<compile_context>
chip_gen: v5e
topology: v5e:2x2
jax: 0.10.0
libtpu: 0.0.40
codegen_flags: <defaults>
</compile_context>

<pallas_src>
import functools

import jax
import jax.numpy as jnp
from jax.experimental import pallas as pl
from jax.experimental.pallas import tpu as pltpu


def _round_up(n, m):
    return ((n + m - 1) // m) * m


def _mlp_kernel(x_ref, w1_ref, b1_ref, w2_ref, b2_ref, o_ref, *, precision):
    """Fused fc1 -> ReLU -> fc2 for one batch tile (hidden stays in VMEM)."""
    # Cast the activations in-kernel (VPU) instead of a wrapper-side XLA op.
    x = x_ref[...].astype(w1_ref.dtype)
    # fc1 on the MXU with f32 accumulation; bias add + ReLU in f32 on the VPU.
    h = jnp.dot(x, w1_ref[...], preferred_element_type=jnp.float32,
                precision=precision)
    h = jnp.maximum(h + b1_ref[...], 0.0)
    # fc2: back to the MXU compute dtype, accumulate in f32.
    o_ref[...] = (
        jnp.dot(h.astype(w2_ref.dtype), w2_ref[...],
                preferred_element_type=jnp.float32, precision=precision)
        + b2_ref[...]
    )


def prepare_params(w1, b1, w2, b2, *, compute_dtype=jnp.float32,
                   pad_output_lanes=False):
    """Cast + zero-pad parameters ONCE (call at init, not per forward call).

    w1: (input_size, hidden)    fc1 weight (pre-transposed vs PyTorch)
    b1: (hidden,)               fc1 bias
    w2: (hidden, num_classes)   fc2 weight (pre-transposed vs PyTorch)
    b2: (num_classes,)          fc2 bias

    Zero padding is mathematically exact: padded hidden units see zero weight
    columns + zero bias -> relu(0)=0 -> multiply zero w2 rows; padded classes
    (if pad_output_lanes) are sliced off after the kernel.
    """
    input_size, hidden = w1.shape
    num_classes = w2.shape[1]
    hid_p = _round_up(hidden, 128)
    cls_p = _round_up(num_classes, 128) if pad_output_lanes else num_classes

    w1_p = jnp.pad(jnp.asarray(w1, compute_dtype), ((0, 0), (0, hid_p - hidden)))
    b1_p = jnp.pad(jnp.asarray(b1, jnp.float32).reshape(1, hidden),
                   ((0, 0), (0, hid_p - hidden)))
    w2_p = jnp.pad(jnp.asarray(w2, compute_dtype),
                   ((0, hid_p - hidden), (0, cls_p - num_classes)))
    b2_p = jnp.pad(jnp.asarray(b2, jnp.float32).reshape(1, num_classes),
                   ((0, 0), (0, cls_p - num_classes)))
    return dict(w1=w1_p, b1=b1_p, w2=w2_p, b2=b2_p,
                input_size=input_size, num_classes=num_classes,
                compute_dtype=jnp.dtype(compute_dtype),
                pad_output_lanes=pad_output_lanes)


def _choose_batch_tile(B, block_b):
    """Pick (batch_tile, padded_batch) minimizing padded rows & pipeline bubbles."""
    if B <= 2 * block_b:
        # 1-2 grid steps never hide the DMA prologue anyway: run one full-batch
        # step with an unpadded full-dim block.
        return B, B
    # Aim for >= ~4 grid steps so each TensorCore (v7x megacore) gets >= 2.
    tb = min(block_b, _round_up(-(-B // 4), 8))
    tb = _round_up(tb, 8)
    if B % 8 == 0:
        # Prefer a tile that divides B exactly (no padded rows), but only if it
        # is not drastically smaller than the requested tile.
        cand = tb
        while cand >= 8 and B % cand != 0:
            cand -= 8
        if cand >= max(64, tb // 2):
            return cand, B
    return tb, _round_up(B, tb)


def _pallas_forward(x_in, w1_p, b1_p, w2_p, b2_p, *, tb, grid_b, precision,
                    vmem_limit, cost, single_buffer_weights):
    b_p, input_size = x_in.shape
    hid_p = w1_p.shape[1]
    out_cols = w2_p.shape[1]
    # Constant-index resident operands: single-buffered (saves VMEM, esp. v7x).
    const_kw = dict(pipeline_mode=pl.Buffered(1)) if single_buffer_weights else {}

    return pl.pallas_call(
        functools.partial(_mlp_kernel, precision=precision),
        out_shape=jax.ShapeDtypeStruct((b_p, out_cols), jnp.float32),
        grid=(grid_b,),
        in_specs=[
            pl.BlockSpec((tb, input_size), lambda i: (i, 0)),          # batch-tiled x
            pl.BlockSpec((input_size, hid_p), lambda i: (0, 0), **const_kw),
            pl.BlockSpec((1, hid_p), lambda i: (0, 0), **const_kw),
            pl.BlockSpec((hid_p, out_cols), lambda i: (0, 0), **const_kw),
            pl.BlockSpec((1, out_cols), lambda i: (0, 0), **const_kw),
        ],
        out_specs=pl.BlockSpec((tb, out_cols), lambda i: (i, 0)),
        compiler_params=pltpu.CompilerParams(
            # Shard batch tiles across v7x TensorCores only when there is more
            # than one grid step; otherwise keep it a plain sequential step.
            dimension_semantics=("parallel",) if grid_b > 1 else ("arbitrary",),
            vmem_limit_bytes=vmem_limit,
        ),
        cost_estimate=cost,
    )(x_in, w1_p, b1_p, w2_p, b2_p)


def value_model_forward(x, params, *, block_b=512):
    """Forward pass of Value_model: fc2(relu(fc1(x.float()))).

    x      : (B, input_size), any float dtype (cast like x.float() in-kernel)
    params : output of prepare_params()
    returns (B, num_classes) float32
    """
    B, input_size = x.shape
    w1_p, b1_p, w2_p, b2_p = params["w1"], params["b1"], params["w2"], params["b2"]
    num_classes = params["num_classes"]
    compute_dtype = params["compute_dtype"]
    if params["input_size"] != input_size:
        raise ValueError("x feature dim does not match prepared params")
    hid_p = w1_p.shape[1]
    out_cols = w2_p.shape[1]

    precision = (jax.lax.Precision.HIGHEST
                 if compute_dtype == jnp.float32 else None)

    tb, b_p = _choose_batch_tile(B, block_b)
    grid_b = b_p // tb
    # Only pad the batch when no exact tiling was found (rare); never pad/cast
    # the feature dim of x — Mosaic handles the un-aligned K internally.
    x_in = x if b_p == B else jnp.pad(x, ((0, b_p - B), (0, 0)))

    itemsize = jnp.dtype(compute_dtype).itemsize
    vmem_needed = (
        (w1_p.size + w2_p.size) * itemsize        # resident weights (Buffered(1))
        + (b1_p.size + b2_p.size) * 4             # resident f32 biases
        + 2 * tb * input_size * x_in.dtype.itemsize   # double-buffered x tiles
        + 2 * tb * out_cols * 4                   # double-buffered output tiles
        + tb * hid_p * 4                          # f32 hidden activation
        + tb * input_size * itemsize              # in-kernel x cast temp
    )
    vmem_limit = min(max(int(1.5 * vmem_needed) + (4 << 20), 32 << 20), 100 << 20)

    cost = pl.CostEstimate(
        flops=2 * b_p * (input_size * hid_p + hid_p * out_cols),
        transcendentals=0,
        bytes_accessed=(
            x_in.size * x_in.dtype.itemsize
            + (w1_p.size + w2_p.size) * itemsize
            + (b1_p.size + b2_p.size) * 4
            + b_p * out_cols * 4
        ),
    )

    kwargs = dict(tb=tb, grid_b=grid_b, precision=precision,
                  vmem_limit=vmem_limit, cost=cost)
    try:
        out = _pallas_forward(x_in, w1_p, b1_p, w2_p, b2_p,
                              single_buffer_weights=True, **kwargs)
    except Exception:
        # Fallback if this Pallas version rejects Buffered(1) on constant blocks.
        out = _pallas_forward(x_in, w1_p, b1_p, w2_p, b2_p,
                              single_buffer_weights=False, **kwargs)

    if b_p != B or out_cols != num_classes:
        # TODO(synk): fold this slice into the consumer (or use donation) when
        # callers can accept the padded buffer, to avoid an extra HBM copy.
        out = out[:B, :num_classes]
    return out


def make_params(key, input_size, hidden_size, num_classes):
    """Deterministic synthetic parameters (PyTorch Linear layers, pre-transposed)."""
    k1, k2, k3, k4 = jax.random.split(key, 4)
    w1 = jax.random.normal(k1, (input_size, hidden_size), jnp.float32) * 0.1
    b1 = jax.random.normal(k2, (hidden_size,), jnp.float32) * 0.1
    w2 = jax.random.normal(k3, (hidden_size, num_classes), jnp.float32) * 0.1
    b2 = jax.random.normal(k4, (num_classes,), jnp.float32) * 0.1
    return w1, b1, w2, b2


if __name__ == "__main__":
    # Small shapes consistent with the module; feature dims deliberately not
    # multiples of 128 and num_classes tiny, so padding/alignment paths are hit.
    batch, input_size, hidden_size, num_classes = 200, 48, 64, 10

    key = jax.random.PRNGKey(0)
    kx, kp = jax.random.split(key)
    x = jax.random.normal(kx, (batch, input_size), jnp.float32)
    w1, b1, w2, b2 = make_params(kp, input_size, hidden_size, num_classes)

    # Pure-JAX reference of the module's forward.
    ref = jnp.maximum(x @ w1 + b1[None, :], 0.0) @ w2 + b2[None, :]

    # Default f32 path (matches PyTorch f32 semantics), unpadded output store,
    # params prepared once (as they would be at model init).
    params_f32 = prepare_params(w1, b1, w2, b2)
    out_f32 = jax.block_until_ready(value_model_forward(x, params_f32))
    assert out_f32.shape == (batch, num_classes)
    assert jnp.allclose(out_f32, ref, atol=1e-4, rtol=1e-4)

    # Explicit opt-in bf16 MXU fast path with lane-dense (padded) output store.
    params_bf16 = prepare_params(w1, b1, w2, b2, compute_dtype=jnp.bfloat16,
                                 pad_output_lanes=True)
    out_bf16 = jax.block_until_ready(value_model_forward(x, params_bf16))
    assert out_bf16.shape == (batch, num_classes)
    assert jnp.allclose(out_bf16, ref, atol=3e-2, rtol=3e-2)

    print("KERNEL_OK")
</pallas_src>

<mosaic_0001>
module attributes {stable_mosaic.version = 11 : i64} {
  func.func @_mlp_kernel(%arg0: i32, %arg1: memref<200x48xf32, #tpu.memory_space<vmem>>, %arg2: memref<48x128xf32, #tpu.memory_space<vmem>>, %arg3: memref<1x128xf32, #tpu.memory_space<vmem>>, %arg4: memref<128x10xf32, #tpu.memory_space<vmem>>, %arg5: memref<1x10xf32, #tpu.memory_space<vmem>>, %arg6: memref<200x10xf32, #tpu.memory_space<vmem>>) attributes {dimension_semantics = [#tpu.dimension_semantics<arbitrary>], iteration_bounds = array<i64: 1>, scalar_prefetch = 0 : i64, scratch_operands = 0 : i64, tpu.core_type = #tpu.core_type<tc>, window_params = [{transform_indices = @transform_0, window_bounds = array<i64: 200, 48>}, {pipeline_mode = #tpu.pipeline_mode<synchronous>, transform_indices = @transform_1, window_bounds = array<i64: 48, 128>}, {pipeline_mode = #tpu.pipeline_mode<synchronous>, transform_indices = @transform_2, window_bounds = array<i64: 1, 128>}, {pipeline_mode = #tpu.pipeline_mode<synchronous>, transform_indices = @transform_3, window_bounds = array<i64: 128, 10>}, {pipeline_mode = #tpu.pipeline_mode<synchronous>, transform_indices = @transform_4, window_bounds = array<i64: 1, 10>}, {transform_indices = @transform_5, window_bounds = array<i64: 200, 10>}]} {
    %c0 = arith.constant 0 : index
    %c0_0 = arith.constant 0 : index
    %0 = vector.load %arg1[%c0, %c0_0] : memref<200x48xf32, #tpu.memory_space<vmem>>, vector<200x48xf32>
    %c0_1 = arith.constant 0 : index
    %c0_2 = arith.constant 0 : index
    %1 = vector.load %arg2[%c0_1, %c0_2] : memref<48x128xf32, #tpu.memory_space<vmem>>, vector<48x128xf32>
    %cst = arith.constant dense<0.000000e+00> : vector<200x128xf32>
    %2 = tpu.matmul %0, %1, %cst {dimension_numbers = #tpu.dot_dimension_numbers<[1], [0], [0], [1], [0, 0, 1, 1], [], []>, precision = #tpu.contract_precision<fp32>} : vector<200x48xf32>, vector<48x128xf32>, vector<200x128xf32> -> vector<200x128xf32>
    %c0_3 = arith.constant 0 : index
    %c0_4 = arith.constant 0 : index
    %3 = vector.load %arg3[%c0_3, %c0_4] : memref<1x128xf32, #tpu.memory_space<vmem>>, vector<1x128xf32>
    %4 = vector.broadcast %3 : vector<1x128xf32> to vector<200x128xf32>
    %5 = arith.addf %2, %4 : vector<200x128xf32>
    %cst_5 = arith.constant 0.000000e+00 : f32
    %6 = vector.broadcast %cst_5 : f32 to vector<200x128xf32>
    %7 = arith.maximumf %5, %6 : vector<200x128xf32>
    %c0_6 = arith.constant 0 : index
    %c0_7 = arith.constant 0 : index
    %8 = vector.load %arg4[%c0_6, %c0_7] : memref<128x10xf32, #tpu.memory_space<vmem>>, vector<128x10xf32>
    %cst_8 = arith.constant dense<0.000000e+00> : vector<200x10xf32>
    %9 = tpu.matmul %7, %8, %cst_8 {dimension_numbers = #tpu.dot_dimension_numbers<[1], [0], [0], [1], [0, 0, 1, 1], [], []>, precision = #tpu.contract_precision<fp32>} : vector<200x128xf32>, vector<128x10xf32>, vector<200x10xf32> -> vector<200x10xf32>
    %c0_9 = arith.constant 0 : index
    %c0_10 = arith.constant 0 : index
    %10 = vector.load %arg5[%c0_9, %c0_10] : memref<1x10xf32, #tpu.memory_space<vmem>>, vector<1x10xf32>
    %11 = vector.broadcast %10 : vector<1x10xf32> to vector<200x10xf32>
    %12 = arith.addf %9, %11 : vector<200x10xf32>
    %c0_11 = arith.constant 0 : index
    %c0_12 = arith.constant 0 : index
    %13 = vector.load %arg6[%c0_11, %c0_12] : memref<200x10xf32, #tpu.memory_space<vmem>>, vector<200x10xf32>
    tpu.vector_store %arg6[%c0_11, %c0_12], %12 {strides = array<i32>} : memref<200x10xf32, #tpu.memory_space<vmem>>, vector<200x10xf32>,
    return
  }
  func.func @transform_0(%arg0: i32) -> (i32, i32) {
    %c0_i32 = arith.constant 0 : i32
    %c0_i32_0 = arith.constant 0 : i32
    return %arg0, %c0_i32 : i32, i32
  }
  func.func @transform_1(%arg0: i32) -> (i32, i32) {
    %c0_i32 = arith.constant 0 : i32
    %c0_i32_0 = arith.constant 0 : i32
    %c0_i32_1 = arith.constant 0 : i32
    return %c0_i32, %c0_i32_0 : i32, i32
  }
  func.func @transform_2(%arg0: i32) -> (i32, i32) {
    %c0_i32 = arith.constant 0 : i32
    %c0_i32_0 = arith.constant 0 : i32
    %c0_i32_1 = arith.constant 0 : i32
    return %c0_i32, %c0_i32_0 : i32, i32
  }
  func.func @transform_3(%arg0: i32) -> (i32, i32) {
    %c0_i32 = arith.constant 0 : i32
    %c0_i32_0 = arith.constant 0 : i32
    %c0_i32_1 = arith.constant 0 : i32
    return %c0_i32, %c0_i32_0 : i32, i32
  }
  func.func @transform_4(%arg0: i32) -> (i32, i32) {
    %c0_i32 = arith.constant 0 : i32
    %c0_i32_0 = arith.constant 0 : i32
    %c0_i32_1 = arith.constant 0 : i32
    return %c0_i32, %c0_i32_0 : i32, i32
  }
  func.func @transform_5(%arg0: i32) -> (i32, i32) {
    %c0_i32 = arith.constant 0 : i32
    %c0_i32_0 = arith.constant 0 : i32
    return %arg0, %c0_i32 : i32, i32
  }
}

module attributes {stable_mosaic.version = 11 : i64} {
  func.func @_mlp_kernel(%arg0: i32, %arg1: memref<200x48xf32, #tpu.memory_space<vmem>>, %arg2: memref<48x128xf32, #tpu.memory_space<vmem>>, %arg3: memref<1x128xf32, #tpu.memory_space<vmem>>, %arg4: memref<128x10xf32, #tpu.memory_space<vmem>>, %arg5: memref<1x10xf32, #tpu.memory_space<vmem>>, %arg6: memref<200x10xf32, #tpu.memory_space<vmem>>) attributes {dimension_semantics = [#tpu.dimension_semantics<arbitrary>], iteration_bounds = array<i64: 1>, scalar_prefetch = 0 : i64, scratch_operands = 0 : i64, tpu.core_type = #tpu.core_type<tc>, window_params = [{transform_indices = @transform_0, window_bounds = array<i64: 200, 48>}, {pipeline_mode = #tpu.pipeline_mode<synchronous>, transform_indices = @transform_1, window_bounds = array<i64: 48, 128>}, {pipeline_mode = #tpu.pipeline_mode<synchronous>, transform_indices = @transform_2, window_bounds = array<i64: 1, 128>}, {pipeline_mode = #tpu.pipeline_mode<synchronous>, transform_indices = @transform_3, window_bounds = array<i64: 128, 10>}, {pipeline_mode = #tpu.pipeline_mode<synchronous>, transform_indices = @transform_4, window_bounds = array<i64: 1, 10>}, {transform_indices = @transform_5, window_bounds = array<i64: 200, 10>}]} {
    %c0 = arith.constant 0 : index
    %c0_0 = arith.constant 0 : index
    %0 = vector.load %arg1[%c0, %c0_0] : memref<200x48xf32, #tpu.memory_space<vmem>>, vector<200x48xf32>
    %c0_1 = arith.constant 0 : index
    %c0_2 = arith.constant 0 : index
    %1 = vector.load %arg2[%c0_1, %c0_2] : memref<48x128xf32, #tpu.memory_space<vmem>>, vector<48x128xf32>
    %cst = arith.constant dense<0.000000e+00> : vector<200x128xf32>
    %2 = tpu.matmul %0, %1, %cst {dimension_numbers = #tpu.dot_dimension_numbers<[1], [0], [0], [1], [0, 0, 1, 1], [], []>, precision = #tpu.contract_precision<fp32>} : vector<200x48xf32>, vector<48x128xf32>, vector<200x128xf32> -> vector<200x128xf32>
    %c0_3 = arith.constant 0 : index
    %c0_4 = arith.constant 0 : index
    %3 = vector.load %arg3[%c0_3, %c0_4] : memref<1x128xf32, #tpu.memory_space<vmem>>, vector<1x128xf32>
    %4 = vector.broadcast %3 : vector<1x128xf32> to vector<200x128xf32>
    %5 = arith.addf %2, %4 : vector<200x128xf32>
    %cst_5 = arith.constant 0.000000e+00 : f32
    %6 = vector.broadcast %cst_5 : f32 to vector<200x128xf32>
    %7 = arith.maximumf %5, %6 : vector<200x128xf32>
    %c0_6 = arith.constant 0 : index
    %c0_7 = arith.constant 0 : index
    %8 = vector.load %arg4[%c0_6, %c0_7] : memref<128x10xf32, #tpu.memory_space<vmem>>, vector<128x10xf32>
    %cst_8 = arith.constant dense<0.000000e+00> : vector<200x10xf32>
    %9 = tpu.matmul %7, %8, %cst_8 {dimension_numbers = #tpu.dot_dimension_numbers<[1], [0], [0], [1], [0, 0, 1, 1], [], []>, precision = #tpu.contract_precision<fp32>} : vector<200x128xf32>, vector<128x10xf32>, vector<200x10xf32> -> vector<200x10xf32>
    %c0_9 = arith.constant 0 : index
    %c0_10 = arith.constant 0 : index
    %10 = vector.load %arg5[%c0_9, %c0_10] : memref<1x10xf32, #tpu.memory_space<vmem>>, vector<1x10xf32>
    %11 = vector.broadcast %10 : vector<1x10xf32> to vector<200x10xf32>
    %12 = arith.addf %9, %11 : vector<200x10xf32>
    %c0_11 = arith.constant 0 : index
    %c0_12 = arith.constant 0 : index
    %13 = vector.load %arg6[%c0_11, %c0_12] : memref<200x10xf32, #tpu.memory_space<vmem>>, vector<200x10xf32>
    tpu.vector_store %arg6[%c0_11, %c0_12], %12 {strides = array<i32>} : memref<200x10xf32, #tpu.memory_space<vmem>>, vector<200x10xf32>,
    return
  }
  func.func @transform_0(%arg0: i32) -> (i32, i32) {
    %c0_i32 = arith.constant 0 : i32
    %c0_i32_0 = arith.constant 0 : i32
    return %arg0, %c0_i32 : i32, i32
  }
  func.func @transform_1(%arg0: i32) -> (i32, i32) {
    %c0_i32 = arith.constant 0 : i32
    %c0_i32_0 = arith.constant 0 : i32
    %c0_i32_1 = arith.constant 0 : i32
    return %c0_i32, %c0_i32_0 : i32, i32
  }
  func.func @transform_2(%arg0: i32) -> (i32, i32) {
    %c0_i32 = arith.constant 0 : i32
    %c0_i32_0 = arith.constant 0 : i32
    %c0_i32_1 = arith.constant 0 : i32
    return %c0_i32, %c0_i32_0 : i32, i32
  }
  func.func @transform_3(%arg0: i32) -> (i32, i32) {
    %c0_i32 = arith.constant 0 : i32
    %c0_i32_0 = arith.constant 0 : i32
    %c0_i32_1 = arith.constant 0 : i32
    return %c0_i32, %c0_i32_0 : i32, i32
  }
  func.func @transform_4(%arg0: i32) -> (i32, i32) {
    %c0_i32 = arith.constant 0 : i32
    %c0_i32_0 = arith.constant 0 : i32
    %c0_i32_1 = arith.constant 0 : i32
    return %c0_i32, %c0_i32_0 : i32, i32
  }
  func.func @transform_5(%arg0: i32) -> (i32, i32) {
    %c0_i32 = arith.constant 0 : i32
    %c0_i32_0 = arith.constant 0 : i32
    return %arg0, %c0_i32 : i32, i32
  }
}

</mosaic_0001>

<bundles_post_ra>
// kernel: tpu_custom_call.1
= control target key start
LH: loop header
LB: loop body
LE: loop exit
PB: predicated region body
PF: predicated region fallthrough
CT: control target
= control target key end

     0   :  { %vm55_vm0 = vcmask 392192   ;;  %vm2216_vm1 = vcmask 80896   ;;  %s3816_s1 = inlined_call_operand.vmem [shape: f32[48,128], index: 1, kind: input, shape index: {}]   ;;  %s3817_s0 = inlined_call_operand.vmem [shape: f32[200,48], index: 0, kind: input, shape index: {}]   ;;  %s3818_s2 = inlined_call_operand.vmem [shape: f32[1,128], index: 2, kind: input, shape index: {}]   ;;  %s3819_s3 = inlined_call_operand.vmem [shape: f32[128,10], index: 3, kind: input, shape index: {}]   ;;  %s3820_s4 = inlined_call_operand.vmem [shape: f32[1,10], index: 4, kind: input, shape index: {}]   ;;  %s3821_s5 = inlined_call_operand.vmem [shape: f32[200,10], index: 5, kind: output, shape index: {}]  }
   0x1   :  { %v50_v0 = vld [vmem:[%s3816_s1 + $0x28] sm:$0xff]  ;;  %v49_v1 = vld [vmem:[%s3816_s1 + $0x20] sm:$0xff]  ;;  %v48_v2 = vld [vmem:[%s3816_s1 + $0x18] sm:$0xff] }
   0x2   :  { %v2288_v3 = vand.u32 4294901760, %v50_v0  ;;  %v2290_v4 = vand.u32 4294901760, %v49_v1  ;;  %v2292_v5 = vand.u32 4294901760, %v48_v2  ;;  %v47_v6 = vld [vmem:[%s3816_s1 + $0x10] sm:$0xff]  ;;  %v46_v7 = vld [vmem:[%s3816_s1 + $0x8] sm:$0xff]  ;;  %v45_v8 = vld [vmem:[%s3816_s1] sm:$0xff] }
   0x3   :  { %v2303_v9 = vand.u32 4294901760, %v47_v6  ;;  %v2305_v10 = vand.u32 4294901760, %v46_v7  ;;  %v2307_v11 = vand.u32 4294901760, %v45_v8  ;;  %v20_v12 = vld [vmem:[%s3817_s0] sm:$0xff]  ;;  %v21_v13 = vld [vmem:[%s3817_s0 + $0x8] sm:$0xff]  ;;  %v22_v35 = vld [vmem:[%s3817_s0 + $0x10] sm:$0xff] }
   0x4   :  { %142 = vmatpush.msra.mxu0 %v2288_v3  ;;  %v2317_v14 = vsub.f32 %v50_v0, %v2288_v3  ;;  %v2320_v15 = vsub.f32 %v49_v1, %v2290_v4  ;;  %666 = vmatpush.msra.mxu3 %v2288_v3  ;;  %v2324_v16 = vsub.f32 %v48_v2, %v2292_v5  ;;  %v57_v17 = vsel %vm55_vm0, %v20_v12, 0  ;;  %v23_v47 = vld [vmem:[%s3817_s0 + $0x18] sm:$0xff]  ;;  %v24_v58 = vld [vmem:[%s3817_s0 + $0x20] sm:$0xff]  ;;  %v25_v1 = vld [vmem:[%s3817_s0 + $0x28] sm:$0xff] }
   0x5   :  { %v2328_v18 = vsub.f32 %v47_v6, %v2303_v9  ;;  %v2330_v19 = vand.u32 4294901760, %v57_v17  ;;  %v2333_v20 = vsub.f32 %v46_v7, %v2305_v10  ;;  %v2336_v21 = vsub.f32 %v45_v8, %v2307_v11  ;;  %v26_v8 = vld [vmem:[%s3817_s0 + $0x30] sm:$0xff] }
   0x6   :  { %144 = vmatpush.msra.mxu0 %v2290_v4  ;;  %513 = vmatpush.msra.mxu2 %v2317_v14  ;;  %v366_v22 = vand.u32 4294901760, %v2317_v14  ;;  %v372_v23 = vand.u32 4294901760, %v2320_v15  ;;  %v378_v24 = vand.u32 4294901760, %v2324_v16  ;;  %v60_v25 = vsel %vm55_vm0, %v21_v13, 0 }
   0x7   :  { %668 = vmatpush.msra.mxu3 %v2290_v4  ;;  %v154_v26 = vsub.f32 %v57_v17, %v2330_v19  ;;  %v384_v27 = vand.u32 4294901760, %v2328_v18  ;;  %v390_v28 = vand.u32 4294901760, %v2333_v20  ;;  %v2355_v32 = vand.u32 4294901760, %v60_v25 }
   0x8   :  { %146 = vmatpush.msra.mxu0 %v2292_v5  ;;  %516 = vmatpush.msra.mxu2 %v2320_v15  ;;  %v367_v29 = vsub.f32 %v2317_v14, %v366_v22  ;;  %v373_v30 = vsub.f32 %v2320_v15, %v372_v23  ;;  %v379_v31 = vsub.f32 %v2324_v16, %v378_v24  ;;  %v396_v34 = vand.u32 4294901760, %v2336_v21  ;;  %v27_v15 = vld [vmem:[%s3817_s0 + $0x38] sm:$0xff] }
   0x9   :  { %670 = vmatpush.msra.mxu3 %v2292_v5  ;;  %v155_v33 = vand.u32 4294901760, %v154_v26  ;;  %v385_v38 = vsub.f32 %v2328_v18, %v384_v27  ;;  %v162_v39 = vsub.f32 %v60_v25, %v2355_v32  ;;  %v391_v42 = vsub.f32 %v2333_v20, %v390_v28 }
   0xa   :  { %148 = vmatpush.msra.mxu0 %v2303_v9  ;;  %v368_v36 = vand.u32 4294901760, %v367_v29  ;;  %519 = vmatpush.msra.mxu2 %v2324_v16  ;;  %v374_v37 = vand.u32 4294901760, %v373_v30  ;;  %v380_v41 = vand.u32 4294901760, %v379_v31  ;;  %v63_v44 = vsel %vm55_vm0, %v22_v35, 0  ;;  %v29_v30 = vld [vmem:[%s3817_s0 + $0x48] sm:$0xff] }
   0xb   :  { %v156_v40 = vsub.f32 %v154_v26, %v155_v33  ;;  %672 = vmatpush.msra.mxu3 %v2303_v9  ;;  %v163_v43 = vand.u32 4294901760, %v162_v39  ;;  %v2376_v46 = vand.u32 4294901760, %v63_v44  ;;  %v386_v48 = vand.u32 4294901760, %v385_v38  ;;  %v30_v38 = vld [vmem:[%s3817_s0 + $0x50] sm:$0xff] }
   0xc   :  { %150 = vmatpush.msra.mxu0 %v2305_v10  ;;  %369 = vmatpush.msra.mxu1 %v368_v36  ;;  %v397_v49 = vsub.f32 %v2336_v21, %v396_v34  ;;  %v392_v52 = vand.u32 4294901760, %v391_v42  ;;  %v66_v53 = vsel %vm55_vm0, %v23_v47, 0  ;;  %v69_v61 = vsel %vm55_vm0, %v24_v58, 0 }
   0xd   :  { %522 = vmatpush.msra.mxu2 %v2328_v18  ;;  %v157_v45 = vand.u32 4294901760, %v156_v40  ;;  %674 = vmatpush.msra.mxu3 %v2305_v10  ;;  %v164_v50 = vsub.f32 %v162_v39, %v163_v43  ;;  %v170_v51 = vsub.f32 %v63_v44, %v2376_v46  ;;  %v2390_v57 = vand.u32 4294901760, %v66_v53 }
   0xe   :  { %152 = vmatpush.msra.mxu0 %v2307_v11  ;;  %375 = vmatpush.msra.mxu1 %v374_v37  ;;  %v398_v54 = vand.u32 4294901760, %v397_v49  ;;  %v2402_v0 = vand.u32 4294901760, %v69_v61  ;;  %v75_v12 = vsel %vm55_vm0, %v26_v8, 0  ;;  %v78_v18 = vsel %vm55_vm0, %v27_v15, 0 }
   0xf   :  { %158 = vmatmul.f32.vlgmr.msra.gmra.mxu0 %v157_v45  ;;  %525 = vmatpush.msra.mxu2 %v2333_v20  ;;  %v165_v55 = vand.u32 4294901760, %v164_v50  ;;  %v171_v56 = vand.u32 4294901760, %v170_v51  ;;  %v178_v60 = vsub.f32 %v66_v53, %v2390_v57  ;;  %v2428_v14 = vand.u32 4294901760, %v75_v12  ;;  %v31_v45 = vld [vmem:[%s3817_s0 + $0x58] sm:$0xff]  ;;  %v32_v53 = vld [vmem:[%s3817_s0 + $0x60] sm:$0xff] }
  0x10   :  { %381 = vmatpush.msra.mxu1 %v380_v41  ;;  %676 = vmatpush.msra.mxu3 %v2307_v11  ;;  %v87_v41 = vsel %vm55_vm0, %v30_v38, 0  ;;  %v90_v49 = vsel %vm55_vm0, %v31_v45, 0 }
  0x11   :  { %528 = vmatpush.msra.mxu2 %v2336_v21  ;;  %680 = vmatmul.f32.vlgmr.msra.gmra.mxu3 %v155_v33  ;;  %v172_v59 = vsub.f32 %v170_v51, %v171_v56  ;;  %v179_v63 = vand.u32 4294901760, %v178_v60  ;;  %v202_v17 = vsub.f32 %v75_v12, %v2428_v14  ;;  %v2460_v44 = vand.u32 4294901760, %v87_v41 }
  0x12   :  { %387 = vmatpush.msra.mxu1 %v386_v48  ;;  %531 = vmatmul.f32.vlgmr.msra.gmra.mxu2 %v154_v26 }
  0x13   :  { %841 = vmatpush.msrb.mxu0 %v366_v22  ;;  %v173_v62 = vand.u32 4294901760, %v172_v59  ;;  %v180_v2 = vsub.f32 %v178_v60, %v179_v63  ;;  %v203_v21 = vand.u32 4294901760, %v202_v17  ;;  %v2436_v22 = vand.u32 4294901760, %v78_v18 }
  0x14   :  { %393 = vmatpush.msra.mxu1 %v392_v52  ;;  %v234_v48 = vsub.f32 %v87_v41, %v2460_v44  ;;  %v2468_v52 = vand.u32 4294901760, %v90_v49 }
  0x15   :  { %845 = vmatpush.msrb.mxu0 %v372_v23  ;;  %v28_v23 = vld [vmem:[%s3817_s0 + $0x40] sm:$0xff]  ;;  %v210_v25 = vsub.f32 %v78_v18, %v2436_v22 }
  0x16   :  { %399 = vmatpush.msra.mxu1 %v398_v54  ;;  %v81_v26 = vsel %vm55_vm0, %v28_v23, 0  ;;  %v36_v23 = vld [vmem:[%s3817_s0 + $0x80] sm:$0xff] }
  0x17   :  { %166 = vmatmul.f32.gmra.mxu0 %v165_v55  ;;  %401 = vmatmul.f32.vlgmr.msra.gmra.mxu1 %v2330_v19  ;;  %v2444_v29 = vand.u32 4294901760, %v81_v26  ;;  %v242_v55 = vsub.f32 %v90_v49, %v2468_v52 }
  0x18   :  { %974 = vmatpush.msrb.mxu1 %v2288_v3  ;;  %849 = vmatpush.msrb.mxu0 %v378_v24  ;;  %v186_v3 = vsub.f32 %v69_v61, %v2402_v0  ;;  %v204_v24 = vsub.f32 %v202_v17, %v203_v21  ;;  %v33_v61 = vld [vmem:[%s3817_s0 + $0x68] sm:$0xff] }
  0x19   :  { %686 = vmatmul.f32.gmra.mxu3 %v163_v43  ;;  %v218_v33 = vsub.f32 %v81_v26, %v2444_v29  ;;  %v243_v59 = vand.u32 4294901760, %v242_v55  ;;  %v105_v26 = vsel %vm55_vm0, %v36_v23, 0 }
  0x1a   :  { %536 = vmatmul.f32.gmra.mxu2 %v162_v39  ;;  %976 = vmatpush.msrb.mxu1 %v2290_v4  ;;  %v72_v4 = vsel %vm55_vm0, %v25_v1, 0  ;;  %v187_v6 = vand.u32 4294901760, %v186_v3  ;;  %v96_v1 = vsel %vm55_vm0, %v33_v61, 0 }
  0x1b   :  { %853 = vmatpush.msrb.mxu0 %v384_v27  ;;  %v2420_v7 = vand.u32 4294901760, %v72_v4  ;;  %v205_v27 = vand.u32 4294901760, %v204_v24  ;;  %v219_v36 = vand.u32 4294901760, %v218_v33 }
  0x1c   :  { %978 = vmatpush.msrb.mxu1 %v2292_v5  ;;  %v181_v5 = vand.u32 4294901760, %v180_v2 }
  0x1d   :  { %857 = vmatpush.msrb.mxu0 %v390_v28  ;;  %v211_v28 = vand.u32 4294901760, %v210_v25  ;;  %v220_v39 = vsub.f32 %v218_v33, %v219_v36 }
  0x1e   :  { %980 = vmatpush.msrb.mxu1 %v2303_v9  ;;  %v188_v9 = vsub.f32 %v186_v3, %v187_v6 }
  0x1f   :  { %174 = vmatmul.f32.gmra.mxu0 %v173_v62  ;;  %405 = vmatmul.f32.gmra.mxu1 %v2355_v32  ;;  %v212_v31 = vsub.f32 %v210_v25, %v211_v28  ;;  %v221_v42 = vand.u32 4294901760, %v220_v39  ;;  %v244_v62 = vsub.f32 %v242_v55, %v243_v59 }
  0x20   :  { %982 = vmatpush.msrb.mxu1 %v2305_v10  ;;  %861 = vmatpush.msrb.mxu0 %v396_v34  ;;  %v194_v10 = vsub.f32 %v72_v4, %v2420_v7  ;;  %v189_v13 = vand.u32 4294901760, %v188_v9  ;;  %v84_v34 = vsel %vm55_vm0, %v29_v30, 0  ;;  %v2484_v4 = vand.u32 4294901760, %v96_v1 }
  0x21   :  { %692 = vmatmul.f32.gmra.mxu3 %v171_v56  ;;  %v213_v35 = vand.u32 4294901760, %v212_v31  ;;  %v2452_v37 = vand.u32 4294901760, %v84_v34  ;;  %v93_v56 = vsel %vm55_vm0, %v32_v53, 0  ;;  %v245_v2 = vand.u32 4294901760, %v244_v62  ;;  %v37_v31 = vld [vmem:[%s3817_s0 + $0x88] sm:$0xff] }
  0x22   :  { %541 = vmatmul.f32.gmra.mxu2 %v170_v51  ;;  %984 = vmatpush.msrb.mxu1 %v2307_v11  ;;  %v195_v11 = vand.u32 4294901760, %v194_v10  ;;  %v235_v51 = vand.u32 4294901760, %v234_v48  ;;  %v258_v8 = vsub.f32 %v96_v1, %v2484_v4  ;;  %v2508_v30 = vand.u32 4294901760, %v105_v26 }
  0x23   :  { %v226_v40 = vsub.f32 %v84_v34, %v2452_v37 }
  0x24   :  { %v196_v16 = vsub.f32 %v194_v10, %v195_v11  ;;  %v236_v54 = vsub.f32 %v234_v48, %v235_v51  ;;  %v259_v12 = vand.u32 4294901760, %v258_v8  ;;  %v282_v34 = vsub.f32 %v105_v26, %v2508_v30 }
  0x25   :  { %v227_v43 = vand.u32 4294901760, %v226_v40 }
  0x26   :  { %v197_v20 = vand.u32 4294901760, %v196_v16  ;;  %v237_v58 = vand.u32 4294901760, %v236_v54  ;;  %v260_v15 = vsub.f32 %v258_v8, %v259_v12  ;;  %v283_v39 = vand.u32 4294901760, %v282_v34 }
  0x27   :  { %182 = vmatmul.f32.gmra.mxu0 %v181_v5  ;;  %409 = vmatmul.f32.gmra.mxu1 %v2376_v46  ;;  %v228_v47 = vsub.f32 %v226_v40, %v227_v43  ;;  %v34_v5 = vld [vmem:[%s3817_s0 + $0x70] sm:$0xff] }
  0x28   :  { %v99_v9 = vsel %vm55_vm0, %v34_v5, 0  ;;  %v261_v18 = vand.u32 4294901760, %v260_v15  ;;  %v284_v45 = vsub.f32 %v282_v34, %v283_v39 }
  0x29   :  { %698 = vmatmul.f32.gmra.mxu3 %v179_v63  ;;  %v229_v50 = vand.u32 4294901760, %v228_v47 }
  0x2a   :  { %546 = vmatmul.f32.gmra.mxu2 %v178_v60  ;;  %v2476_v60 = vand.u32 4294901760, %v93_v56 }
  0x2c   :  { %v250_v63 = vsub.f32 %v93_v56, %v2476_v60 }
  0x2f   :  { %190 = vmatmul.f32.gmra.mxu0 %v189_v13  ;;  %413 = vmatmul.f32.gmra.mxu1 %v2390_v57  ;;  %v2492_v13 = vand.u32 4294901760, %v99_v9 }
  0x31   :  { %704 = vmatmul.f32.gmra.mxu3 %v187_v6  ;;  %v266_v16 = vsub.f32 %v99_v9, %v2492_v13 }
  0x32   :  { %551 = vmatmul.f32.gmra.mxu2 %v186_v3  ;;  %v251_v3 = vand.u32 4294901760, %v250_v63 }
  0x34   :  { %v252_v6 = vsub.f32 %v250_v63, %v251_v3 }
  0x37   :  { %198 = vmatmul.f32.gmra.mxu0 %v197_v20  ;;  %417 = vmatmul.f32.gmra.mxu1 %v2402_v0  ;;  %v267_v20 = vand.u32 4294901760, %v266_v16 }
  0x39   :  { %710 = vmatmul.f32.gmra.mxu3 %v195_v11  ;;  %v35_v11 = vld [vmem:[%s3817_s0 + $0x78] sm:$0xff]  ;;  %v268_v24 = vsub.f32 %v266_v16, %v267_v20 }
  0x3a   :  { %556 = vmatmul.f32.gmra.mxu2 %v194_v10  ;;  %v253_v10 = vand.u32 4294901760, %v252_v6 }
  0x3f   :  { %206 = vmatmul.f32.gmra.mxu0 %v205_v27  ;;  %421 = vmatmul.f32.gmra.mxu1 %v2420_v7  ;;  %v269_v27 = vand.u32 4294901760, %v268_v24 }
  0x41   :  { %716 = vmatmul.f32.gmra.mxu3 %v203_v21 }
  0x42   :  { %561 = vmatmul.f32.gmra.mxu2 %v202_v17  ;;  %v102_v17 = vsel %vm55_vm0, %v35_v11, 0 }
  0x43   :  { %v2500_v21 = vand.u32 4294901760, %v102_v17 }
  0x47   :  { %214 = vmatmul.f32.gmra.mxu0 %v213_v35  ;;  %425 = vmatmul.f32.gmra.mxu1 %v2428_v14  ;;  %v108_v35 = vsel %vm55_vm0, %v37_v31, 0 }
  0x49   :  { %722 = vmatmul.f32.gmra.mxu3 %v211_v28 }
  0x4a   :  { %566 = vmatmul.f32.gmra.mxu2 %v210_v25  ;;  %v274_v25 = vsub.f32 %v102_v17, %v2500_v21 }
  0x4c   :  { %v275_v28 = vand.u32 4294901760, %v274_v25 }
  0x4f   :  { %222 = vmatmul.f32.gmra.mxu0 %v221_v42  ;;  %429 = vmatmul.f32.gmra.mxu1 %v2436_v22  ;;  %v38_v42 = vld [vmem:[%s3817_s0 + $0x90] sm:$0xff] }
  0x50   :  { %v111_v49 = vsel %vm55_vm0, %v38_v42, 0 }
  0x51   :  { %728 = vmatmul.f32.gmra.mxu3 %v219_v36  ;;  %v1126_v36 = vld [vmem:[%s3819_s3 + $0x78] sm:$0xff]  ;;  %v2539_v54 = vand.u32 4294901760, %v111_v49 }
  0x52   :  { %571 = vmatmul.f32.gmra.mxu2 %v218_v33  ;;  %v276_v33 = vsub.f32 %v274_v25, %v275_v28  ;;  %v2521_v41 = vand.u32 4294901760, %v1126_v36 }
  0x53   :  { %v298_v62 = vsub.f32 %v111_v49, %v2539_v54 }
  0x54   :  { %v277_v38 = vand.u32 4294901760, %v276_v33  ;;  %1132 = vmatpush.msrb.mxu2 %v2521_v41  ;;  %1736 = vmatpush.msra.mxu1 %v2521_v41 }
  0x55   :  { %v299_v6 = vand.u32 4294901760, %v298_v62 }
  0x57   :  { %230 = vmatmul.f32.gmra.mxu0 %v229_v50  ;;  %433 = vmatmul.f32.gmra.mxu1 %v2444_v29  ;;  %v300_v23 = vsub.f32 %v298_v62, %v299_v6 }
  0x59   :  { %734 = vmatmul.f32.gmra.mxu3 %v227_v43  ;;  %v2528_v43 = vsub.f32 %v1126_v36, %v2521_v41  ;;  %v301_v31 = vand.u32 4294901760, %v300_v23 }
  0x5a   :  { %576 = vmatmul.f32.gmra.mxu2 %v226_v40  ;;  %v2519_v40 = vand.u32 4294901760, %v108_v35 }
  0x5b   :  { %1563 = vmatpush.msra.mxu0 %v2528_v43 }
  0x5c   :  { %v290_v47 = vsub.f32 %v108_v35, %v2519_v40 }
  0x5e   :  { %v291_v53 = vand.u32 4294901760, %v290_v47 }
  0x5f   :  { %238 = vmatmul.f32.gmra.mxu0 %v237_v58  ;;  %437 = vmatmul.f32.gmra.mxu1 %v2452_v37  ;;  %v2544_v58 = vld [vmem:[%s3818_s2] ss:$0 sm:$0xff] }
  0x60   :  { %v292_v61 = vsub.f32 %v290_v47, %v291_v53 }
  0x61   :  { %740 = vmatmul.f32.gmra.mxu3 %v235_v51  ;;  %v285_v51 = vand.u32 4294901760, %v284_v45 }
  0x62   :  { %581 = vmatmul.f32.gmra.mxu2 %v234_v48  ;;  %v3825_v48 = vand.u32 4294901760, %v2528_v43  ;;  %v293_v5 = vand.u32 4294901760, %v292_v61 }
  0x64   :  { %v1367_v50 = vsub.f32 %v2528_v43, %v3825_v48 }
  0x67   :  { %246 = vmatmul.f32.gmra.mxu0 %v245_v2  ;;  %441 = vmatmul.f32.gmra.mxu1 %v2460_v44  ;;  %v1125_v2 = vld [vmem:[%s3819_s3 + $0x70] sm:$0xff] }
  0x69   :  { %746 = vmatmul.f32.gmra.mxu3 %v243_v59  ;;  %v39_v59 = vld [vmem:[%s3817_s0 + $0x98] sm:$0xff] }
  0x6a   :  { %586 = vmatmul.f32.gmra.mxu2 %v242_v55  ;;  %v1368_v55 = vand.u32 4294901760, %v1367_v50 }
  0x6c   :  { %1369 = vmatpush.msrb.mxu3 %v1368_v55 }
  0x6f   :  { %254 = vmatmul.f32.gmra.mxu0 %v253_v10  ;;  %445 = vmatmul.f32.gmra.mxu1 %v2468_v52 }
  0x71   :  { %752 = vmatmul.f32.gmra.mxu3 %v251_v3  ;;  %v2556_v3 = vand.u32 4294901760, %v1125_v2 }
  0x72   :  { %591 = vmatmul.f32.gmra.mxu2 %v250_v63  ;;  %v114_v63 = vsel %vm55_vm0, %v39_v59, 0 }
  0x73   :  { %1134 = vmatpush.msrb.mxu2 %v2556_v3  ;;  %1738 = vmatpush.msra.mxu1 %v2556_v3 }
  0x77   :  { %262 = vmatmul.f32.gmra.mxu0 %v261_v18  ;;  %449 = vmatmul.f32.gmra.mxu1 %v2476_v60 }
  0x79   :  { %758 = vmatmul.f32.gmra.mxu3 %v259_v12  ;;  %v2564_v12 = vsub.f32 %v1125_v2, %v2556_v3 }
  0x7a   :  { %596 = vmatmul.f32.gmra.mxu2 %v258_v8  ;;  %v2558_v8 = vand.u32 4294901760, %v114_v63 }
  0x7b   :  { %v3824_v18 = vand.u32 4294901760, %v2564_v12  ;;  %1566 = vmatpush.msra.mxu0 %v2564_v12 }
  0x7c   :  { %v306_v24 = vsub.f32 %v114_v63, %v2558_v8 }
  0x7d   :  { %v1373_v26 = vsub.f32 %v2564_v12, %v3824_v18 }
  0x7e   :  { %v307_v33 = vand.u32 4294901760, %v306_v24 }
  0x7f   :  { %270 = vmatmul.f32.gmra.mxu0 %v269_v27  ;;  %453 = vmatmul.f32.gmra.mxu1 %v2484_v4 }
  0x80   :  { %v308_v45 = vsub.f32 %v306_v24, %v307_v33 }
  0x81   :  { %764 = vmatmul.f32.gmra.mxu3 %v267_v20 }
  0x82   :  { %601 = vmatmul.f32.gmra.mxu2 %v266_v16  ;;  %v40_v16 = vld [vmem:[%s3817_s0 + $0xa0] sm:$0xff] }
  0x87   :  { %278 = vmatmul.f32.gmra.mxu0 %v277_v38  ;;  %457 = vmatmul.f32.gmra.mxu1 %v2492_v13  ;;  %v41_v38 = vld [vmem:[%s3817_s0 + $0xa8] sm:$0xff] }
  0x88   :  { %v120_v49 = vsel %vm55_vm0, %v41_v38, 0 }
  0x89   :  { %770 = vmatmul.f32.gmra.mxu3 %v275_v28  ;;  %v1374_v28 = vand.u32 4294901760, %v1373_v26 }
  0x8a   :  { %606 = vmatmul.f32.gmra.mxu2 %v274_v25  ;;  %v117_v25 = vsel %vm55_vm0, %v40_v16, 0 }
  0x8b   :  { %1375 = vmatpush.msrb.mxu3 %v1374_v28 }
  0x8c   :  { %v159_v56 = vpop.f32.mrf.mxu0 }
  0x8d   :  { %v160_v1 = vadd.f32 %v2544_v58, %v159_v56  ;;  %v2604_v56 = vand.u32 4294901760, %v120_v49 }
  0x8f   :  { %286 = vmatmul.f32.gmra.mxu0 %v285_v51  ;;  %461 = vmatmul.f32.gmra.mxu1 %v2500_v21  ;;  %3859 = vst [vmem:[#allocation3_spill] sm:$0xff] %v2604_v56 }
  0x91   :  { %776 = vmatmul.f32.gmra.mxu3 %v283_v39  ;;  %v1124_v39 = vld [vmem:[%s3819_s3 + $0x68] sm:$0xff] }
  0x92   :  { %611 = vmatmul.f32.gmra.mxu2 %v282_v34  ;;  %v2580_v34 = vand.u32 4294901760, %v117_v25  ;;  %v2592_v42 = vand.u32 4294901760, %v1124_v39 }
  0x94   :  { %v2560_v9 = vpop.f32.mrf.mxu0  ;;  %v402_v10 = vpop.f32.mrf.mxu1  ;;  %3858 = vst [vmem:[#allocation2_spill] sm:$0xff] %v2580_v34  ;;  %1136 = vmatpush.msrb.mxu2 %v2592_v42  ;;  %v2599_v50 = vsub.f32 %v1124_v39, %v2592_v42  ;;  %1740 = vmatpush.msra.mxu1 %v2592_v42 }
  0x95   :  { %v403_v11 = vadd.f32 %v402_v10, %v160_v1  ;;  %v532_v15 = vpop.f32.mrf.mxu2  ;;  %v681_v17 = vpop.f32.mrf.mxu3  ;;  %v1123_v10 = vld [vmem:[%s3819_s3 + $0x60] sm:$0xff] }
  0x96   :  { %v3823_v51 = vand.u32 4294901760, %v2599_v50  ;;  %1569 = vmatpush.msra.mxu0 %v2599_v50 }
  0x97   :  { %v533_v20 = vadd.f32 %v532_v15, %v403_v11  ;;  %294 = vmatmul.f32.gmra.mxu0 %v293_v5  ;;  %465 = vmatmul.f32.gmra.mxu1 %v2508_v30  ;;  %v322_v5 = vsub.f32 %v120_v49, %v2604_v56  ;;  %v2622_v11 = vand.u32 4294901760, %v1123_v10 }
  0x98   :  { %v1379_v63 = vsub.f32 %v2599_v50, %v3823_v51 }
  0x99   :  { %v2578_v27 = vadd.f32 %v681_v17, %v533_v20  ;;  %782 = vmatmul.f32.gmra.mxu3 %v291_v53  ;;  %v309_v53 = vand.u32 4294901760, %v308_v45  ;;  %v323_v16 = vand.u32 4294901760, %v322_v5  ;;  %1138 = vmatpush.msrb.mxu2 %v2622_v11 }
  0x9a   :  { %616 = vmatmul.f32.gmra.mxu2 %v290_v47  ;;  %v314_v47 = vsub.f32 %v117_v25, %v2580_v34  ;;  %v1380_v1 = vand.u32 4294901760, %v1379_v63  ;;  %v2632_v25 = vsub.f32 %v1123_v10, %v2622_v11  ;;  %1742 = vmatpush.msra.mxu1 %v2622_v11 }
  0x9b   :  { %v324_v28 = vsub.f32 %v322_v5, %v323_v16 }
  0x9c   :  { %v2582_v35 = vpop.f32.mrf.mxu0  ;;  %v2584_v36 = vpop.f32.mrf.mxu1  ;;  %v315_v55 = vand.u32 4294901760, %v314_v47  ;;  %1381 = vmatpush.msrb.mxu3 %v1380_v1  ;;  %v3822_v26 = vand.u32 4294901760, %v2632_v25  ;;  %1572 = vmatpush.msra.mxu0 %v2632_v25  ;;  %v44_v1 = vld [vmem:[%s3817_s0 + $0xc0] sm:$0xff] }
  0x9d   :  { %v325_v45 = vand.u32 4294901760, %v324_v28  ;;  %v129_v10 = vsel %vm55_vm0, %v44_v1, 0 }
  0x9e   :  { %v316_v2 = vsub.f32 %v314_v47, %v315_v55  ;;  %v1385_v38 = vsub.f32 %v2632_v25, %v3822_v26 }
  0x9f   :  { %302 = vmatmul.f32.gmra.mxu0 %v301_v31  ;;  %469 = vmatmul.f32.gmra.mxu1 %v2519_v40 }
  0xa0   :  { %v317_v15 = vand.u32 4294901760, %v316_v2  ;;  %v1386_v39 = vand.u32 4294901760, %v1385_v38  ;;  %v1122_v2 = vld [vmem:[%s3819_s3 + $0x58] sm:$0xff] }
  0xa1   :  { %788 = vmatmul.f32.gmra.mxu3 %v299_v6 }
  0xa2   :  { %621 = vmatmul.f32.gmra.mxu2 %v298_v62  ;;  %v42_v62 = vld [vmem:[%s3817_s0 + $0xb0] sm:$0xff]  ;;  %1387 = vmatpush.msrb.mxu3 %v1386_v39  ;;  %v2670_v39 = vand.u32 4294901760, %v129_v10 }
  0xa3   :  { %v123_v6 = vsel %vm55_vm0, %v42_v62, 0 }
  0xa4   :  { %v2606_v59 = vpop.f32.mrf.mxu0  ;;  %v2608_v61 = vpop.f32.mrf.mxu1  ;;  %v2624_v17 = vand.u32 4294901760, %v123_v6  ;;  %3864 = vst [vmem:[#allocation8_spill] sm:$0xff] %v2670_v39 }
  0xa6   :  { %3860 = vst [vmem:[#allocation4_spill] sm:$0xff] %v2624_v17  ;;  %v330_v31 = vsub.f32 %v123_v6, %v2624_v17 }
  0xa7   :  { %310 = vmatmul.f32.gmra.mxu0 %v309_v53  ;;  %473 = vmatmul.f32.gmra.mxu1 %v2539_v54 }
  0xa8   :  { %v331_v49 = vand.u32 4294901760, %v330_v31 }
  0xa9   :  { %794 = vmatmul.f32.gmra.mxu3 %v307_v33 }
  0xaa   :  { %626 = vmatmul.f32.gmra.mxu2 %v306_v24  ;;  %v43_v24 = vld [vmem:[%s3817_s0 + $0xb8] sm:$0xff] }
  0xab   :  { %v126_v33 = vsel %vm55_vm0, %v43_v24, 0 }
  0xac   :  { %v2626_v20 = vpop.f32.mrf.mxu0  ;;  %v2628_v23 = vpop.f32.mrf.mxu1  ;;  %v2646_v53 = vand.u32 4294901760, %v126_v33 }
  0xae   :  { %3861 = vst [vmem:[#allocation5_spill] sm:$0xff] %v2646_v53  ;;  %v338_v6 = vsub.f32 %v126_v33, %v2646_v53 }
  0xaf   :  { %318 = vmatmul.f32.gmra.mxu0 %v317_v15  ;;  %477 = vmatmul.f32.gmra.mxu1 %v2558_v8 }
  0xb0   :  { %v339_v38 = vand.u32 4294901760, %v338_v6 }
  0xb1   :  { %800 = vmatmul.f32.gmra.mxu3 %v315_v55  ;;  %v2658_v55 = vand.u32 4294901760, %v1122_v2 }
  0xb2   :  { %631 = vmatmul.f32.gmra.mxu2 %v314_v47  ;;  %v332_v47 = vsub.f32 %v330_v31, %v331_v49 }
  0xb3   :  { %1140 = vmatpush.msrb.mxu2 %v2658_v55  ;;  %v2665_v15 = vsub.f32 %v1122_v2, %v2658_v55  ;;  %1744 = vmatpush.msra.mxu1 %v2658_v55 }
  0xb4   :  { %v2648_v63 = vpop.f32.mrf.mxu0  ;;  %v2650_v62 = vpop.f32.mrf.mxu1  ;;  %v333_v28 = vand.u32 4294901760, %v332_v47  ;;  %v1121_v47 = vld [vmem:[%s3819_s3 + $0x50] sm:$0xff] }
  0xb5   :  { %3862 = vst [vmem:[#allocation6_spill] sm:$0xff] %v2648_v63  ;;  %v3826_v24 = vand.u32 4294901760, %v2665_v15  ;;  %1575 = vmatpush.msra.mxu0 %v2665_v15  ;;  %v2684_v26 = vand.u32 4294901760, %v1121_v47 }
  0xb6   :  { %3863 = vst [vmem:[#allocation7_spill] sm:$0xff] %v2650_v62 }
  0xb7   :  { %326 = vmatmul.f32.gmra.mxu0 %v325_v45  ;;  %481 = vmatmul.f32.gmra.mxu1 %v2580_v34  ;;  %v1391_v1 = vsub.f32 %v2665_v15, %v3826_v24 }
  0xb8   :  { %1142 = vmatpush.msrb.mxu2 %v2684_v26  ;;  %1746 = vmatpush.msra.mxu1 %v2684_v26 }
  0xb9   :  { %806 = vmatmul.f32.gmra.mxu3 %v323_v16  ;;  %v1392_v2 = vand.u32 4294901760, %v1391_v1  ;;  %v346_v16 = vsub.f32 %v129_v10, %v2670_v39  ;;  %v2693_v10 = vsub.f32 %v1121_v47, %v2684_v26 }
  0xba   :  { %636 = vmatmul.f32.gmra.mxu2 %v322_v5  ;;  %v340_v5 = vsub.f32 %v338_v6, %v339_v38 }
  0xbb   :  { %1393 = vmatpush.msrb.mxu3 %v1392_v2  ;;  %v347_v18 = vand.u32 4294901760, %v346_v16  ;;  %1578 = vmatpush.msra.mxu0 %v2693_v10 }
  0xbc   :  { %v2672_v33 = vpop.f32.mrf.mxu0  ;;  %v2674_v45 = vpop.f32.mrf.mxu1  ;;  %v341_v51 = vand.u32 4294901760, %v340_v5 }
  0xbd   :  { %3865 = vst [vmem:[#allocation9_spill] sm:$0xff] %v2672_v33 }
  0xbe   :  { %3866 = vst [vmem:[#allocation10_spill] sm:$0xff] %v2674_v45 }
  0xbf   :  { %334 = vmatmul.f32.gmra.mxu0 %v333_v28  ;;  %485 = vmatmul.f32.gmra.mxu1 %v2604_v56  ;;  %v1114_v56 = vld [vmem:[%s3819_s3 + $0x18] sm:$0xff] }
  0xc0   :  { %v2867_v33 = vand.u32 4294901760, %v1114_v56 }
  0xc1   :  { %812 = vmatmul.f32.gmra.mxu3 %v331_v49  ;;  %v348_v49 = vsub.f32 %v346_v16, %v347_v18 }
  0xc2   :  { %641 = vmatmul.f32.gmra.mxu2 %v330_v31  ;;  %v3827_v31 = vand.u32 4294901760, %v2693_v10 }
  0xc3   :  { %v349_v2 = vand.u32 4294901760, %v348_v49 }
  0xc4   :  { %v2686_v48 = vpop.f32.mrf.mxu0  ;;  %v2688_v1 = vpop.f32.mrf.mxu1  ;;  %v1397_v28 = vsub.f32 %v2693_v10, %v3827_v31 }
  0xc5   :  { %3867 = vst [vmem:[#allocation11_spill] sm:$0xff] %v2686_v48  ;;  %v1115_v48 = vld [vmem:[%s3819_s3 + $0x20] sm:$0xff] }
  0xc6   :  { %3868 = vst [vmem:[#allocation12_spill] sm:$0xff] %v2688_v1  ;;  %v1398_v5 = vand.u32 4294901760, %v1397_v28  ;;  %v2840_v1 = vand.u32 4294901760, %v1115_v48 }
  0xc7   :  { %342 = vmatmul.f32.gmra.mxu0 %v341_v51  ;;  %489 = vmatmul.f32.gmra.mxu1 %v2624_v17  ;;  %v1120_v51 = vld [vmem:[%s3819_s3 + $0x48] sm:$0xff] }
  0xc8   :  { %1399 = vmatpush.msrb.mxu3 %v1398_v5  ;;  %v1119_v5 = vld [vmem:[%s3819_s3 + $0x40] sm:$0xff] }
  0xc9   :  { %818 = vmatmul.f32.gmra.mxu3 %v339_v38  ;;  %v2709_v38 = vand.u32 4294901760, %v1120_v51 }
  0xca   :  { %646 = vmatmul.f32.gmra.mxu2 %v338_v6 }
  0xcb   :  { %v2712_v6 = vsub.f32 %v1120_v51, %v2709_v38  ;;  %1748 = vmatpush.msra.mxu1 %v2709_v38  ;;  %1144 = vmatpush.msrb.mxu2 %v2709_v38  ;;  %v2730_v51 = vand.u32 4294901760, %v1119_v5 }
  0xcc   :  { %v2701_v24 = vpop.f32.mrf.mxu0  ;;  %v2703_v47 = vpop.f32.mrf.mxu1 }
  0xcd   :  { %3869 = vst [vmem:[#allocation13_spill] sm:$0xff] %v2701_v24  ;;  %1581 = vmatpush.msra.mxu0 %v2712_v6  ;;  %1146 = vmatpush.msrb.mxu2 %v2730_v51 }
  0xce   :  { %3870 = vst [vmem:[#allocation14_spill] sm:$0xff] %v2703_v47  ;;  %1750 = vmatpush.msra.mxu1 %v2730_v51 }
  0xcf   :  { %350 = vmatmul.f32.gmra.mxu0 %v349_v2  ;;  %493 = vmatmul.f32.gmra.mxu1 %v2646_v53  ;;  %v3828_v2 = vand.u32 4294901760, %v2712_v6  ;;  %v2784_v53 = vpop.f32.mrf.mxu3 }
  0xd1   :  { %824 = vmatmul.f32.gmra.mxu3 %v347_v18  ;;  %v1403_v18 = vsub.f32 %v2712_v6, %v3828_v2  ;;  %v2739_v2 = vsub.f32 %v1119_v5, %v2730_v51 }
  0xd2   :  { %651 = vmatmul.f32.gmra.mxu2 %v346_v16 }
  0xd3   :  { %v1404_v16 = vand.u32 4294901760, %v1403_v18  ;;  %v3831_v18 = vand.u32 4294901760, %v2739_v2  ;;  %1584 = vmatpush.msra.mxu0 %v2739_v2 }
  0xd4   :  { %v2716_v49 = vpop.f32.mrf.mxu0  ;;  %v2718_v28 = vpop.f32.mrf.mxu1 }
  0xd5   :  { %3871 = vst [vmem:[#allocation15_spill] sm:$0xff] %v2716_v49  ;;  %1405 = vmatpush.msrb.mxu3 %v1404_v16  ;;  %v1409_v16 = vsub.f32 %v2739_v2, %v3831_v18 }
  0xd6   :  { %3872 = vst [vmem:[#allocation16_spill] sm:$0xff] %v2718_v28 }
  0xd7   :  { %497 = vmatmul.f32.gmra.mxu1 %v2670_v39  ;;  %863 = vmatmul.f32.vlgmr.msrb.gmra.mxu0 %v2330_v19 }
  0xdc   :  { %v2732_v31 = vpop.f32.mrf.mxu0  ;;  %v2734_v49 = vpop.f32.mrf.mxu1 }
  0xdd   :  { %3873 = vst [vmem:[#allocation17_spill] sm:$0xff] %v2732_v31  ;;  %v1410_v31 = vand.u32 4294901760, %v1409_v16 }
  0xde   :  { %3874 = vst [vmem:[#allocation18_spill] sm:$0xff] %v2734_v49 }
  0xdf   :  { %867 = vmatmul.f32.gmra.mxu0 %v2355_v32  ;;  %986 = vmatmul.f32.vlgmr.msrb.gmra.mxu1 %v2330_v19  ;;  %v1118_v19 = vld [vmem:[%s3819_s3 + $0x38] sm:$0xff] }
  0xe0   :  { %1411 = vmatpush.msrb.mxu3 %v1410_v31  ;;  %v2757_v5 = vand.u32 4294901760, %v1118_v19 }
  0xe2   :  { %1148 = vmatpush.msrb.mxu2 %v2757_v5  ;;  %v2761_v18 = vsub.f32 %v1118_v19, %v2757_v5  ;;  %1752 = vmatpush.msra.mxu1 %v2757_v5 }
  0xe4   :  { %v2748_v49 = vpop.f32.mrf.mxu0  ;;  %v2750_v39 = vpop.f32.mrf.mxu1  ;;  %1587 = vmatpush.msra.mxu0 %v2761_v18 }
  0xe5   :  { %3875 = vst [vmem:[#allocation19_spill] sm:$0xff] %v2748_v49  ;;  %v3834_v49 = vand.u32 4294901760, %v2761_v18 }
  0xe6   :  { %3876 = vst [vmem:[#allocation20_spill] sm:$0xff] %v2750_v39 }
  0xe7   :  { %871 = vmatmul.f32.gmra.mxu0 %v2376_v46  ;;  %990 = vmatmul.f32.gmra.mxu1 %v2355_v32  ;;  %v1415_v32 = vsub.f32 %v2761_v18, %v3834_v49 }
  0xe9   :  { %v1416_v19 = vand.u32 4294901760, %v1415_v32 }
  0xeb   :  { %1417 = vmatpush.msrb.mxu3 %v1416_v19 }
  0xec   :  { %v2764_v16 = vpop.f32.mrf.mxu0  ;;  %v2766_v31 = vpop.f32.mrf.mxu1 }
  0xed   :  { %3877 = vst [vmem:[#allocation21_spill] sm:$0xff] %v2764_v16  ;;  %v1117_v16 = vld [vmem:[%s3819_s3 + $0x30] sm:$0xff] }
  0xee   :  { %3878 = vst [vmem:[#allocation22_spill] sm:$0xff] %v2766_v31  ;;  %v2782_v31 = vand.u32 4294901760, %v1117_v16 }
  0xef   :  { %875 = vmatmul.f32.gmra.mxu0 %v2390_v57  ;;  %994 = vmatmul.f32.gmra.mxu1 %v2376_v46 }
  0xf0   :  { %1150 = vmatpush.msrb.mxu2 %v2782_v31  ;;  %v2790_v46 = vsub.f32 %v1117_v16, %v2782_v31  ;;  %1754 = vmatpush.msra.mxu1 %v2782_v31  ;;  %v2806_v16 = vpop.f32.mrf.mxu3 }
  0xf2   :  { %v3835_v32 = vand.u32 4294901760, %v2790_v46  ;;  %1590 = vmatpush.msra.mxu0 %v2790_v46 }
  0xf4   :  { %v2775_v39 = vpop.f32.mrf.mxu0  ;;  %v2777_v28 = vpop.f32.mrf.mxu1 }
  0xf5   :  { %3879 = vst [vmem:[#allocation23_spill] sm:$0xff] %v2775_v39  ;;  %v1421_v39 = vsub.f32 %v2790_v46, %v3835_v32 }
  0xf6   :  { %3880 = vst [vmem:[#allocation24_spill] sm:$0xff] %v2777_v28  ;;  %v2802_v28 = vpop.f32.mrf.mxu2 }
  0xf7   :  { %879 = vmatmul.f32.gmra.mxu0 %v2402_v0  ;;  %998 = vmatmul.f32.gmra.mxu1 %v2390_v57  ;;  %v1422_v57 = vand.u32 4294901760, %v1421_v39 }
  0xf9   :  { %1423 = vmatpush.msrb.mxu3 %v1422_v57 }
  0xfc   :  { %v2795_v19 = vpop.f32.mrf.mxu0  ;;  %v2797_v49 = vpop.f32.mrf.mxu1 }
  0xfd   :  { %3881 = vst [vmem:[#allocation25_spill] sm:$0xff] %v2795_v19  ;;  %v1116_v19 = vld [vmem:[%s3819_s3 + $0x28] sm:$0xff] }
  0xfe   :  { %3882 = vst [vmem:[#allocation26_spill] sm:$0xff] %v2797_v49  ;;  %v2811_v24 = vand.u32 4294901760, %v1116_v19  ;;  %v2829_v32 = vpop.f32.mrf.mxu2 }
  0xff   :  { %883 = vmatmul.f32.gmra.mxu0 %v2420_v7  ;;  %1002 = vmatmul.f32.gmra.mxu1 %v2402_v0 }
 0x100   :  { %1152 = vmatpush.msrb.mxu2 %v2811_v24  ;;  %v2819_v39 = vsub.f32 %v1116_v19, %v2811_v24  ;;  %1756 = vmatpush.msra.mxu1 %v2811_v24 }
 0x102   :  { %v3838_v0 = vand.u32 4294901760, %v2819_v39  ;;  %1593 = vmatpush.msra.mxu0 %v2819_v39  ;;  %1154 = vmatpush.msrb.mxu2 %v2840_v1 }
 0x103   :  { %1758 = vmatpush.msra.mxu1 %v2840_v1 }
 0x104   :  { %v2813_v49 = vpop.f32.mrf.mxu0  ;;  %v2815_v47 = vpop.f32.mrf.mxu1  ;;  %v1427_v57 = vsub.f32 %v2819_v39, %v3838_v0  ;;  %1156 = vmatpush.msrb.mxu2 %v2867_v33 }
 0x105   :  { %3883 = vst [vmem:[#allocation27_spill] sm:$0xff] %v2813_v49  ;;  %1760 = vmatpush.msra.mxu1 %v2867_v33 }
 0x106   :  { %3884 = vst [vmem:[#allocation28_spill] sm:$0xff] %v2815_v47  ;;  %v1428_v49 = vand.u32 4294901760, %v1427_v57  ;;  %v2831_v47 = vpop.f32.mrf.mxu3 }
 0x107   :  { %887 = vmatmul.f32.gmra.mxu0 %v2428_v14  ;;  %1006 = vmatmul.f32.gmra.mxu1 %v2420_v7  ;;  %3885 = vst [vmem:[#allocation29_spill] sm:$0xff] %v2831_v47  ;;  %v2846_v7 = vsub.f32 %v1115_v48, %v2840_v1 }
 0x108   :  { %1429 = vmatpush.msrb.mxu3 %v1428_v49  ;;  %v2851_v49 = vpop.f32.mrf.mxu2 }
 0x109   :  { %v3841_v57 = vand.u32 4294901760, %v2846_v7  ;;  %1596 = vmatpush.msra.mxu0 %v2846_v7 }
 0x10c   :  { %v2833_v19 = vpop.f32.mrf.mxu0  ;;  %v2835_v17 = vpop.f32.mrf.mxu1 }
 0x10d   :  { %3886 = vst [vmem:[#allocation30_spill] sm:$0xff] %v2833_v19 }
 0x10e   :  { %3887 = vst [vmem:[#allocation31_spill] sm:$0xff] %v2835_v17  ;;  %v2860_v17 = vpop.f32.mrf.mxu3 }
 0x10f   :  { %891 = vmatmul.f32.gmra.mxu0 %v2436_v22  ;;  %1010 = vmatmul.f32.gmra.mxu1 %v2428_v14  ;;  %v1433_v14 = vsub.f32 %v2846_v7, %v3841_v57  ;;  %3890 = vst [vmem:[#allocation34_spill] sm:$0xff] %v2860_v17  ;;  %v2875_v57 = vsub.f32 %v1114_v56, %v2867_v33 }
 0x111   :  { %v1434_v48 = vand.u32 4294901760, %v1433_v14  ;;  %v2878_v14 = vpop.f32.mrf.mxu2  ;;  %1599 = vmatpush.msra.mxu0 %v2875_v57 }
 0x112   :  { %3893 = vst [vmem:[#allocation37_spill] sm:$0xff] %v2878_v14 }
 0x113   :  { %1435 = vmatpush.msrb.mxu3 %v1434_v48 }
 0x114   :  { %v2853_v0 = vpop.f32.mrf.mxu0  ;;  %v2855_v19 = vpop.f32.mrf.mxu1 }
 0x115   :  { %3888 = vst [vmem:[#allocation32_spill] sm:$0xff] %v2853_v0 }
 0x116   :  { %3889 = vst [vmem:[#allocation33_spill] sm:$0xff] %v2855_v19  ;;  %v2882_v48 = vpop.f32.mrf.mxu3 }
 0x117   :  { %895 = vmatmul.f32.gmra.mxu0 %v2444_v29  ;;  %1014 = vmatmul.f32.gmra.mxu1 %v2436_v22  ;;  %v3844_v22 = vand.u32 4294901760, %v2875_v57  ;;  %3894 = vst [vmem:[#allocation38_spill] sm:$0xff] %v2882_v48 }
 0x119   :  { %v2893_v17 = vpop.f32.mrf.mxu2 }
 0x11a   :  { %3897 = vst [vmem:[#allocation41_spill] sm:$0xff] %v2893_v17 }
 0x11c   :  { %v2869_v0 = vpop.f32.mrf.mxu0  ;;  %v2871_v19 = vpop.f32.mrf.mxu1 }
 0x11d   :  { %3891 = vst [vmem:[#allocation35_spill] sm:$0xff] %v2869_v0  ;;  %v1439_v0 = vsub.f32 %v2875_v57, %v3844_v22 }
 0x11e   :  { %3892 = vst [vmem:[#allocation36_spill] sm:$0xff] %v2871_v19  ;;  %v2902_v34 = vpop.f32.mrf.mxu3 }
 0x11f   :  { %899 = vmatmul.f32.gmra.mxu0 %v2452_v37  ;;  %1018 = vmatmul.f32.gmra.mxu1 %v2444_v29  ;;  %v1440_v56 = vand.u32 4294901760, %v1439_v0  ;;  %v1113_v29 = vld [vmem:[%s3819_s3 + $0x10] sm:$0xff]  ;;  %3898 = vst [vmem:[#allocation42_spill] sm:$0xff] %v2902_v34 }
 0x120   :  { %v2900_v48 = vand.u32 4294901760, %v1113_v29 }
 0x121   :  { %1441 = vmatpush.msrb.mxu3 %v1440_v56 }
 0x122   :  { %1158 = vmatpush.msrb.mxu2 %v2900_v48  ;;  %v2906_v0 = vsub.f32 %v1113_v29, %v2900_v48  ;;  %1762 = vmatpush.msra.mxu1 %v2900_v48 }
 0x124   :  { %v2889_v19 = vpop.f32.mrf.mxu0  ;;  %v2891_v45 = vpop.f32.mrf.mxu1  ;;  %1602 = vmatpush.msra.mxu0 %v2906_v0 }
 0x125   :  { %3895 = vst [vmem:[#allocation39_spill] sm:$0xff] %v2889_v19 }
 0x126   :  { %3896 = vst [vmem:[#allocation40_spill] sm:$0xff] %v2891_v45  ;;  %v2920_v45 = vpop.f32.mrf.mxu2  ;;  %v2927_v34 = vpop.f32.mrf.mxu3 }
 0x127   :  { %903 = vmatmul.f32.gmra.mxu0 %v2460_v44  ;;  %1022 = vmatmul.f32.gmra.mxu1 %v2452_v37  ;;  %v3845_v37 = vand.u32 4294901760, %v2906_v0  ;;  %3901 = vst [vmem:[#allocation45_spill] sm:$0xff] %v2920_v45 }
 0x128   :  { %3902 = vst [vmem:[#allocation46_spill] sm:$0xff] %v2927_v34  ;;  %v3905_v34 = vand.u32 4294901760, %v2528_v43  ;;  %v3908_v43 = vand.u32 4294901760, %v2599_v50 }
 0x129   :  { %v1445_v19 = vsub.f32 %v2906_v0, %v3845_v37 }
 0x12b   :  { %v1446_v29 = vand.u32 4294901760, %v1445_v19 }
 0x12c   :  { %v2909_v56 = vpop.f32.mrf.mxu0  ;;  %v2911_v22 = vpop.f32.mrf.mxu1 }
 0x12d   :  { %3899 = vst [vmem:[#allocation43_spill] sm:$0xff] %v2909_v56  ;;  %v1112_v56 = vld [vmem:[%s3819_s3 + $0x8] sm:$0xff]  ;;  %1447 = vmatpush.msrb.mxu3 %v1446_v29  ;;  %v1111_v29 = vld [vmem:[%s3819_s3] sm:$0xff] }
 0x12e   :  { %3900 = vst [vmem:[#allocation44_spill] sm:$0xff] %v2911_v22  ;;  %v2925_v22 = vand.u32 4294901760, %v1112_v56  ;;  %v2944_v37 = vand.u32 4294901760, %v1111_v29  ;;  %v2959_v47 = vpop.f32.mrf.mxu3 }
 0x12f   :  { %907 = vmatmul.f32.gmra.mxu0 %v2468_v52  ;;  %1026 = vmatmul.f32.gmra.mxu1 %v2460_v44 }
 0x130   :  { %1160 = vmatpush.msrb.mxu2 %v2925_v22  ;;  %1764 = vmatpush.msra.mxu1 %v2925_v22  ;;  %v2936_v44 = vsub.f32 %v1112_v56, %v2925_v22  ;;  %v1455_v56 = vsub.f32 %v1111_v29, %v2944_v37 }
 0x132   :  { %v1450_v19 = vand.u32 4294901760, %v2936_v44  ;;  %1605 = vmatpush.msra.mxu0 %v2936_v44  ;;  %1162 = vmatpush.msrb.mxu2 %v2944_v37  ;;  %v1456_v62 = vand.u32 4294901760, %v1455_v56 }
 0x133   :  { %1766 = vmatpush.msra.mxu1 %v2944_v37 }
 0x134   :  { %v2929_v17 = vpop.f32.mrf.mxu0  ;;  %v2931_v14 = vpop.f32.mrf.mxu1  ;;  %1921 = vmatpush.msra.mxu2 %v3905_v34  ;;  %1608 = vmatpush.msra.mxu0 %v1455_v56  ;;  %v1457_v29 = vsub.f32 %v1455_v56, %v1456_v62  ;;  %v3909_v34 = vand.u32 4294901760, %v2632_v25  ;;  %v3913_v25 = vand.u32 4294901760, %v2739_v2 }
 0x135   :  { %3903 = vst [vmem:[#allocation47_spill] sm:$0xff] %v2929_v17  ;;  %v1451_v17 = vsub.f32 %v2936_v44, %v1450_v19  ;;  %v3907_v44 = vand.u32 4294901760, %v2564_v12  ;;  %v3910_v12 = vand.u32 4294901760, %v2665_v15 }
 0x136   :  { %3904 = vst [vmem:[#allocation48_spill] sm:$0xff] %v2931_v14  ;;  %v2951_v14 = vpop.f32.mrf.mxu2  ;;  %v2981_v50 = vpop.f32.mrf.mxu3 }
 0x137   :  { %911 = vmatmul.f32.gmra.mxu0 %v2476_v60  ;;  %1030 = vmatmul.f32.gmra.mxu1 %v2468_v52  ;;  %v1452_v52 = vand.u32 4294901760, %v1451_v17  ;;  %v1458_v17 = vand.u32 4294901760, %v1457_v29 }
 0x138   :  { %1925 = vmatpush.msra.mxu2 %v3907_v44 }
 0x139   :  { %1453 = vmatpush.msrb.mxu3 %v1452_v52 }
 0x13a   :  { %1929 = vmatpush.msra.mxu2 %v3908_v43 }
 0x13b   :  { %1459 = vmatpush.msrb.mxu3 %v1458_v17 }
 0x13c   :  { %v2955_v45 = vpop.f32.mrf.mxu0  ;;  %v2957_v63 = vpop.f32.mrf.mxu1  ;;  %1933 = vmatpush.msra.mxu2 %v3909_v34 }
 0x13d   :  { %3906 = vst [vmem:[#allocation49_spill] sm:$0xff] %v2955_v45  ;;  %2084 = vmatpush.msra.mxu3 %v2521_v41  ;;  %v3912_v41 = vand.u32 4294901760, %v2712_v6 }
 0x13e   :  { %1937 = vmatpush.msra.mxu2 %v3910_v12  ;;  %v2976_v56 = vpop.f32.mrf.mxu2  ;;  %v192_v12 = vadd.f32 %v2544_v58, %v2626_v20 }
 0x13f   :  { %915 = vmatmul.f32.gmra.mxu0 %v2484_v4  ;;  %1034 = vmatmul.f32.gmra.mxu1 %v2476_v60  ;;  %v3911_v60 = vand.u32 4294901760, %v2693_v10  ;;  %v3914_v10 = vand.u32 4294901760, %v2761_v18  ;;  %v3918_v18 = vand.u32 4294901760, %v2875_v57 }
 0x140   :  { %2086 = vmatpush.msra.mxu3 %v2556_v3 }
 0x141   :  { %1941 = vmatpush.msra.mxu2 %v3911_v60 }
 0x142   :  { %2088 = vmatpush.msra.mxu3 %v2592_v42 }
 0x143   :  { %1945 = vmatpush.msra.mxu2 %v3912_v41 }
 0x144   :  { %v2970_v45 = vpop.f32.mrf.mxu0  ;;  %v2972_v52 = vpop.f32.mrf.mxu1  ;;  %2090 = vmatpush.msra.mxu3 %v2622_v11  ;;  %v3916_v11 = vand.u32 4294901760, %v2819_v39 }
 0x145   :  { %1949 = vmatpush.msra.mxu2 %v3913_v25 }
 0x146   :  { %2092 = vmatpush.msra.mxu3 %v2658_v55  ;;  %v3001_v42 = vpop.f32.mrf.mxu2  ;;  %v3008_v55 = vpop.f32.mrf.mxu3 }
 0x147   :  { %919 = vmatmul.f32.gmra.mxu0 %v2492_v13  ;;  %1038 = vmatmul.f32.gmra.mxu1 %v2484_v4  ;;  %v3915_v4 = vand.u32 4294901760, %v2790_v46 }
 0x148   :  { %1953 = vmatpush.msra.mxu2 %v3914_v10  ;;  %2094 = vmatpush.msra.mxu3 %v2684_v26  ;;  %v3917_v26 = vand.u32 4294901760, %v2846_v7 }
 0x14a   :  { %1957 = vmatpush.msra.mxu2 %v3915_v4  ;;  %2096 = vmatpush.msra.mxu3 %v2709_v38  ;;  %v3919_v38 = vand.u32 4294901760, %v2906_v0 }
 0x14c   :  { %v2991_v3 = vpop.f32.mrf.mxu0  ;;  %v2993_v15 = vpop.f32.mrf.mxu1  ;;  %1961 = vmatpush.msra.mxu2 %v3916_v11  ;;  %2098 = vmatpush.msra.mxu3 %v2730_v51  ;;  %v3920_v11 = vld [vmem:[#allocation29_spill] sm:$0xff] }
 0x14e   :  { %1965 = vmatpush.msra.mxu2 %v3917_v26  ;;  %2100 = vmatpush.msra.mxu3 %v2757_v5  ;;  %v3027_v5 = vpop.f32.mrf.mxu2  ;;  %v3921_v26 = vld [vmem:[#allocation7_spill] sm:$0xff] }
 0x14f   :  { %923 = vmatmul.f32.gmra.mxu0 %v2500_v21  ;;  %1042 = vmatmul.f32.gmra.mxu1 %v2492_v13  ;;  %v168_v13 = vadd.f32 %v2544_v58, %v2560_v9  ;;  %v3030_v9 = vpop.f32.mrf.mxu3 }
 0x150   :  { %1969 = vmatpush.msra.mxu2 %v3918_v18  ;;  %2102 = vmatpush.msra.mxu3 %v2782_v31 }
 0x151   :  { %v407_v51 = vadd.f32 %v2584_v36, %v168_v13 }
 0x152   :  { %1973 = vmatpush.msra.mxu2 %v3919_v38  ;;  %2104 = vmatpush.msra.mxu3 %v2811_v24 }
 0x153   :  { %v538_v24 = vadd.f32 %v2802_v28, %v407_v51 }
 0x154   :  { %v3013_v6 = vpop.f32.mrf.mxu1  ;;  %v864_v2 = vpop.f32.mrf.mxu0  ;;  %1977 = vmatpush.msra.mxu2 %v1450_v19  ;;  %2106 = vmatpush.msra.mxu3 %v2840_v1 }
 0x155   :  { %v865_v31 = vadd.f32 %v864_v2, %v2578_v27  ;;  %v688_v27 = vadd.f32 %v2784_v53, %v538_v24 }
 0x156   :  { %1981 = vmatpush.msra.mxu2 %v1456_v62  ;;  %2108 = vmatpush.msra.mxu3 %v2867_v33 }
 0x157   :  { %927 = vmatmul.f32.gmra.mxu0 %v2508_v30  ;;  %1046 = vmatmul.f32.gmra.mxu1 %v2500_v21  ;;  %v176_v21 = vadd.f32 %v2544_v58, %v2582_v35  ;;  %v3046_v35 = vpop.f32.mrf.mxu2 }
 0x158   :  { %2110 = vmatpush.msra.mxu3 %v2900_v48 }
 0x159   :  { %v411_v62 = vadd.f32 %v2608_v61, %v176_v21  ;;  %v3055_v61 = vpop.f32.mrf.mxu3 }
 0x15a   :  { %2112 = vmatpush.msra.mxu3 %v2925_v22  ;;  %v184_v22 = vadd.f32 %v2544_v58, %v2606_v59 }
 0x15b   :  { %v543_v53 = vadd.f32 %v2829_v32, %v411_v62  ;;  %v3924_v62 = vld [vmem:[#allocation2_spill] sm:$0xff] }
 0x15c   :  { %v868_v46 = vpop.f32.mrf.mxu0  ;;  %v987_v39 = vpop.f32.mrf.mxu1  ;;  %2114 = vmatpush.msra.mxu3 %v2944_v37  ;;  %v415_v59 = vadd.f32 %v2628_v23, %v184_v22  ;;  %v3926_v22 = vld [vmem:[#allocation10_spill] sm:$0xff] }
 0x15d   :  { %v988_v7 = vadd.f32 %v987_v39, %v865_v31  ;;  %v869_v1 = vadd.f32 %v868_v46, %v688_v27  ;;  %v694_v44 = vadd.f32 %v2806_v16, %v543_v53  ;;  %v3922_v31 = vld [vmem:[#allocation6_spill] sm:$0xff]  ;;  %v3923_v39 = vld [vmem:[#allocation37_spill] sm:$0xff] }
 0x15e   :  { %v548_v60 = vadd.f32 %v2851_v49, %v415_v59  ;;  %v419_v49 = vadd.f32 %v3921_v26, %v192_v12  ;;  %v200_v46 = vadd.f32 %v2544_v58, %v3922_v31 }
 0x15f   :  { %v1086_v36 = vmax.f32 %v988_v7, 0.0  ;;  %931 = vmatmul.f32.gmra.mxu0 %v2519_v40  ;;  %1050 = vmatmul.f32.gmra.mxu1 %v2508_v30  ;;  %v3074_v16 = vpop.f32.mrf.mxu2 }
 0x160   :  { %v700_v20 = vadd.f32 %v3920_v11, %v548_v60  ;;  %v553_v21 = vadd.f32 %v3923_v39, %v419_v49  ;;  %v423_v53 = vadd.f32 %v3926_v22, %v200_v46  ;;  %v3931_v49 = vld [vmem:[#allocation12_spill] sm:$0xff] }
 0x161   :  { %v3043_v33 = vand.u32 4294901760, %v1086_v36  ;;  %v3077_v25 = vpop.f32.mrf.mxu3 }
 0x163   :  { %v3049_v28 = vsub.f32 %v1086_v36, %v3043_v33  ;;  %1461 = vmatmul.f32.vlgmr.msrb.gmra.mxu3 %v3043_v33 }
 0x164   :  { %v872_v57 = vpop.f32.mrf.mxu0  ;;  %v991_v30 = vpop.f32.mrf.mxu1 }
 0x165   :  { %v1165_v48 = vand.u32 4294901760, %v3049_v28  ;;  %v992_v0 = vadd.f32 %v991_v30, %v869_v1  ;;  %v873_v17 = vadd.f32 %v872_v57, %v694_v44  ;;  %v3925_v57 = vld [vmem:[#allocation34_spill] sm:$0xff] }
 0x166   :  { %v706_v30 = vadd.f32 %v3925_v57, %v553_v21 }
 0x167   :  { %v1087_v37 = vmax.f32 %v992_v0, 0.0  ;;  %935 = vmatmul.f32.gmra.mxu0 %v2539_v54  ;;  %1054 = vmatmul.f32.gmra.mxu1 %v2519_v40  ;;  %v1166_v19 = vsub.f32 %v3049_v28, %v1165_v48  ;;  %v3096_v36 = vpop.f32.mrf.mxu2 }
 0x169   :  { %v3065_v29 = vand.u32 4294901760, %v1087_v37  ;;  %v1167_v32 = vand.u32 4294901760, %v1166_v19  ;;  %v3105_v0 = vpop.f32.mrf.mxu3 }
 0x16b   :  { %v3068_v43 = vsub.f32 %v1087_v37, %v3065_v29  ;;  %1168 = vmatmul.f32.vlgmr.msrb.gmra.mxu2 %v1167_v32  ;;  %1465 = vmatmul.f32.gmra.mxu3 %v3065_v29 }
 0x16c   :  { %v876_v34 = vpop.f32.mrf.mxu0  ;;  %v995_v40 = vpop.f32.mrf.mxu1 }
 0x16d   :  { %v996_v23 = vadd.f32 %v995_v40, %v873_v17  ;;  %v1173_v41 = vand.u32 4294901760, %v3068_v43  ;;  %v877_v13 = vadd.f32 %v876_v34, %v700_v20  ;;  %v3927_v17 = vld [vmem:[#allocation9_spill] sm:$0xff]  ;;  %v3930_v20 = vld [vmem:[#allocation38_spill] sm:$0xff] }
 0x16e   :  { %v208_v34 = vadd.f32 %v2544_v58, %v3927_v17  ;;  %v3928_v40 = vld [vmem:[#allocation41_spill] sm:$0xff]  ;;  %v3936_v17 = vld [vmem:[#allocation14_spill] sm:$0xff] }
 0x16f   :  { %v1088_v10 = vmax.f32 %v996_v23, 0.0  ;;  %939 = vmatmul.f32.gmra.mxu0 %v2558_v8  ;;  %1058 = vmatmul.f32.gmra.mxu1 %v2539_v54  ;;  %v1174_v4 = vsub.f32 %v3068_v43, %v1173_v41  ;;  %v558_v12 = vadd.f32 %v3928_v40, %v423_v53 }
 0x171   :  { %v3086_v2 = vand.u32 4294901760, %v1088_v10  ;;  %v1175_v18 = vand.u32 4294901760, %v1174_v4  ;;  %v3929_v4 = vld [vmem:[#allocation3_spill] sm:$0xff]  ;;  %v712_v26 = vadd.f32 %v3930_v20, %v558_v12  ;;  %v3128_v31 = vpop.f32.mrf.mxu3 }
 0x173   :  { %v3089_v38 = vsub.f32 %v1088_v10, %v3086_v2  ;;  %1176 = vmatmul.f32.gmra.mxu2 %v1175_v18  ;;  %1469 = vmatmul.f32.gmra.mxu3 %v3086_v2  ;;  %v427_v18 = vadd.f32 %v3931_v49, %v208_v34 }
 0x174   :  { %v880_v51 = vpop.f32.mrf.mxu0  ;;  %v999_v54 = vpop.f32.mrf.mxu1 }
 0x175   :  { %v1000_v24 = vadd.f32 %v999_v54, %v877_v13  ;;  %v1181_v7 = vand.u32 4294901760, %v3089_v38  ;;  %v881_v44 = vadd.f32 %v880_v51, %v706_v30  ;;  %v3124_v13 = vpop.f32.mrf.mxu2 }
 0x177   :  { %v1089_v27 = vmax.f32 %v1000_v24, 0.0  ;;  %943 = vmatmul.f32.gmra.mxu0 %v3924_v62  ;;  %1062 = vmatmul.f32.gmra.mxu1 %v2558_v8  ;;  %v1182_v1 = vsub.f32 %v3089_v38, %v1181_v7 }
 0x179   :  { %v3107_v37 = vand.u32 4294901760, %v1089_v27  ;;  %v1183_v19 = vand.u32 4294901760, %v1182_v1  ;;  %v3933_v1 = vld [vmem:[#allocation45_spill] sm:$0xff] }
 0x17a   :  { %v563_v57 = vadd.f32 %v3933_v1, %v427_v18  ;;  %v3939_v1 = vld [vmem:[#allocation46_spill] sm:$0xff] }
 0x17b   :  { %v3110_v59 = vsub.f32 %v1089_v27, %v3107_v37  ;;  %1184 = vmatmul.f32.gmra.mxu2 %v1183_v19  ;;  %1473 = vmatmul.f32.gmra.mxu3 %v3107_v37  ;;  %v3932_v27 = vld [vmem:[#allocation11_spill] sm:$0xff]  ;;  %v3934_v19 = vld [vmem:[#allocation4_spill] sm:$0xff] }
 0x17c   :  { %v884_v8 = vpop.f32.mrf.mxu0  ;;  %v1003_v32 = vpop.f32.mrf.mxu1 }
 0x17d   :  { %v1004_v60 = vadd.f32 %v1003_v32, %v881_v44  ;;  %v1189_v23 = vand.u32 4294901760, %v3110_v59  ;;  %v885_v46 = vadd.f32 %v884_v8, %v712_v26  ;;  %v3935_v8 = vld [vmem:[#allocation42_spill] sm:$0xff]  ;;  %v3937_v26 = vld [vmem:[#allocation13_spill] sm:$0xff] }
 0x17e   :  { %v718_v32 = vadd.f32 %v3935_v8, %v563_v57  ;;  %v224_v49 = vadd.f32 %v2544_v58, %v3937_v26 }
 0x17f   :  { %v1090_v10 = vmax.f32 %v1004_v60, 0.0  ;;  %947 = vmatmul.f32.gmra.mxu0 %v3929_v4  ;;  %1066 = vmatmul.f32.gmra.mxu1 %v3924_v62  ;;  %v1190_v11 = vsub.f32 %v3110_v59, %v1189_v23  ;;  %v216_v62 = vadd.f32 %v2544_v58, %v3932_v27  ;;  %v3147_v60 = vpop.f32.mrf.mxu2 }
 0x181   :  { %v3126_v51 = vand.u32 4294901760, %v1090_v10  ;;  %v1191_v54 = vand.u32 4294901760, %v1190_v11  ;;  %v431_v34 = vadd.f32 %v3936_v17, %v216_v62  ;;  %v3175_v17 = vld [vmem:[%s3818_s2] ss:$0 sm:$0xff] }
 0x183   :  { %v3131_v39 = vsub.f32 %v1090_v10, %v3126_v51  ;;  %1192 = vmatmul.f32.gmra.mxu2 %v1191_v54  ;;  %1477 = vmatmul.f32.gmra.mxu3 %v3126_v51  ;;  %v568_v18 = vadd.f32 %v2951_v14, %v431_v34  ;;  %v3156_v54 = vpop.f32.mrf.mxu3  ;;  %v3941_v34 = vld [vmem:[#allocation15_spill] sm:$0xff] }
 0x184   :  { %v888_v21 = vpop.f32.mrf.mxu0  ;;  %v1007_v24 = vpop.f32.mrf.mxu1 }
 0x185   :  { %v1008_v30 = vadd.f32 %v1007_v24, %v885_v46  ;;  %v1197_v22 = vand.u32 4294901760, %v3131_v39  ;;  %v889_v10 = vadd.f32 %v888_v21, %v718_v32  ;;  %v3938_v21 = vld [vmem:[#allocation5_spill] sm:$0xff]  ;;  %v724_v57 = vadd.f32 %v3939_v1, %v568_v18  ;;  %v3943_v1 = vld [vmem:[#allocation18_spill] sm:$0xff] }
 0x187   :  { %v1091_v53 = vmax.f32 %v1008_v30, 0.0  ;;  %951 = vmatmul.f32.gmra.mxu0 %v3934_v19  ;;  %1070 = vmatmul.f32.gmra.mxu1 %v3929_v4  ;;  %v1198_v44 = vsub.f32 %v3131_v39, %v1197_v22  ;;  %v3940_v30 = vld [vmem:[#allocation16_spill] sm:$0xff] }
 0x188   :  { %v435_v58 = vadd.f32 %v3940_v30, %v224_v49 }
 0x189   :  { %v3145_v40 = vand.u32 4294901760, %v1091_v53  ;;  %v1199_v12 = vand.u32 4294901760, %v1198_v44 }
 0x18b   :  { %v3150_v11 = vsub.f32 %v1091_v53, %v3145_v40  ;;  %1200 = vmatmul.f32.gmra.mxu2 %v1199_v12  ;;  %1481 = vmatmul.f32.gmra.mxu3 %v3145_v40  ;;  %v232_v12 = vadd.f32 %v3175_v17, %v3941_v34  ;;  %v3183_v49 = vpop.f32.mrf.mxu3 }
 0x18c   :  { %v892_v4 = vpop.f32.mrf.mxu0  ;;  %v1011_v20 = vpop.f32.mrf.mxu1 }
 0x18d   :  { %v1012_v46 = vadd.f32 %v1011_v20, %v889_v10  ;;  %v1205_v24 = vand.u32 4294901760, %v3150_v11  ;;  %v893_v44 = vadd.f32 %v892_v4, %v724_v57  ;;  %v573_v10 = vadd.f32 %v2976_v56, %v435_v58  ;;  %v3180_v20 = vpop.f32.mrf.mxu2 }
 0x18e   :  { %v439_v56 = vadd.f32 %v3943_v1, %v232_v12 }
 0x18f   :  { %v1092_v27 = vmax.f32 %v1012_v46, 0.0  ;;  %955 = vmatmul.f32.gmra.mxu0 %v3938_v21  ;;  %1074 = vmatmul.f32.gmra.mxu1 %v3934_v19  ;;  %v1206_v62 = vsub.f32 %v3150_v11, %v1205_v24  ;;  %v3942_v46 = vld [vmem:[#allocation8_spill] sm:$0xff] }
 0x191   :  { %v3166_v53 = vand.u32 4294901760, %v1092_v27  ;;  %v1207_v14 = vand.u32 4294901760, %v1206_v62  ;;  %v730_v62 = vadd.f32 %v2959_v47, %v573_v10 }
 0x193   :  { %v3169_v8 = vsub.f32 %v1092_v27, %v3166_v53  ;;  %1208 = vmatmul.f32.gmra.mxu2 %v1207_v14  ;;  %1485 = vmatmul.f32.gmra.mxu3 %v3166_v53 }
 0x194   :  { %v896_v32 = vpop.f32.mrf.mxu0  ;;  %v1015_v19 = vpop.f32.mrf.mxu1 }
 0x195   :  { %v1016_v4 = vadd.f32 %v1015_v19, %v893_v44  ;;  %v1213_v26 = vand.u32 4294901760, %v3169_v8  ;;  %v897_v58 = vadd.f32 %v896_v32, %v730_v62  ;;  %v3944_v19 = vld [vmem:[#allocation17_spill] sm:$0xff]  ;;  %v3202_v10 = vpop.f32.mrf.mxu2  ;;  %v3945_v62 = vld [vmem:[#allocation20_spill] sm:$0xff] }
 0x196   :  { %v240_v34 = vadd.f32 %v3175_v17, %v3944_v19 }
 0x197   :  { %v1093_v18 = vmax.f32 %v1016_v4, 0.0  ;;  %959 = vmatmul.f32.gmra.mxu0 %v3942_v46  ;;  %1078 = vmatmul.f32.gmra.mxu1 %v3938_v21  ;;  %v1214_v27 = vsub.f32 %v3169_v8, %v1213_v26  ;;  %v578_v4 = vadd.f32 %v3001_v42, %v439_v56 }
 0x198   :  { %v443_v1 = vadd.f32 %v3945_v62, %v240_v34 }
 0x199   :  { %v3192_v57 = vand.u32 4294901760, %v1093_v18  ;;  %v1215_v30 = vand.u32 4294901760, %v1214_v27 }
 0x19b   :  { %v3195_v14 = vsub.f32 %v1093_v18, %v3192_v57  ;;  %1216 = vmatmul.f32.gmra.mxu2 %v1215_v30  ;;  %1489 = vmatmul.f32.gmra.mxu3 %v3192_v57  ;;  %v736_v18 = vadd.f32 %v2981_v50, %v578_v4  ;;  %v3211_v30 = vpop.f32.mrf.mxu3  ;;  %v583_v50 = vadd.f32 %v3027_v5, %v443_v1 }
 0x19c   :  { %v900_v44 = vpop.f32.mrf.mxu0  ;;  %v1019_v21 = vpop.f32.mrf.mxu1 }
 0x19d   :  { %v1020_v47 = vadd.f32 %v1019_v21, %v897_v58  ;;  %v3846_v12 = vand.u32 4294901760, %v3195_v14  ;;  %v901_v58 = vadd.f32 %v900_v44, %v736_v18 }
 0x19f   :  { %v1094_v27 = vmax.f32 %v1020_v47, 0.0  ;;  %1082 = vmatmul.f32.gmra.mxu1 %v3942_v46  ;;  %1611 = vmatmul.f32.vlgmr.msra.gmra.mxu0 %v3049_v28  ;;  %v1222_v32 = vsub.f32 %v3195_v14, %v3846_v12  ;;  %v3946_v47 = vld [vmem:[#allocation19_spill] sm:$0xff] }
 0x1a0   :  { %v248_v12 = vadd.f32 %v3175_v17, %v3946_v47 }
 0x1a1   :  { %v3213_v42 = vand.u32 4294901760, %v1094_v27  ;;  %v1223_v56 = vand.u32 4294901760, %v1222_v32  ;;  %v3947_v32 = vld [vmem:[#allocation22_spill] sm:$0xff] }
 0x1a2   :  { %v447_v18 = vadd.f32 %v3947_v32, %v248_v12 }
 0x1a3   :  { %v3216_v21 = vsub.f32 %v1094_v27, %v3213_v42  ;;  %1224 = vmatmul.f32.gmra.mxu2 %v1223_v56  ;;  %1493 = vmatmul.f32.gmra.mxu3 %v3213_v42  ;;  %v742_v27 = vadd.f32 %v3008_v55, %v583_v50  ;;  %v3231_v56 = vpop.f32.mrf.mxu2 }
 0x1a4   :  { %v904_v46 = vpop.f32.mrf.mxu0  ;;  %v1023_v19 = vpop.f32.mrf.mxu1  ;;  %v588_v12 = vadd.f32 %v3046_v35, %v447_v18 }
 0x1a5   :  { %v1024_v34 = vadd.f32 %v1023_v19, %v901_v58  ;;  %v1229_v4 = vand.u32 4294901760, %v3216_v21  ;;  %v3235_v58 = vpop.f32.mrf.mxu3  ;;  %v905_v19 = vadd.f32 %v904_v46, %v742_v27  ;;  %v3949_v27 = vld [vmem:[#allocation24_spill] sm:$0xff] }
 0x1a7   :  { %v1095_v62 = vmax.f32 %v1024_v34, 0.0  ;;  %1616 = vmatmul.f32.gmra.mxu0 %v3068_v43  ;;  %1770 = vmatmul.f32.vlgmr.msra.gmra.mxu1 %v1165_v48  ;;  %v1230_v44 = vsub.f32 %v3216_v21, %v1229_v4  ;;  %v3948_v34 = vld [vmem:[#allocation21_spill] sm:$0xff] }
 0x1a8   :  { %v256_v55 = vadd.f32 %v3175_v17, %v3948_v34 }
 0x1a9   :  { %v3233_v5 = vand.u32 4294901760, %v1095_v62  ;;  %v1231_v1 = vand.u32 4294901760, %v1230_v44 }
 0x1ab   :  { %v3238_v47 = vsub.f32 %v1095_v62, %v3233_v5  ;;  %1232 = vmatmul.f32.gmra.mxu2 %v1231_v1  ;;  %1497 = vmatmul.f32.gmra.mxu3 %v3233_v5  ;;  %v748_v62 = vadd.f32 %v3030_v9, %v588_v12  ;;  %v451_v1 = vadd.f32 %v3949_v27, %v256_v55  ;;  %v3255_v18 = vpop.f32.mrf.mxu2 }
 0x1ac   :  { %v908_v28 = vpop.f32.mrf.mxu0  ;;  %v1027_v48 = vpop.f32.mrf.mxu1 }
 0x1ad   :  { %v1028_v50 = vadd.f32 %v1027_v48, %v905_v19  ;;  %v3847_v32 = vand.u32 4294901760, %v3238_v47  ;;  %v909_v19 = vadd.f32 %v908_v28, %v748_v62  ;;  %v593_v9 = vadd.f32 %v3074_v16, %v451_v1  ;;  %v3264_v55 = vpop.f32.mrf.mxu3  ;;  %v3951_v62 = vld [vmem:[#allocation26_spill] sm:$0xff] }
 0x1af   :  { %v1096_v44 = vmax.f32 %v1028_v50, 0.0  ;;  %1621 = vmatmul.f32.gmra.mxu0 %v3089_v38  ;;  %1776 = vmatmul.f32.gmra.mxu1 %v1173_v41  ;;  %v1238_v46 = vsub.f32 %v3238_v47, %v3847_v32  ;;  %v3950_v50 = vld [vmem:[#allocation23_spill] sm:$0xff] }
 0x1b0   :  { %v264_v32 = vadd.f32 %v3175_v17, %v3950_v50  ;;  %v3952_v50 = vld [vmem:[#allocation25_spill] sm:$0xff] }
 0x1b1   :  { %v3253_v34 = vand.u32 4294901760, %v1096_v44  ;;  %v1239_v35 = vand.u32 4294901760, %v1238_v46 }
 0x1b3   :  { %v3258_v48 = vsub.f32 %v1096_v44, %v3253_v34  ;;  %1240 = vmatmul.f32.gmra.mxu2 %v1239_v35  ;;  %1501 = vmatmul.f32.gmra.mxu3 %v3253_v34  ;;  %v754_v44 = vadd.f32 %v3055_v61, %v593_v9  ;;  %v455_v35 = vadd.f32 %v3951_v62, %v264_v32  ;;  %v3284_v61 = vpop.f32.mrf.mxu2 }
 0x1b4   :  { %v912_v43 = vpop.f32.mrf.mxu0  ;;  %v1031_v41 = vpop.f32.mrf.mxu1 }
 0x1b5   :  { %v1032_v12 = vadd.f32 %v1031_v41, %v909_v19  ;;  %v3848_v46 = vand.u32 4294901760, %v3258_v48  ;;  %v913_v19 = vadd.f32 %v912_v43, %v754_v44 }
 0x1b7   :  { %v1097_v27 = vmax.f32 %v1032_v12, 0.0  ;;  %1626 = vmatmul.f32.gmra.mxu0 %v3110_v59  ;;  %1782 = vmatmul.f32.gmra.mxu1 %v1181_v7  ;;  %v1246_v28 = vsub.f32 %v3258_v48, %v3848_v46  ;;  %v272_v12 = vadd.f32 %v3175_v17, %v3952_v50  ;;  %v598_v46 = vadd.f32 %v3096_v36, %v455_v35  ;;  %v3953_v36 = vld [vmem:[#allocation28_spill] sm:$0xff]  ;;  %v3954_v50 = vld [vmem:[#allocation27_spill] sm:$0xff] }
 0x1b9   :  { %v3275_v16 = vand.u32 4294901760, %v1097_v27  ;;  %v1247_v1 = vand.u32 4294901760, %v1246_v28  ;;  %v3287_v28 = vpop.f32.mrf.mxu3  ;;  %v760_v44 = vadd.f32 %v3077_v25, %v598_v46  ;;  %v459_v62 = vadd.f32 %v3953_v36, %v272_v12 }
 0x1bb   :  { %v3278_v41 = vsub.f32 %v1097_v27, %v3275_v16  ;;  %1248 = vmatmul.f32.gmra.mxu2 %v1247_v1  ;;  %1505 = vmatmul.f32.gmra.mxu3 %v3275_v16  ;;  %v3307_v12 = vpop.f32.mrf.mxu2 }
 0x1bc   :  { %v916_v38 = vpop.f32.mrf.mxu0  ;;  %v1035_v7 = vpop.f32.mrf.mxu1 }
 0x1bd   :  { %v1036_v32 = vadd.f32 %v1035_v7, %v913_v19  ;;  %v3849_v9 = vand.u32 4294901760, %v3278_v41  ;;  %v917_v19 = vadd.f32 %v916_v38, %v760_v44  ;;  %v3955_v44 = vld [vmem:[#allocation31_spill] sm:$0xff] }
 0x1bf   :  { %v1098_v43 = vmax.f32 %v1036_v32, 0.0  ;;  %1631 = vmatmul.f32.gmra.mxu0 %v3131_v39  ;;  %1788 = vmatmul.f32.gmra.mxu1 %v1189_v23  ;;  %v1254_v27 = vsub.f32 %v3278_v41, %v3849_v9  ;;  %v280_v32 = vadd.f32 %v3175_v17, %v3954_v50  ;;  %v603_v9 = vadd.f32 %v3124_v13, %v459_v62  ;;  %v3956_v50 = vld [vmem:[#allocation30_spill] sm:$0xff] }
 0x1c1   :  { %v3297_v35 = vand.u32 4294901760, %v1098_v43  ;;  %v1255_v1 = vand.u32 4294901760, %v1254_v27  ;;  %v463_v36 = vadd.f32 %v3955_v44, %v280_v32  ;;  %v3317_v13 = vpop.f32.mrf.mxu3 }
 0x1c3   :  { %v3300_v7 = vsub.f32 %v1098_v43, %v3297_v35  ;;  %1256 = vmatmul.f32.gmra.mxu2 %v1255_v1  ;;  %1509 = vmatmul.f32.gmra.mxu3 %v3297_v35  ;;  %v766_v43 = vadd.f32 %v3105_v0, %v603_v9  ;;  %v608_v0 = vadd.f32 %v3147_v60, %v463_v36 }
 0x1c4   :  { %v920_v59 = vpop.f32.mrf.mxu0  ;;  %v1039_v23 = vpop.f32.mrf.mxu1 }
 0x1c5   :  { %v1040_v25 = vadd.f32 %v1039_v23, %v917_v19  ;;  %v3854_v46 = vand.u32 4294901760, %v3300_v7  ;;  %v921_v19 = vadd.f32 %v920_v59, %v766_v43 }
 0x1c7   :  { %v1099_v27 = vmax.f32 %v1040_v25, 0.0  ;;  %1636 = vmatmul.f32.gmra.mxu0 %v3150_v11  ;;  %1794 = vmatmul.f32.gmra.mxu1 %v1197_v22  ;;  %v1262_v38 = vsub.f32 %v3300_v7, %v3854_v46  ;;  %v288_v25 = vadd.f32 %v3175_v17, %v3956_v50 }
 0x1c9   :  { %v3319_v62 = vand.u32 4294901760, %v1099_v27  ;;  %v1263_v1 = vand.u32 4294901760, %v1262_v38  ;;  %v3957_v38 = vld [vmem:[#allocation33_spill] sm:$0xff] }
 0x1ca   :  { %v467_v43 = vadd.f32 %v3957_v38, %v288_v25 }
 0x1cb   :  { %v3322_v23 = vsub.f32 %v1099_v27, %v3319_v62  ;;  %1264 = vmatmul.f32.gmra.mxu2 %v1263_v1  ;;  %1513 = vmatmul.f32.gmra.mxu3 %v3319_v62  ;;  %v772_v27 = vadd.f32 %v3128_v31, %v608_v0  ;;  %v3337_v1 = vpop.f32.mrf.mxu2 }
 0x1cc   :  { %v924_v39 = vpop.f32.mrf.mxu0  ;;  %v1043_v22 = vpop.f32.mrf.mxu1  ;;  %v613_v25 = vadd.f32 %v3180_v20, %v467_v43 }
 0x1cd   :  { %v1044_v9 = vadd.f32 %v1043_v22, %v921_v19  ;;  %v3851_v32 = vand.u32 4294901760, %v3322_v23  ;;  %v3341_v19 = vpop.f32.mrf.mxu3  ;;  %v925_v22 = vadd.f32 %v924_v39, %v772_v27  ;;  %v3959_v27 = vld [vmem:[#allocation36_spill] sm:$0xff] }
 0x1cf   :  { %v1100_v44 = vmax.f32 %v1044_v9, 0.0  ;;  %1641 = vmatmul.f32.gmra.mxu0 %v3169_v8  ;;  %1800 = vmatmul.f32.gmra.mxu1 %v1205_v24  ;;  %v1270_v59 = vsub.f32 %v3322_v23, %v3851_v32  ;;  %v3958_v9 = vld [vmem:[#allocation32_spill] sm:$0xff] }
 0x1d0   :  { %v296_v31 = vadd.f32 %v3175_v17, %v3958_v9 }
 0x1d1   :  { %v3339_v60 = vand.u32 4294901760, %v1100_v44  ;;  %v1271_v36 = vand.u32 4294901760, %v1270_v59 }
 0x1d3   :  { %v3344_v50 = vsub.f32 %v1100_v44, %v3339_v60  ;;  %1272 = vmatmul.f32.gmra.mxu2 %v1271_v36  ;;  %1517 = vmatmul.f32.gmra.mxu3 %v3339_v60  ;;  %v778_v44 = vadd.f32 %v3156_v54, %v613_v25  ;;  %v471_v36 = vadd.f32 %v3959_v27, %v296_v31  ;;  %v3361_v43 = vpop.f32.mrf.mxu2 }
 0x1d4   :  { %v928_v11 = vpop.f32.mrf.mxu0  ;;  %v1047_v24 = vpop.f32.mrf.mxu1 }
 0x1d5   :  { %v1048_v0 = vadd.f32 %v1047_v24, %v925_v22  ;;  %v3850_v38 = vand.u32 4294901760, %v3344_v50  ;;  %v929_v22 = vadd.f32 %v928_v11, %v778_v44  ;;  %v618_v54 = vadd.f32 %v3202_v10, %v471_v36 }
 0x1d6   :  { %v3961_v11 = vand.u32 4294901760, %v3195_v14 }
 0x1d7   :  { %v1101_v59 = vmax.f32 %v1048_v0, 0.0  ;;  %1646 = vmatmul.f32.gmra.mxu0 %v3195_v14  ;;  %1806 = vmatmul.f32.gmra.mxu1 %v1213_v26  ;;  %v1278_v39 = vsub.f32 %v3344_v50, %v3850_v38  ;;  %v3960_v0 = vld [vmem:[#allocation35_spill] sm:$0xff]  ;;  %v784_v44 = vadd.f32 %v3183_v49, %v618_v54 }
 0x1d8   :  { %v304_v38 = vadd.f32 %v3175_v17, %v3960_v0  ;;  %v3963_v14 = vld [vmem:[#allocation39_spill] sm:$0xff] }
 0x1d9   :  { %v3359_v9 = vand.u32 4294901760, %v1101_v59  ;;  %v1279_v20 = vand.u32 4294901760, %v1278_v39  ;;  %v3371_v39 = vpop.f32.mrf.mxu3 }
 0x1db   :  { %v3364_v24 = vsub.f32 %v1101_v59, %v3359_v9  ;;  %1280 = vmatmul.f32.gmra.mxu2 %v1279_v20  ;;  %1521 = vmatmul.f32.gmra.mxu3 %v3359_v9  ;;  %v3962_v20 = vld [vmem:[#allocation40_spill] sm:$0xff]  ;;  %v3391_v54 = vpop.f32.mrf.mxu2 }
 0x1dc   :  { %v932_v8 = vpop.f32.mrf.mxu0  ;;  %v1051_v26 = vpop.f32.mrf.mxu1  ;;  %v475_v0 = vadd.f32 %v3962_v20, %v304_v38 }
 0x1dd   :  { %v1052_v31 = vadd.f32 %v1051_v26, %v929_v22  ;;  %v3852_v25 = vand.u32 4294901760, %v3364_v24  ;;  %v933_v22 = vadd.f32 %v932_v8, %v784_v44  ;;  %v3964_v44 = vld [vmem:[#allocation44_spill] sm:$0xff] }
 0x1df   :  { %v1102_v27 = vmax.f32 %v1052_v31, 0.0  ;;  %1651 = vmatmul.f32.gmra.mxu0 %v3216_v21  ;;  %1812 = vmatmul.f32.gmra.mxu1 %v3961_v11  ;;  %v1286_v59 = vsub.f32 %v3364_v24, %v3852_v25  ;;  %v312_v31 = vadd.f32 %v3175_v17, %v3963_v14  ;;  %v623_v25 = vadd.f32 %v3231_v56, %v475_v0  ;;  %v3410_v21 = vld [vmem:[%s3820_s4] ss:$0 sm:$0xff] }
 0x1e1   :  { %v3381_v10 = vand.u32 4294901760, %v1102_v27  ;;  %v1287_v36 = vand.u32 4294901760, %v1286_v59  ;;  %v479_v20 = vadd.f32 %v3964_v44, %v312_v31  ;;  %v790_v56 = vadd.f32 %v3211_v30, %v623_v25  ;;  %v3966_v30 = vld [vmem:[#allocation43_spill] sm:$0xff] }
 0x1e2   :  { %v320_v25 = vadd.f32 %v3175_v17, %v3966_v30  ;;  %v3968_v30 = vld [vmem:[#allocation48_spill] sm:$0xff] }
 0x1e3   :  { %v3384_v26 = vsub.f32 %v1102_v27, %v3381_v10  ;;  %1288 = vmatmul.f32.gmra.mxu2 %v1287_v36  ;;  %1525 = vmatmul.f32.gmra.mxu3 %v3381_v10 }
 0x1e4   :  { %v936_v11 = vpop.f32.mrf.mxu0  ;;  %v1055_v32 = vpop.f32.mrf.mxu1 }
 0x1e5   :  { %v1056_v49 = vadd.f32 %v1055_v32, %v933_v22  ;;  %v3853_v38 = vand.u32 4294901760, %v3384_v26  ;;  %v937_v36 = vadd.f32 %v936_v11, %v790_v56 }
 0x1e6   :  { %v1462_v59 = vpop.f32.mrf.mxu3 }
 0x1e7   :  { %v1103_v8 = vmax.f32 %v1056_v49, 0.0  ;;  %1656 = vmatmul.f32.gmra.mxu0 %v3238_v47  ;;  %1818 = vmatmul.f32.gmra.mxu1 %v1229_v4  ;;  %v1294_v27 = vsub.f32 %v3384_v26, %v3853_v38  ;;  %v628_v4 = vadd.f32 %v3255_v18, %v479_v20 }
 0x1e9   :  { %v3401_v32 = vand.u32 4294901760, %v1103_v8  ;;  %v1295_v0 = vand.u32 4294901760, %v1294_v27  ;;  %v796_v20 = vadd.f32 %v3235_v58, %v628_v4 }
 0x1eb   :  { %3965 = vst [vmem:[#allocation29_spill] sm:$0xff] %v3401_v32  ;;  %v3404_v22 = vsub.f32 %v1103_v8, %v3401_v32  ;;  %1296 = vmatmul.f32.gmra.mxu2 %v1295_v0  ;;  %1529 = vmatmul.f32.gmra.mxu3 %v3401_v32  ;;  %v3967_v0 = vand.u32 4294901760, %v3238_v47  ;;  %v3969_v47 = vld [vmem:[#allocation47_spill] sm:$0xff] }
 0x1ec   :  { %v940_v14 = vpop.f32.mrf.mxu0  ;;  %v1059_v31 = vpop.f32.mrf.mxu1 }
 0x1ed   :  { %v1060_v49 = vadd.f32 %v1059_v31, %v937_v36  ;;  %v3855_v11 = vand.u32 4294901760, %v3404_v22  ;;  %v483_v36 = vadd.f32 %v3968_v30, %v320_v25 }
 0x1ee   :  { %v1169_v8 = vpop.f32.mrf.mxu2  ;;  %v1466_v27 = vpop.f32.mrf.mxu3 }
 0x1ef   :  { %v1104_v44 = vmax.f32 %v1060_v49, 0.0  ;;  %v1170_v56 = vadd.f32 %v3410_v21, %v1169_v8  ;;  %1661 = vmatmul.f32.gmra.mxu0 %v3258_v48  ;;  %1824 = vmatmul.f32.gmra.mxu1 %v3967_v0  ;;  %v1302_v18 = vsub.f32 %v3404_v22, %v3855_v11  ;;  %v941_v49 = vadd.f32 %v940_v14, %v796_v20 }
 0x1f0   :  { %v328_v0 = vadd.f32 %v3175_v17, %v3969_v47  ;;  %v633_v58 = vadd.f32 %v3284_v61, %v483_v36 }
 0x1f1   :  { %v3425_v31 = vand.u32 4294901760, %v1104_v44  ;;  %v1303_v38 = vand.u32 4294901760, %v1302_v18  ;;  %v3427_v46 = vadd.f32 %v1462_v59, %v1170_v56 }
 0x1f2   :  { %v487_v20 = vadd.f32 %v2957_v63, %v328_v0  ;;  %v802_v61 = vadd.f32 %v3264_v55, %v633_v58 }
 0x1f3   :  { %v3430_v8 = vsub.f32 %v1104_v44, %v3425_v31  ;;  %1304 = vmatmul.f32.gmra.mxu2 %v1303_v38  ;;  %1533 = vmatmul.f32.gmra.mxu3 %v3425_v31  ;;  %v3970_v38 = vand.u32 4294901760, %v3258_v48 }
 0x1f4   :  { %v944_v11 = vpop.f32.mrf.mxu0  ;;  %v1063_v32 = vpop.f32.mrf.mxu1  ;;  %v638_v48 = vadd.f32 %v3307_v12, %v487_v20 }
 0x1f5   :  { %v1064_v4 = vadd.f32 %v1063_v32, %v941_v49  ;;  %v1309_v25 = vand.u32 4294901760, %v3430_v8  ;;  %v945_v49 = vadd.f32 %v944_v11, %v802_v61 }
 0x1f6   :  { %v1177_v18 = vpop.f32.mrf.mxu2  ;;  %v1470_v59 = vpop.f32.mrf.mxu3 }
 0x1f7   :  { %v1105_v56 = vmax.f32 %v1064_v4, 0.0  ;;  %v1178_v14 = vadd.f32 %v3410_v21, %v1177_v18  ;;  %1666 = vmatmul.f32.gmra.mxu0 %v3278_v41  ;;  %1830 = vmatmul.f32.gmra.mxu1 %v3970_v38  ;;  %v1310_v44 = vsub.f32 %v3430_v8, %v1309_v25  ;;  %v3971_v38 = vld [vmem:[#allocation49_spill] sm:$0xff] }
 0x1f8   :  { %v336_v63 = vadd.f32 %v3175_v17, %v3971_v38 }
 0x1f9   :  { %v3446_v32 = vand.u32 4294901760, %v1105_v56  ;;  %v1311_v30 = vand.u32 4294901760, %v1310_v44  ;;  %v3448_v36 = vadd.f32 %v1466_v27, %v1178_v14  ;;  %v808_v44 = vadd.f32 %v3287_v28, %v638_v48 }
 0x1fa   :  { %v491_v20 = vadd.f32 %v2972_v52, %v336_v63 }
 0x1fb   :  { %v3451_v47 = vsub.f32 %v1105_v56, %v3446_v32  ;;  %1312 = vmatmul.f32.gmra.mxu2 %v1311_v30  ;;  %1537 = vmatmul.f32.gmra.mxu3 %v3446_v32  ;;  %v3972_v56 = vand.u32 4294901760, %v3278_v41  ;;  %v344_v41 = vadd.f32 %v3175_v17, %v2970_v45 }
 0x1fc   :  { %v948_v4 = vpop.f32.mrf.mxu0  ;;  %v1067_v18 = vpop.f32.mrf.mxu1  ;;  %v643_v28 = vadd.f32 %v3337_v1, %v491_v20 }
 0x1fd   :  { %v1068_v55 = vadd.f32 %v1067_v18, %v945_v49  ;;  %v1317_v0 = vand.u32 4294901760, %v3451_v47  ;;  %v949_v18 = vadd.f32 %v948_v4, %v808_v44 }
 0x1fe   :  { %v1185_v58 = vpop.f32.mrf.mxu2  ;;  %v1474_v27 = vpop.f32.mrf.mxu3  ;;  %v814_v1 = vadd.f32 %v3317_v13, %v643_v28 }
 0x1ff   :  { %v1106_v14 = vmax.f32 %v1068_v55, 0.0  ;;  %v1186_v11 = vadd.f32 %v3410_v21, %v1185_v58  ;;  %1671 = vmatmul.f32.gmra.mxu0 %v3300_v7  ;;  %1836 = vmatmul.f32.gmra.mxu1 %v3972_v56  ;;  %v1318_v12 = vsub.f32 %v3451_v47, %v1317_v0  ;;  %v495_v56 = vadd.f32 %v2993_v15, %v344_v41 }
 0x200   :  { %v352_v15 = vadd.f32 %v3175_v17, %v2991_v3 }
 0x201   :  { %v3467_v61 = vand.u32 4294901760, %v1106_v14  ;;  %v1319_v30 = vand.u32 4294901760, %v1318_v12  ;;  %v3469_v49 = vadd.f32 %v1470_v59, %v1186_v11 }
 0x202   :  { %v499_v17 = vadd.f32 %v3013_v6, %v352_v15 }
 0x203   :  { %v3472_v38 = vsub.f32 %v1106_v14, %v3467_v61  ;;  %1320 = vmatmul.f32.gmra.mxu2 %v1319_v30  ;;  %1541 = vmatmul.f32.gmra.mxu3 %v3467_v61  ;;  %v3973_v14 = vand.u32 4294901760, %v3300_v7  ;;  %v648_v7 = vadd.f32 %v3361_v43, %v495_v56 }
 0x204   :  { %v952_v55 = vpop.f32.mrf.mxu0  ;;  %v1071_v58 = vpop.f32.mrf.mxu1 }
 0x205   :  { %v1072_v52 = vadd.f32 %v1071_v58, %v949_v18  ;;  %v1325_v48 = vand.u32 4294901760, %v3472_v38  ;;  %v953_v30 = vadd.f32 %v952_v55, %v814_v1  ;;  %v820_v3 = vadd.f32 %v3341_v19, %v648_v7 }
 0x206   :  { %v1193_v63 = vpop.f32.mrf.mxu2  ;;  %v1478_v59 = vpop.f32.mrf.mxu3 }
 0x207   :  { %v1107_v11 = vmax.f32 %v1072_v52, 0.0  ;;  %v1194_v4 = vadd.f32 %v3410_v21, %v1193_v63  ;;  %1676 = vmatmul.f32.gmra.mxu0 %v3322_v23  ;;  %1842 = vmatmul.f32.gmra.mxu1 %v3973_v14  ;;  %v1326_v45 = vsub.f32 %v3472_v38, %v1325_v48 }
 0x209   :  { %v3488_v12 = vand.u32 4294901760, %v1107_v11  ;;  %v1327_v44 = vand.u32 4294901760, %v1326_v45  ;;  %v3490_v20 = vadd.f32 %v1474_v27, %v1194_v4 }
 0x20b   :  { %v3493_v18 = vsub.f32 %v1107_v11, %v3488_v12  ;;  %1328 = vmatmul.f32.gmra.mxu2 %v1327_v44  ;;  %1545 = vmatmul.f32.gmra.mxu3 %v3488_v12  ;;  %v3974_v11 = vand.u32 4294901760, %v3322_v23  ;;  %v653_v44 = vadd.f32 %v3391_v54, %v499_v17 }
 0x20c   :  { %v1075_v58 = vpop.f32.mrf.mxu1  ;;  %v956_v41 = vpop.f32.mrf.mxu0 }
 0x20d   :  { %v1076_v13 = vadd.f32 %v1075_v58, %v953_v30  ;;  %v1333_v28 = vand.u32 4294901760, %v3493_v18  ;;  %v957_v56 = vadd.f32 %v956_v41, %v820_v3  ;;  %v826_v54 = vadd.f32 %v3371_v39, %v653_v44 }
 0x20e   :  { %v1201_v52 = vpop.f32.mrf.mxu2  ;;  %v1482_v27 = vpop.f32.mrf.mxu3 }
 0x20f   :  { %v1108_v63 = vmax.f32 %v1076_v13, 0.0  ;;  %v1202_v55 = vadd.f32 %v3410_v21, %v1201_v52  ;;  %1681 = vmatmul.f32.gmra.mxu0 %v3344_v50  ;;  %1848 = vmatmul.f32.gmra.mxu1 %v3974_v11  ;;  %v1334_v43 = vsub.f32 %v3493_v18, %v1333_v28 }
 0x211   :  { %v3509_v4 = vand.u32 4294901760, %v1108_v63  ;;  %v1335_v14 = vand.u32 4294901760, %v1334_v43  ;;  %v3511_v45 = vadd.f32 %v1478_v59, %v1202_v55  ;;  %v3975_v59 = vand.u32 4294901760, %v3344_v50 }
 0x213   :  { %v3514_v1 = vsub.f32 %v1108_v63, %v3509_v4  ;;  %1336 = vmatmul.f32.gmra.mxu2 %v1335_v14  ;;  %1549 = vmatmul.f32.gmra.mxu3 %v3509_v4 }
 0x214   :  { %v1079_v23 = vpop.f32.mrf.mxu1  ;;  %v960_v13 = vpop.f32.mrf.mxu0 }
 0x215   :  { %v1080_v30 = vadd.f32 %v1079_v23, %v957_v56  ;;  %v1341_v19 = vand.u32 4294901760, %v3514_v1  ;;  %v961_v11 = vadd.f32 %v960_v13, %v826_v54  ;;  %v3977_v54 = vand.u32 4294901760, %v3384_v26 }
 0x216   :  { %v1209_v7 = vpop.f32.mrf.mxu2  ;;  %v1486_v6 = vpop.f32.mrf.mxu3 }
 0x217   :  { %v1109_v58 = vmax.f32 %v1080_v30, 0.0  ;;  %v1210_v15 = vadd.f32 %v3410_v21, %v1209_v7  ;;  %1686 = vmatmul.f32.gmra.mxu0 %v3364_v24  ;;  %1854 = vmatmul.f32.gmra.mxu1 %v3975_v59  ;;  %v1342_v41 = vsub.f32 %v3514_v1, %v1341_v19 }
 0x219   :  { %v3527_v52 = vand.u32 4294901760, %v1109_v58  ;;  %v1343_v63 = vand.u32 4294901760, %v1342_v41  ;;  %v3529_v55 = vadd.f32 %v1482_v27, %v1210_v15  ;;  %v3976_v27 = vand.u32 4294901760, %v3364_v24 }
 0x21b   :  { %v3532_v43 = vsub.f32 %v1109_v58, %v3527_v52  ;;  %1344 = vmatmul.f32.gmra.mxu2 %v1343_v63  ;;  %1553 = vmatmul.f32.gmra.mxu3 %v3527_v52 }
 0x21c   :  { %v1083_v50 = vpop.f32.mrf.mxu1 }
 0x21d   :  { %v1084_v3 = vadd.f32 %v1083_v50, %v961_v11  ;;  %v1349_v17 = vand.u32 4294901760, %v3532_v43 }
 0x21e   :  { %v1217_v14 = vpop.f32.mrf.mxu2  ;;  %v1490_v56 = vpop.f32.mrf.mxu3 }
 0x21f   :  { %v1110_v23 = vmax.f32 %v1084_v3, 0.0  ;;  %v1218_v39 = vadd.f32 %v3410_v21, %v1217_v14  ;;  %1691 = vmatmul.f32.gmra.mxu0 %v3384_v26  ;;  %1860 = vmatmul.f32.gmra.mxu1 %v3976_v27  ;;  %v1350_v44 = vsub.f32 %v3532_v43, %v1349_v17 }
 0x221   :  { %v3543_v30 = vand.u32 4294901760, %v1110_v23  ;;  %v1351_v7 = vand.u32 4294901760, %v1350_v44  ;;  %v3545_v58 = vadd.f32 %v1486_v6, %v1218_v39 }
 0x223   :  { %v3548_v15 = vsub.f32 %v1110_v23, %v3543_v30  ;;  %1352 = vmatmul.f32.gmra.mxu2 %v1351_v7  ;;  %1557 = vmatmul.f32.gmra.mxu3 %v3543_v30  ;;  %v3978_v23 = vand.u32 4294901760, %v3404_v22 }
 0x225   :  { %v1357_v59 = vand.u32 4294901760, %v3548_v15 }
 0x226   :  { %v1225_v41 = vpop.f32.mrf.mxu2  ;;  %v1494_v24 = vpop.f32.mrf.mxu3 }
 0x227   :  { %v1226_v13 = vadd.f32 %v3410_v21, %v1225_v41  ;;  %1696 = vmatmul.f32.gmra.mxu0 %v3404_v22  ;;  %1866 = vmatmul.f32.gmra.mxu1 %v3977_v54  ;;  %v1358_v6 = vsub.f32 %v3548_v15, %v1357_v59 }
 0x229   :  { %v1359_v63 = vand.u32 4294901760, %v1358_v6  ;;  %v3559_v11 = vadd.f32 %v1490_v56, %v1226_v13 }
 0x22b   :  { %1360 = vmatmul.f32.gmra.mxu2 %v1359_v63  ;;  %2116 = vmatmul.f32.vlgmr.msra.gmra.mxu3 %v3043_v33 }
 0x22e   :  { %v1233_v50 = vpop.f32.mrf.mxu2  ;;  %v1498_v3 = vpop.f32.mrf.mxu3 }
 0x22f   :  { %v1234_v14 = vadd.f32 %v3410_v21, %v1233_v50  ;;  %1701 = vmatmul.f32.gmra.mxu0 %v3430_v8  ;;  %1872 = vmatmul.f32.gmra.mxu1 %v3978_v23 }
 0x231   :  { %v3566_v26 = vadd.f32 %v1494_v24, %v1234_v14 }
 0x233   :  { %1983 = vmatmul.f32.vlgmr.msra.gmra.mxu2 %v3043_v33  ;;  %2120 = vmatmul.f32.gmra.mxu3 %v3065_v29 }
 0x236   :  { %v1241_v56 = vpop.f32.mrf.mxu2  ;;  %v1502_v39 = vpop.f32.mrf.mxu3 }
 0x237   :  { %v1242_v27 = vadd.f32 %v3410_v21, %v1241_v56  ;;  %1706 = vmatmul.f32.gmra.mxu0 %v3451_v47  ;;  %1878 = vmatmul.f32.gmra.mxu1 %v1309_v25 }
 0x239   :  { %v3574_v44 = vadd.f32 %v1498_v3, %v1242_v27 }
 0x23b   :  { %1987 = vmatmul.f32.gmra.mxu2 %v3065_v29  ;;  %2124 = vmatmul.f32.gmra.mxu3 %v3086_v2 }
 0x23e   :  { %v1249_v22 = vpop.f32.mrf.mxu2  ;;  %v1506_v7 = vpop.f32.mrf.mxu3 }
 0x23f   :  { %v1250_v33 = vadd.f32 %v3410_v21, %v1249_v22  ;;  %1711 = vmatmul.f32.gmra.mxu0 %v3472_v38  ;;  %1884 = vmatmul.f32.gmra.mxu1 %v1317_v0 }
 0x241   :  { %v3582_v41 = vadd.f32 %v1502_v39, %v1250_v33 }
 0x243   :  { %1991 = vmatmul.f32.gmra.mxu2 %v3086_v2  ;;  %2128 = vmatmul.f32.gmra.mxu3 %v3107_v37 }
 0x246   :  { %v1257_v8 = vpop.f32.mrf.mxu2  ;;  %v1510_v25 = vpop.f32.mrf.mxu3 }
 0x247   :  { %v1258_v29 = vadd.f32 %v3410_v21, %v1257_v8  ;;  %1716 = vmatmul.f32.gmra.mxu0 %v3493_v18  ;;  %1890 = vmatmul.f32.gmra.mxu1 %v1325_v48 }
 0x249   :  { %v3590_v24 = vadd.f32 %v1506_v7, %v1258_v29 }
 0x24b   :  { %1995 = vmatmul.f32.gmra.mxu2 %v3107_v37  ;;  %2132 = vmatmul.f32.gmra.mxu3 %v3126_v51 }
 0x24e   :  { %v1265_v47 = vpop.f32.mrf.mxu2  ;;  %v1514_v0 = vpop.f32.mrf.mxu3 }
 0x24f   :  { %v1266_v2 = vadd.f32 %v3410_v21, %v1265_v47  ;;  %1721 = vmatmul.f32.gmra.mxu0 %v3514_v1  ;;  %1896 = vmatmul.f32.gmra.mxu1 %v1333_v28 }
 0x251   :  { %v3598_v13 = vadd.f32 %v1510_v25, %v1266_v2 }
 0x253   :  { %1999 = vmatmul.f32.gmra.mxu2 %v3126_v51  ;;  %2136 = vmatmul.f32.gmra.mxu3 %v3145_v40  ;;  %v3610_v51 = vpop.f32.mrf.mxu0 }
 0x256   :  { %v1273_v38 = vpop.f32.mrf.mxu2  ;;  %v1518_v48 = vpop.f32.mrf.mxu3 }
 0x257   :  { %v1274_v37 = vadd.f32 %v3410_v21, %v1273_v38  ;;  %1726 = vmatmul.f32.gmra.mxu0 %v3532_v43  ;;  %1902 = vmatmul.f32.gmra.mxu1 %v1341_v19  ;;  %v3620_v19 = vpop.f32.mrf.mxu1 }
 0x259   :  { %v3606_v54 = vadd.f32 %v1514_v0, %v1274_v37 }
 0x25b   :  { %2003 = vmatmul.f32.gmra.mxu2 %v3145_v40  ;;  %2140 = vmatmul.f32.gmra.mxu3 %v3166_v53  ;;  %v1617_v8 = vpop.f32.mrf.mxu0 }
 0x25e   :  { %v1281_v18 = vpop.f32.mrf.mxu2  ;;  %v1522_v28 = vpop.f32.mrf.mxu3 }
 0x25f   :  { %v1282_v6 = vadd.f32 %v3410_v21, %v1281_v18  ;;  %1731 = vmatmul.f32.gmra.mxu0 %v3548_v15  ;;  %1908 = vmatmul.f32.gmra.mxu1 %v1349_v17 }
 0x261   :  { %v3616_v63 = vadd.f32 %v1518_v48, %v1282_v6 }
 0x263   :  { %2007 = vmatmul.f32.gmra.mxu2 %v3166_v53  ;;  %2144 = vmatmul.f32.gmra.mxu3 %v3192_v57 }
 0x266   :  { %v1289_v40 = vpop.f32.mrf.mxu2  ;;  %v1526_v1 = vpop.f32.mrf.mxu3 }
 0x267   :  { %v1290_v50 = vadd.f32 %v3410_v21, %v1289_v40  ;;  %1914 = vmatmul.f32.gmra.mxu1 %v1357_v59 }
 0x269   :  { %v3625_v3 = vadd.f32 %v1522_v28, %v1290_v50 }
 0x26b   :  { %2011 = vmatmul.f32.gmra.mxu2 %v3192_v57  ;;  %2148 = vmatmul.f32.gmra.mxu3 %v3213_v42 }
 0x26e   :  { %v1297_v43 = vpop.f32.mrf.mxu2  ;;  %v1530_v17 = vpop.f32.mrf.mxu3 }
 0x26f   :  { %v1298_v53 = vadd.f32 %v3410_v21, %v1297_v43 }
 0x271   :  { %v3630_v14 = vadd.f32 %v1526_v1, %v1298_v53 }
 0x273   :  { %2015 = vmatmul.f32.gmra.mxu2 %v3213_v42  ;;  %2152 = vmatmul.f32.gmra.mxu3 %v3233_v5 }
 0x276   :  { %v1305_v23 = vpop.f32.mrf.mxu2  ;;  %v1534_v56 = vpop.f32.mrf.mxu3 }
 0x277   :  { %v1306_v15 = vadd.f32 %v3410_v21, %v1305_v23 }
 0x279   :  { %v3635_v59 = vadd.f32 %v1530_v17, %v1306_v15 }
 0x27b   :  { %2019 = vmatmul.f32.gmra.mxu2 %v3233_v5  ;;  %2156 = vmatmul.f32.gmra.mxu3 %v3253_v34  ;;  %v1777_v5 = vpop.f32.mrf.mxu1 }
 0x27e   :  { %v1313_v57 = vpop.f32.mrf.mxu2  ;;  %v1538_v39 = vpop.f32.mrf.mxu3 }
 0x27f   :  { %v1314_v27 = vadd.f32 %v3410_v21, %v1313_v57 }
 0x281   :  { %v3640_v22 = vadd.f32 %v1534_v56, %v1314_v27 }
 0x283   :  { %2023 = vmatmul.f32.gmra.mxu2 %v3253_v34  ;;  %2160 = vmatmul.f32.gmra.mxu3 %v3275_v16  ;;  %v1622_v34 = vpop.f32.mrf.mxu0  ;;  %v1783_v38 = vpop.f32.mrf.mxu1 }
 0x286   :  { %v1321_v42 = vpop.f32.mrf.mxu2  ;;  %v1542_v7 = vpop.f32.mrf.mxu3 }
 0x287   :  { %v1322_v33 = vadd.f32 %v3410_v21, %v1321_v42  ;;  %v1613_v42 = vadd.f32 %v3610_v51, %v3427_v46 }
 0x289   :  { %v3645_v25 = vadd.f32 %v1538_v39, %v1322_v33  ;;  %v3979_v33 = vld [vmem:[#allocation29_spill] sm:$0xff] }
 0x28b   :  { %2027 = vmatmul.f32.gmra.mxu2 %v3275_v16  ;;  %2164 = vmatmul.f32.gmra.mxu3 %v3297_v35  ;;  %v1627_v16 = vpop.f32.mrf.mxu0  ;;  %v1789_v1 = vpop.f32.mrf.mxu1 }
 0x28e   :  { %v1329_v29 = vpop.f32.mrf.mxu2  ;;  %v1546_v47 = vpop.f32.mrf.mxu3 }
 0x28f   :  { %v1330_v0 = vadd.f32 %v3410_v21, %v1329_v29  ;;  %v1772_v29 = vadd.f32 %v3620_v19, %v1613_v42 }
 0x291   :  { %v3650_v2 = vadd.f32 %v1542_v7, %v1330_v0 }
 0x293   :  { %2031 = vmatmul.f32.gmra.mxu2 %v3297_v35  ;;  %2168 = vmatmul.f32.gmra.mxu3 %v3319_v62  ;;  %v1632_v53 = vpop.f32.mrf.mxu0 }
 0x296   :  { %v1337_v48 = vpop.f32.mrf.mxu2  ;;  %v1550_v37 = vpop.f32.mrf.mxu3 }
 0x297   :  { %v1338_v18 = vadd.f32 %v3410_v21, %v1337_v48 }
 0x299   :  { %v3655_v28 = vadd.f32 %v1546_v47, %v1338_v18 }
 0x29b   :  { %2035 = vmatmul.f32.gmra.mxu2 %v3319_v62  ;;  %2172 = vmatmul.f32.gmra.mxu3 %v3339_v60  ;;  %v1795_v62 = vpop.f32.mrf.mxu1  ;;  %v1637_v27 = vpop.f32.mrf.mxu0 }
 0x29e   :  { %v1345_v6 = vpop.f32.mrf.mxu2  ;;  %v1554_v40 = vpop.f32.mrf.mxu3 }
 0x29f   :  { %v1346_v50 = vadd.f32 %v3410_v21, %v1345_v6 }
 0x2a1   :  { %v3660_v35 = vadd.f32 %v1550_v37, %v1346_v50 }
 0x2a3   :  { %2039 = vmatmul.f32.gmra.mxu2 %v3339_v60  ;;  %2176 = vmatmul.f32.gmra.mxu3 %v3359_v9  ;;  %v1801_v7 = vpop.f32.mrf.mxu1  ;;  %v1642_v37 = vpop.f32.mrf.mxu0 }
 0x2a6   :  { %v1353_v43 = vpop.f32.mrf.mxu2  ;;  %v1558_v17 = vpop.f32.mrf.mxu3 }
 0x2a7   :  { %v1354_v23 = vadd.f32 %v3410_v21, %v1353_v43 }
 0x2a9   :  { %v3665_v56 = vadd.f32 %v1554_v40, %v1354_v23  ;;  %v1623_v40 = vadd.f32 %v1622_v34, %v3469_v49 }
 0x2ab   :  { %2043 = vmatmul.f32.gmra.mxu2 %v3359_v9  ;;  %2180 = vmatmul.f32.gmra.mxu3 %v3381_v10 }
 0x2ae   :  { %v1361_v15 = vpop.f32.mrf.mxu2  ;;  %v2117_v57 = vpop.f32.mrf.mxu3 }
 0x2af   :  { %v1362_v39 = vadd.f32 %v3410_v21, %v1361_v15  ;;  %v1618_v21 = vadd.f32 %v1617_v8, %v3448_v36  ;;  %v1784_v36 = vadd.f32 %v1783_v38, %v1623_v40  ;;  %v1647_v8 = vpop.f32.mrf.mxu0  ;;  %v1628_v15 = vadd.f32 %v1627_v16, %v3490_v20 }
 0x2b1   :  { %v3670_v60 = vadd.f32 %v1558_v17, %v1362_v39  ;;  %v1778_v46 = vadd.f32 %v1777_v5, %v1618_v21  ;;  %v1643_v21 = vadd.f32 %v1642_v37, %v3545_v58 }
 0x2b3   :  { %2047 = vmatmul.f32.gmra.mxu2 %v3381_v10  ;;  %2184 = vmatmul.f32.gmra.mxu3 %v3979_v33  ;;  %v1807_v10 = vpop.f32.mrf.mxu1 }
 0x2b6   :  { %v1984_v9 = vpop.f32.mrf.mxu2  ;;  %v2121_v47 = vpop.f32.mrf.mxu3 }
 0x2b7   :  { %v1985_v0 = vadd.f32 %v1984_v9, %v1772_v29  ;;  %v1652_v38 = vpop.f32.mrf.mxu0 }
 0x2b9   :  { %v2118_v48 = vadd.f32 %v2117_v57, %v1985_v0 }
 0x2bb   :  { %2217 = vst.msk [vmem:[%s3821_s5] sm:$0xff] %vm2216_vm1, %v2118_v48  ;;  %2051 = vmatmul.f32.gmra.mxu2 %v3979_v33  ;;  %2188 = vmatmul.f32.gmra.mxu3 %v3425_v31  ;;  %v1813_v43 = vpop.f32.mrf.mxu1  ;;  %v1633_v33 = vadd.f32 %v1632_v53, %v3511_v45 }
 0x2be   :  { %v1988_v51 = vpop.f32.mrf.mxu2  ;;  %v2125_v19 = vpop.f32.mrf.mxu3 }
 0x2bf   :  { %v1989_v18 = vadd.f32 %v1988_v51, %v1778_v46  ;;  %v1657_v29 = vpop.f32.mrf.mxu0 }
 0x2c1   :  { %v2122_v6 = vadd.f32 %v2121_v47, %v1989_v18  ;;  %v1638_v47 = vadd.f32 %v1637_v27, %v3529_v55  ;;  %v1648_v18 = vadd.f32 %v1647_v8, %v3559_v11 }
 0x2c3   :  { %2218 = vst.msk [vmem:[%s3821_s5 + $0x8] sm:$0xff] %vm2216_vm1, %v2122_v6  ;;  %2055 = vmatmul.f32.gmra.mxu2 %v3425_v31  ;;  %2192 = vmatmul.f32.gmra.mxu3 %v3446_v32  ;;  %v1790_v31 = vadd.f32 %v1789_v1, %v1628_v15  ;;  %v1819_v39 = vpop.f32.mrf.mxu1  ;;  %v1658_v15 = vadd.f32 %v1657_v29, %v3574_v44 }
 0x2c6   :  { %v1992_v50 = vpop.f32.mrf.mxu2  ;;  %v2129_v5 = vpop.f32.mrf.mxu3 }
 0x2c7   :  { %v1993_v17 = vadd.f32 %v1992_v50, %v1784_v36  ;;  %v1662_v46 = vpop.f32.mrf.mxu0  ;;  %v1653_v50 = vadd.f32 %v1652_v38, %v3566_v26 }
 0x2c9   :  { %v2126_v23 = vadd.f32 %v2125_v19, %v1993_v17  ;;  %v1820_v11 = vadd.f32 %v1819_v39, %v1653_v50 }
 0x2cb   :  { %2219 = vst.msk [vmem:[%s3821_s5 + $0x10] sm:$0xff] %vm2216_vm1, %v2126_v23  ;;  %2059 = vmatmul.f32.gmra.mxu2 %v3446_v32  ;;  %2196 = vmatmul.f32.gmra.mxu3 %v3467_v61  ;;  %v1796_v32 = vadd.f32 %v1795_v62, %v1633_v33  ;;  %v1825_v0 = vpop.f32.mrf.mxu1 }
 0x2cc   :  { %v1826_v26 = vadd.f32 %v1825_v0, %v1658_v15 }
 0x2ce   :  { %v1996_v49 = vpop.f32.mrf.mxu2  ;;  %v2133_v34 = vpop.f32.mrf.mxu3 }
 0x2cf   :  { %v1997_v57 = vadd.f32 %v1996_v49, %v1790_v31  ;;  %v1667_v58 = vpop.f32.mrf.mxu0 }
 0x2d1   :  { %v2130_v42 = vadd.f32 %v2129_v5, %v1997_v57  ;;  %v1663_v57 = vadd.f32 %v1662_v46, %v3582_v41 }
 0x2d3   :  { %2220 = vst.msk [vmem:[%s3821_s5 + $0x18] sm:$0xff] %vm2216_vm1, %v2130_v42  ;;  %2063 = vmatmul.f32.gmra.mxu2 %v3467_v61  ;;  %2200 = vmatmul.f32.gmra.mxu3 %v3488_v12  ;;  %v1802_v61 = vadd.f32 %v1801_v7, %v1638_v47  ;;  %v1831_v55 = vpop.f32.mrf.mxu1 }
 0x2d4   :  { %v1832_v44 = vadd.f32 %v1831_v55, %v1663_v57 }
 0x2d6   :  { %v2000_v20 = vpop.f32.mrf.mxu2  ;;  %v2137_v16 = vpop.f32.mrf.mxu3 }
 0x2d7   :  { %v2001_v1 = vadd.f32 %v2000_v20, %v1796_v32  ;;  %v1672_v5 = vpop.f32.mrf.mxu0 }
 0x2d9   :  { %v2134_v9 = vadd.f32 %v2133_v34, %v2001_v1 }
 0x2db   :  { %2221 = vst.msk [vmem:[%s3821_s5 + $0x20] sm:$0xff] %vm2216_vm1, %v2134_v9  ;;  %2067 = vmatmul.f32.gmra.mxu2 %v3488_v12  ;;  %2204 = vmatmul.f32.gmra.mxu3 %v3509_v4  ;;  %v1808_v12 = vadd.f32 %v1807_v10, %v1643_v21  ;;  %v1837_v6 = vpop.f32.mrf.mxu1 }
 0x2de   :  { %v2004_v45 = vpop.f32.mrf.mxu2  ;;  %v2141_v53 = vpop.f32.mrf.mxu3 }
 0x2df   :  { %v2005_v62 = vadd.f32 %v2004_v45, %v1802_v61  ;;  %v1677_v38 = vpop.f32.mrf.mxu0  ;;  %v1673_v45 = vadd.f32 %v1672_v5, %v3598_v13 }
 0x2e0   :  { %v1678_v55 = vadd.f32 %v1677_v38, %v3606_v54 }
 0x2e1   :  { %v2138_v48 = vadd.f32 %v2137_v16, %v2005_v62  ;;  %v1668_v16 = vadd.f32 %v1667_v58, %v3590_v24 }
 0x2e3   :  { %2222 = vst.msk [vmem:[%s3821_s5 + $0x28] sm:$0xff] %vm2216_vm1, %v2138_v48  ;;  %2071 = vmatmul.f32.gmra.mxu2 %v3509_v4  ;;  %2208 = vmatmul.f32.gmra.mxu3 %v3527_v52  ;;  %v1814_v4 = vadd.f32 %v1813_v43, %v1648_v18  ;;  %v1843_v17 = vpop.f32.mrf.mxu1  ;;  %v1838_v41 = vadd.f32 %v1837_v6, %v1668_v16 }
 0x2e4   :  { %v1844_v24 = vadd.f32 %v1843_v17, %v1673_v45 }
 0x2e6   :  { %v2008_v27 = vpop.f32.mrf.mxu2  ;;  %v2145_v7 = vpop.f32.mrf.mxu3 }
 0x2e7   :  { %v2009_v51 = vadd.f32 %v2008_v27, %v1808_v12  ;;  %v1682_v1 = vpop.f32.mrf.mxu0 }
 0x2e8   :  { %v1683_v58 = vadd.f32 %v1682_v1, %v3616_v63 }
 0x2e9   :  { %v2142_v19 = vadd.f32 %v2141_v53, %v2009_v51 }
 0x2eb   :  { %2223 = vst.msk [vmem:[%s3821_s5 + $0x30] sm:$0xff] %vm2216_vm1, %v2142_v19  ;;  %2075 = vmatmul.f32.gmra.mxu2 %v3527_v52  ;;  %2212 = vmatmul.f32.gmra.mxu3 %v3543_v30  ;;  %v1849_v39 = vpop.f32.mrf.mxu1 }
 0x2ec   :  { %v1850_v13 = vadd.f32 %v1849_v39, %v1678_v55 }
 0x2ee   :  { %v2012_v37 = vpop.f32.mrf.mxu2  ;;  %v2149_v10 = vpop.f32.mrf.mxu3 }
 0x2ef   :  { %v2013_v40 = vadd.f32 %v2012_v37, %v1814_v4  ;;  %v1687_v53 = vpop.f32.mrf.mxu0 }
 0x2f0   :  { %v1688_v50 = vadd.f32 %v1687_v53, %v3625_v3 }
 0x2f1   :  { %v2146_v36 = vadd.f32 %v2145_v7, %v2013_v40 }
 0x2f3   :  { %2224 = vst.msk [vmem:[%s3821_s5 + $0x38] sm:$0xff] %vm2216_vm1, %v2146_v36  ;;  %2079 = vmatmul.f32.gmra.mxu2 %v3543_v30  ;;  %v1855_v29 = vpop.f32.mrf.mxu1 }
 0x2f4   :  { %v1856_v54 = vadd.f32 %v1855_v29, %v1683_v58 }
 0x2f6   :  { %v2016_v52 = vpop.f32.mrf.mxu2  ;;  %v2153_v8 = vpop.f32.mrf.mxu3 }
 0x2f7   :  { %v2017_v43 = vadd.f32 %v2016_v52, %v1820_v11  ;;  %v1692_v51 = vpop.f32.mrf.mxu0 }
 0x2f8   :  { %v1693_v17 = vadd.f32 %v1692_v51, %v3630_v14 }
 0x2f9   :  { %v2150_v23 = vadd.f32 %v2149_v10, %v2017_v43 }
 0x2fb   :  { %2225 = vst.msk [vmem:[%s3821_s5 + $0x40] sm:$0xff] %vm2216_vm1, %v2150_v23  ;;  %v1861_v21 = vpop.f32.mrf.mxu1 }
 0x2fc   :  { %v1862_v63 = vadd.f32 %v1861_v21, %v1688_v50 }
 0x2fe   :  { %v2020_v31 = vpop.f32.mrf.mxu2  ;;  %v2157_v49 = vpop.f32.mrf.mxu3 }
 0x2ff   :  { %v2021_v34 = vadd.f32 %v2020_v31, %v1826_v26  ;;  %v1697_v40 = vpop.f32.mrf.mxu0 }
 0x300   :  { %v1698_v38 = vadd.f32 %v1697_v40, %v3635_v59 }
 0x301   :  { %v2154_v30 = vadd.f32 %v2153_v8, %v2021_v34 }
 0x303   :  { %2226 = vst.msk [vmem:[%s3821_s5 + $0x48] sm:$0xff] %vm2216_vm1, %v2154_v30  ;;  %v1867_v18 = vpop.f32.mrf.mxu1 }
 0x304   :  { %v1868_v3 = vadd.f32 %v1867_v18, %v1693_v17 }
 0x306   :  { %v2024_v42 = vpop.f32.mrf.mxu2  ;;  %v2161_v33 = vpop.f32.mrf.mxu3 }
 0x307   :  { %v2025_v32 = vadd.f32 %v2024_v42, %v1832_v44  ;;  %v1702_v23 = vpop.f32.mrf.mxu0 }
 0x309   :  { %v2158_v20 = vadd.f32 %v2157_v49, %v2025_v32  ;;  %v1703_v32 = vadd.f32 %v1702_v23, %v3640_v22 }
 0x30b   :  { %2227 = vst.msk [vmem:[%s3821_s5 + $0x50] sm:$0xff] %vm2216_vm1, %v2158_v20  ;;  %v1873_v11 = vpop.f32.mrf.mxu1 }
 0x30c   :  { %v1874_v14 = vadd.f32 %v1873_v11, %v1698_v38 }
 0x30e   :  { %v2028_v9 = vpop.f32.mrf.mxu2  ;;  %v2165_v47 = vpop.f32.mrf.mxu3 }
 0x30f   :  { %v2029_v0 = vadd.f32 %v2028_v9, %v1838_v41  ;;  %v1707_v30 = vpop.f32.mrf.mxu0 }
 0x311   :  { %v2162_v61 = vadd.f32 %v2161_v33, %v2029_v0 }
 0x313   :  { %2228 = vst.msk [vmem:[%s3821_s5 + $0x58] sm:$0xff] %vm2216_vm1, %v2162_v61  ;;  %v1879_v15 = vpop.f32.mrf.mxu1 }
 0x314   :  { %v1880_v59 = vadd.f32 %v1879_v15, %v1703_v32 }
 0x316   :  { %v2032_v62 = vpop.f32.mrf.mxu2  ;;  %v2169_v48 = vpop.f32.mrf.mxu3 }
 0x317   :  { %v2033_v46 = vadd.f32 %v2032_v62, %v1844_v24  ;;  %v1712_v41 = vpop.f32.mrf.mxu0 }
 0x318   :  { %v1713_v62 = vadd.f32 %v1712_v41, %v3650_v2 }
 0x319   :  { %v2166_v12 = vadd.f32 %v2165_v47, %v2033_v46  ;;  %v1708_v47 = vadd.f32 %v1707_v30, %v3645_v25 }
 0x31b   :  { %2229 = vst.msk [vmem:[%s3821_s5 + $0x60] sm:$0xff] %vm2216_vm1, %v2166_v12  ;;  %v1885_v42 = vpop.f32.mrf.mxu1 }
 0x31c   :  { %v1886_v22 = vadd.f32 %v1885_v42, %v1708_v47 }
 0x31e   :  { %v2036_v27 = vpop.f32.mrf.mxu2  ;;  %v2173_v7 = vpop.f32.mrf.mxu3 }
 0x31f   :  { %v2037_v19 = vadd.f32 %v2036_v27, %v1850_v13  ;;  %v1717_v53 = vpop.f32.mrf.mxu0 }
 0x320   :  { %v1718_v13 = vadd.f32 %v1717_v53, %v3655_v28 }
 0x321   :  { %v2170_v4 = vadd.f32 %v2169_v48, %v2037_v19 }
 0x323   :  { %2230 = vst.msk [vmem:[%s3821_s5 + $0x68] sm:$0xff] %vm2216_vm1, %v2170_v4  ;;  %v1891_v9 = vpop.f32.mrf.mxu1 }
 0x324   :  { %v1892_v25 = vadd.f32 %v1891_v9, %v1713_v62 }
 0x326   :  { %v2040_v37 = vpop.f32.mrf.mxu2  ;;  %v2177_v10 = vpop.f32.mrf.mxu3 }
 0x327   :  { %v2041_v6 = vadd.f32 %v2040_v37, %v1856_v54  ;;  %v1722_v27 = vpop.f32.mrf.mxu0 }
 0x328   :  { %v1723_v4 = vadd.f32 %v1722_v27, %v3660_v35 }
 0x329   :  { %v2174_v36 = vadd.f32 %v2173_v7, %v2041_v6 }
 0x32b   :  { %2231 = vst.msk [vmem:[%s3821_s5 + $0x70] sm:$0xff] %vm2216_vm1, %v2174_v36  ;;  %v1897_v48 = vpop.f32.mrf.mxu1 }
 0x32c   :  { %v1898_v2 = vadd.f32 %v1897_v48, %v1718_v13 }
 0x32e   :  { %v2044_v52 = vpop.f32.mrf.mxu2  ;;  %v2181_v8 = vpop.f32.mrf.mxu3 }
 0x32f   :  { %v2045_v5 = vadd.f32 %v2044_v52, %v1862_v63  ;;  %v1727_v54 = vpop.f32.mrf.mxu0 }
 0x330   :  { %v1728_v36 = vadd.f32 %v1727_v54, %v3665_v56 }
 0x331   :  { %v2178_v43 = vadd.f32 %v2177_v10, %v2045_v5 }
 0x333   :  { %2232 = vst.msk [vmem:[%s3821_s5 + $0x78] sm:$0xff] %vm2216_vm1, %v2178_v43  ;;  %v1903_v7 = vpop.f32.mrf.mxu1 }
 0x334   :  { %v1904_v28 = vadd.f32 %v1903_v7, %v1723_v4 }
 0x336   :  { %v2048_v26 = vpop.f32.mrf.mxu2  ;;  %v2185_v31 = vpop.f32.mrf.mxu3 }
 0x337   :  { %v2049_v49 = vadd.f32 %v2048_v26, %v1868_v3  ;;  %v1732_v52 = vpop.f32.mrf.mxu0 }
 0x338   :  { %v1733_v43 = vadd.f32 %v1732_v52, %v3670_v60 }
 0x339   :  { %v2182_v34 = vadd.f32 %v2181_v8, %v2049_v49 }
 0x33b   :  { %2233 = vst.msk [vmem:[%s3821_s5 + $0x80] sm:$0xff] %vm2216_vm1, %v2182_v34  ;;  %v1909_v6 = vpop.f32.mrf.mxu1 }
 0x33c   :  { %v1910_v35 = vadd.f32 %v1909_v6, %v1728_v36 }
 0x33e   :  { %v2052_v57 = vpop.f32.mrf.mxu2  ;;  %v2189_v39 = vpop.f32.mrf.mxu3 }
 0x33f   :  { %v2053_v44 = vadd.f32 %v2052_v57, %v1874_v14 }
 0x341   :  { %v2186_v33 = vadd.f32 %v2185_v31, %v2053_v44 }
 0x343   :  { %2234 = vst.msk [vmem:[%s3821_s5 + $0x88] sm:$0xff] %vm2216_vm1, %v2186_v33  ;;  %v1915_v5 = vpop.f32.mrf.mxu1 }
 0x344   :  { %v1916_v56 = vadd.f32 %v1915_v5, %v1733_v43 }
 0x346   :  { %v2056_v20 = vpop.f32.mrf.mxu2  ;;  %v2193_v16 = vpop.f32.mrf.mxu3 }
 0x347   :  { %v2057_v1 = vadd.f32 %v2056_v20, %v1880_v59 }
 0x349   :  { %v2190_v29 = vadd.f32 %v2189_v39, %v2057_v1 }
 0x34b   :  { %2235 = vst.msk [vmem:[%s3821_s5 + $0x90] sm:$0xff] %vm2216_vm1, %v2190_v29 }
 0x34e   :  { %v2060_v0 = vpop.f32.mrf.mxu2  ;;  %v2197_v45 = vpop.f32.mrf.mxu3 }
 0x34f   :  { %v2061_v61 = vadd.f32 %v2060_v0, %v1886_v22 }
 0x351   :  { %v2194_v24 = vadd.f32 %v2193_v16, %v2061_v61 }
 0x353   :  { %2236 = vst.msk [vmem:[%s3821_s5 + $0x98] sm:$0xff] %vm2216_vm1, %v2194_v24 }
 0x356   :  { %v2064_v21 = vpop.f32.mrf.mxu2  ;;  %v2201_v55 = vpop.f32.mrf.mxu3 }
 0x357   :  { %v2065_v46 = vadd.f32 %v2064_v21, %v1892_v25 }
 0x359   :  { %v2198_v12 = vadd.f32 %v2197_v45, %v2065_v46 }
 0x35b   :  { %2237 = vst.msk [vmem:[%s3821_s5 + $0xa0] sm:$0xff] %vm2216_vm1, %v2198_v12 }
 0x35e   :  { %v2068_v51 = vpop.f32.mrf.mxu2  ;;  %v2205_v58 = vpop.f32.mrf.mxu3 }
 0x35f   :  { %v2069_v19 = vadd.f32 %v2068_v51, %v1898_v2 }
 0x361   :  { %v2202_v18 = vadd.f32 %v2201_v55, %v2069_v19 }
 0x363   :  { %2238 = vst.msk [vmem:[%s3821_s5 + $0xa8] sm:$0xff] %vm2216_vm1, %v2202_v18 }
 0x366   :  { %v2072_v37 = vpop.f32.mrf.mxu2  ;;  %v2209_v50 = vpop.f32.mrf.mxu3 }
 0x367   :  { %v2073_v10 = vadd.f32 %v2072_v37, %v1904_v28 }
 0x369   :  { %v2206_v40 = vadd.f32 %v2205_v58, %v2073_v10 }
 0x36b   :  { %2239 = vst.msk [vmem:[%s3821_s5 + $0xb0] sm:$0xff] %vm2216_vm1, %v2206_v40 }
 0x36e   :  { %v2076_v11 = vpop.f32.mrf.mxu2  ;;  %v2213_v3 = vpop.f32.mrf.mxu3 }
 0x36f   :  { %v2077_v63 = vadd.f32 %v2076_v11, %v1910_v35 }
 0x371   :  { %v2210_v8 = vadd.f32 %v2209_v50, %v2077_v63 }
 0x373   :  { %2240 = vst.msk [vmem:[%s3821_s5 + $0xb8] sm:$0xff] %vm2216_vm1, %v2210_v8 }
 0x376   :  { %v2080_v17 = vpop.f32.mrf.mxu2 }
 0x377   :  { %v2081_v23 = vadd.f32 %v2080_v17, %v1916_v56 }
 0x379   :  { %v2214_v15 = vadd.f32 %v2213_v3, %v2081_v23 }
 0x37b   :  { %2241 = vst.msk [vmem:[%s3821_s5 + $0xc0] sm:$0xff] %vm2216_vm1, %v2214_v15 }

// kernel: tpu_custom_call.1
= control target key start
LH: loop header
LB: loop body
LE: loop exit
PB: predicated region body
PF: predicated region fallthrough
CT: control target
= control target key end

     0   :  { %vm55_vm0 = vcmask 392192   ;;  %vm2216_vm1 = vcmask 80896   ;;  %s3816_s1 = inlined_call_operand.vmem [shape: f32[48,128], index: 1, kind: input, shape index: {}]   ;;  %s3817_s0 = inlined_call_operand.vmem [shape: f32[200,48], index: 0, kind: input, shape index: {}]   ;;  %s3818_s2 = inlined_call_operand.vmem [shape: f32[1,128], index: 2, kind: input, shape index: {}]   ;;  %s3819_s3 = inlined_call_operand.vmem [shape: f32[128,10], index: 3, kind: input, shape index: {}]   ;;  %s3820_s4 = inlined_call_operand.vmem [shape: f32[1,10], index: 4, kind: input, shape index: {}]   ;;  %s3821_s5 = inlined_call_operand.vmem [shape: f32[200,10], index: 5, kind: output, shape index: {}]  }
   0x1   :  { %v50_v0 = vld [vmem:[%s3816_s1 + $0x28] sm:$0xff]  ;;  %v49_v1 = vld [vmem:[%s3816_s1 + $0x20] sm:$0xff]  ;;  %v48_v2 = vld [vmem:[%s3816_s1 + $0x18] sm:$0xff] }
   0x2   :  { %v2288_v3 = vand.u32 4294901760, %v50_v0  ;;  %v2290_v4 = vand.u32 4294901760, %v49_v1  ;;  %v2292_v5 = vand.u32 4294901760, %v48_v2  ;;  %v47_v6 = vld [vmem:[%s3816_s1 + $0x10] sm:$0xff]  ;;  %v46_v7 = vld [vmem:[%s3816_s1 + $0x8] sm:$0xff]  ;;  %v45_v8 = vld [vmem:[%s3816_s1] sm:$0xff] }
   0x3   :  { %v2303_v9 = vand.u32 4294901760, %v47_v6  ;;  %v2305_v10 = vand.u32 4294901760, %v46_v7  ;;  %v2307_v11 = vand.u32 4294901760, %v45_v8  ;;  %v20_v12 = vld [vmem:[%s3817_s0] sm:$0xff]  ;;  %v21_v13 = vld [vmem:[%s3817_s0 + $0x8] sm:$0xff]  ;;  %v22_v35 = vld [vmem:[%s3817_s0 + $0x10] sm:$0xff] }
   0x4   :  { %142 = vmatpush.msra.mxu0 %v2288_v3  ;;  %v2317_v14 = vsub.f32 %v50_v0, %v2288_v3  ;;  %v2320_v15 = vsub.f32 %v49_v1, %v2290_v4  ;;  %666 = vmatpush.msra.mxu3 %v2288_v3  ;;  %v2324_v16 = vsub.f32 %v48_v2, %v2292_v5  ;;  %v57_v17 = vsel %vm55_vm0, %v20_v12, 0  ;;  %v23_v47 = vld [vmem:[%s3817_s0 + $0x18] sm:$0xff]  ;;  %v24_v58 = vld [vmem:[%s3817_s0 + $0x20] sm:$0xff]  ;;  %v25_v1 = vld [vmem:[%s3817_s0 + $0x28] sm:$0xff] }
   0x5   :  { %v2328_v18 = vsub.f32 %v47_v6, %v2303_v9  ;;  %v2330_v19 = vand.u32 4294901760, %v57_v17  ;;  %v2333_v20 = vsub.f32 %v46_v7, %v2305_v10  ;;  %v2336_v21 = vsub.f32 %v45_v8, %v2307_v11  ;;  %v26_v8 = vld [vmem:[%s3817_s0 + $0x30] sm:$0xff] }
   0x6   :  { %144 = vmatpush.msra.mxu0 %v2290_v4  ;;  %513 = vmatpush.msra.mxu2 %v2317_v14  ;;  %v366_v22 = vand.u32 4294901760, %v2317_v14  ;;  %v372_v23 = vand.u32 4294901760, %v2320_v15  ;;  %v378_v24 = vand.u32 4294901760, %v2324_v16  ;;  %v60_v25 = vsel %vm55_vm0, %v21_v13, 0 }
   0x7   :  { %668 = vmatpush.msra.mxu3 %v2290_v4  ;;  %v154_v26 = vsub.f32 %v57_v17, %v2330_v19  ;;  %v384_v27 = vand.u32 4294901760, %v2328_v18  ;;  %v390_v28 = vand.u32 4294901760, %v2333_v20  ;;  %v2355_v32 = vand.u32 4294901760, %v60_v25 }
   0x8   :  { %146 = vmatpush.msra.mxu0 %v2292_v5  ;;  %516 = vmatpush.msra.mxu2 %v2320_v15  ;;  %v367_v29 = vsub.f32 %v2317_v14, %v366_v22  ;;  %v373_v30 = vsub.f32 %v2320_v15, %v372_v23  ;;  %v379_v31 = vsub.f32 %v2324_v16, %v378_v24  ;;  %v396_v34 = vand.u32 4294901760, %v2336_v21  ;;  %v27_v15 = vld [vmem:[%s3817_s0 + $0x38] sm:$0xff] }
   0x9   :  { %670 = vmatpush.msra.mxu3 %v2292_v5  ;;  %v155_v33 = vand.u32 4294901760, %v154_v26  ;;  %v385_v38 = vsub.f32 %v2328_v18, %v384_v27  ;;  %v162_v39 = vsub.f32 %v60_v25, %v2355_v32  ;;  %v391_v42 = vsub.f32 %v2333_v20, %v390_v28 }
   0xa   :  { %148 = vmatpush.msra.mxu0 %v2303_v9  ;;  %v368_v36 = vand.u32 4294901760, %v367_v29  ;;  %519 = vmatpush.msra.mxu2 %v2324_v16  ;;  %v374_v37 = vand.u32 4294901760, %v373_v30  ;;  %v380_v41 = vand.u32 4294901760, %v379_v31  ;;  %v63_v44 = vsel %vm55_vm0, %v22_v35, 0  ;;  %v29_v30 = vld [vmem:[%s3817_s0 + $0x48] sm:$0xff] }
   0xb   :  { %v156_v40 = vsub.f32 %v154_v26, %v155_v33  ;;  %672 = vmatpush.msra.mxu3 %v2303_v9  ;;  %v163_v43 = vand.u32 4294901760, %v162_v39  ;;  %v2376_v46 = vand.u32 4294901760, %v63_v44  ;;  %v386_v48 = vand.u32 4294901760, %v385_v38  ;;  %v30_v38 = vld [vmem:[%s3817_s0 + $0x50] sm:$0xff] }
   0xc   :  { %150 = vmatpush.msra.mxu0 %v2305_v10  ;;  %369 = vmatpush.msra.mxu1 %v368_v36  ;;  %v397_v49 = vsub.f32 %v2336_v21, %v396_v34  ;;  %v392_v52 = vand.u32 4294901760, %v391_v42  ;;  %v66_v53 = vsel %vm55_vm0, %v23_v47, 0  ;;  %v69_v61 = vsel %vm55_vm0, %v24_v58, 0 }
   0xd   :  { %522 = vmatpush.msra.mxu2 %v2328_v18  ;;  %v157_v45 = vand.u32 4294901760, %v156_v40  ;;  %674 = vmatpush.msra.mxu3 %v2305_v10  ;;  %v164_v50 = vsub.f32 %v162_v39, %v163_v43  ;;  %v170_v51 = vsub.f32 %v63_v44, %v2376_v46  ;;  %v2390_v57 = vand.u32 4294901760, %v66_v53 }
   0xe   :  { %152 = vmatpush.msra.mxu0 %v2307_v11  ;;  %375 = vmatpush.msra.mxu1 %v374_v37  ;;  %v398_v54 = vand.u32 4294901760, %v397_v49  ;;  %v2402_v0 = vand.u32 4294901760, %v69_v61  ;;  %v75_v12 = vsel %vm55_vm0, %v26_v8, 0  ;;  %v78_v18 = vsel %vm55_vm0, %v27_v15, 0 }
   0xf   :  { %158 = vmatmul.f32.vlgmr.msra.gmra.mxu0 %v157_v45  ;;  %525 = vmatpush.msra.mxu2 %v2333_v20  ;;  %v165_v55 = vand.u32 4294901760, %v164_v50  ;;  %v171_v56 = vand.u32 4294901760, %v170_v51  ;;  %v178_v60 = vsub.f32 %v66_v53, %v2390_v57  ;;  %v2428_v14 = vand.u32 4294901760, %v75_v12  ;;  %v31_v45 = vld [vmem:[%s3817_s0 + $0x58] sm:$0xff]  ;;  %v32_v53 = vld [vmem:[%s3817_s0 + $0x60] sm:$0xff] }
  0x10   :  { %381 = vmatpush.msra.mxu1 %v380_v41  ;;  %676 = vmatpush.msra.mxu3 %v2307_v11  ;;  %v87_v41 = vsel %vm55_vm0, %v30_v38, 0  ;;  %v90_v49 = vsel %vm55_vm0, %v31_v45, 0 }
  0x11   :  { %528 = vmatpush.msra.mxu2 %v2336_v21  ;;  %680 = vmatmul.f32.vlgmr.msra.gmra.mxu3 %v155_v33  ;;  %v172_v59 = vsub.f32 %v170_v51, %v171_v56  ;;  %v179_v63 = vand.u32 4294901760, %v178_v60  ;;  %v202_v17 = vsub.f32 %v75_v12, %v2428_v14  ;;  %v2460_v44 = vand.u32 4294901760, %v87_v41 }
  0x12   :  { %387 = vmatpush.msra.mxu1 %v386_v48  ;;  %531 = vmatmul.f32.vlgmr.msra.gmra.mxu2 %v154_v26 }
  0x13   :  { %841 = vmatpush.msrb.mxu0 %v366_v22  ;;  %v173_v62 = vand.u32 4294901760, %v172_v59  ;;  %v180_v2 = vsub.f32 %v178_v60, %v179_v63  ;;  %v203_v21 = vand.u32 4294901760, %v202_v17  ;;  %v2436_v22 = vand.u32 4294901760, %v78_v18 }
  0x14   :  { %393 = vmatpush.msra.mxu1 %v392_v52  ;;  %v234_v48 = vsub.f32 %v87_v41, %v2460_v44  ;;  %v2468_v52 = vand.u32 4294901760, %v90_v49 }
  0x15   :  { %845 = vmatpush.msrb.mxu0 %v372_v23  ;;  %v28_v23 = vld [vmem:[%s3817_s0 + $0x40] sm:$0xff]  ;;  %v210_v25 = vsub.f32 %v78_v18, %v2436_v22 }
  0x16   :  { %399 = vmatpush.msra.mxu1 %v398_v54  ;;  %v81_v26 = vsel %vm55_vm0, %v28_v23, 0  ;;  %v36_v23 = vld [vmem:[%s3817_s0 + $0x80] sm:$0xff] }
  0x17   :  { %166 = vmatmul.f32.gmra.mxu0 %v165_v55  ;;  %401 = vmatmul.f32.vlgmr.msra.gmra.mxu1 %v2330_v19  ;;  %v2444_v29 = vand.u32 4294901760, %v81_v26  ;;  %v242_v55 = vsub.f32 %v90_v49, %v2468_v52 }
  0x18   :  { %974 = vmatpush.msrb.mxu1 %v2288_v3  ;;  %849 = vmatpush.msrb.mxu0 %v378_v24  ;;  %v186_v3 = vsub.f32 %v69_v61, %v2402_v0  ;;  %v204_v24 = vsub.f32 %v202_v17, %v203_v21  ;;  %v33_v61 = vld [vmem:[%s3817_s0 + $0x68] sm:$0xff] }
  0x19   :  { %686 = vmatmul.f32.gmra.mxu3 %v163_v43  ;;  %v218_v33 = vsub.f32 %v81_v26, %v2444_v29  ;;  %v243_v59 = vand.u32 4294901760, %v242_v55  ;;  %v105_v26 = vsel %vm55_vm0, %v36_v23, 0 }
  0x1a   :  { %536 = vmatmul.f32.gmra.mxu2 %v162_v39  ;;  %976 = vmatpush.msrb.mxu1 %v2290_v4  ;;  %v72_v4 = vsel %vm55_vm0, %v25_v1, 0  ;;  %v187_v6 = vand.u32 4294901760, %v186_v3  ;;  %v96_v1 = vsel %vm55_vm0, %v33_v61, 0 }
  0x1b   :  { %853 = vmatpush.msrb.mxu0 %v384_v27  ;;  %v2420_v7 = vand.u32 4294901760, %v72_v4  ;;  %v205_v27 = vand.u32 4294901760, %v204_v24  ;;  %v219_v36 = vand.u32 4294901760, %v218_v33 }
  0x1c   :  { %978 = vmatpush.msrb.mxu1 %v2292_v5  ;;  %v181_v5 = vand.u32 4294901760, %v180_v2 }
  0x1d   :  { %857 = vmatpush.msrb.mxu0 %v390_v28  ;;  %v211_v28 = vand.u32 4294901760, %v210_v25  ;;  %v220_v39 = vsub.f32 %v218_v33, %v219_v36 }
  0x1e   :  { %980 = vmatpush.msrb.mxu1 %v2303_v9  ;;  %v188_v9 = vsub.f32 %v186_v3, %v187_v6 }
  0x1f   :  { %174 = vmatmul.f32.gmra.mxu0 %v173_v62  ;;  %405 = vmatmul.f32.gmra.mxu1 %v2355_v32  ;;  %v212_v31 = vsub.f32 %v210_v25, %v211_v28  ;;  %v221_v42 = vand.u32 4294901760, %v220_v39  ;;  %v244_v62 = vsub.f32 %v242_v55, %v243_v59 }
  0x20   :  { %982 = vmatpush.msrb.mxu1 %v2305_v10  ;;  %861 = vmatpush.msrb.mxu0 %v396_v34  ;;  %v194_v10 = vsub.f32 %v72_v4, %v2420_v7  ;;  %v189_v13 = vand.u32 4294901760, %v188_v9  ;;  %v84_v34 = vsel %vm55_vm0, %v29_v30, 0  ;;  %v2484_v4 = vand.u32 4294901760, %v96_v1 }
  0x21   :  { %692 = vmatmul.f32.gmra.mxu3 %v171_v56  ;;  %v213_v35 = vand.u32 4294901760, %v212_v31  ;;  %v2452_v37 = vand.u32 4294901760, %v84_v34  ;;  %v93_v56 = vsel %vm55_vm0, %v32_v53, 0  ;;  %v245_v2 = vand.u32 4294901760, %v244_v62  ;;  %v37_v31 = vld [vmem:[%s3817_s0 + $0x88] sm:$0xff] }
  0x22   :  { %541 = vmatmul.f32.gmra.mxu2 %v170_v51  ;;  %984 = vmatpush.msrb.mxu1 %v2307_v11  ;;  %v195_v11 = vand.u32 4294901760, %v194_v10  ;;  %v235_v51 = vand.u32 4294901760, %v234_v48  ;;  %v258_v8 = vsub.f32 %v96_v1, %v2484_v4  ;;  %v2508_v30 = vand.u32 4294901760, %v105_v26 }
  0x23   :  { %v226_v40 = vsub.f32 %v84_v34, %v2452_v37 }
  0x24   :  { %v196_v16 = vsub.f32 %v194_v10, %v195_v11  ;;  %v236_v54 = vsub.f32 %v234_v48, %v235_v51  ;;  %v259_v12 = vand.u32 4294901760, %v258_v8  ;;  %v282_v34 = vsub.f32 %v105_v26, %v2508_v30 }
  0x25   :  { %v227_v43 = vand.u32 4294901760, %v226_v40 }
  0x26   :  { %v197_v20 = vand.u32 4294901760, %v196_v16  ;;  %v237_v58 = vand.u32 4294901760, %v236_v54  ;;  %v260_v15 = vsub.f32 %v258_v8, %v259_v12  ;;  %v283_v39 = vand.u32 4294901760, %v282_v34 }
  0x27   :  { %182 = vmatmul.f32.gmra.mxu0 %v181_v5  ;;  %409 = vmatmul.f32.gmra.mxu1 %v2376_v46  ;;  %v228_v47 = vsub.f32 %v226_v40, %v227_v43  ;;  %v34_v5 = vld [vmem:[%s3817_s0 + $0x70] sm:$0xff] }
  0x28   :  { %v99_v9 = vsel %vm55_vm0, %v34_v5, 0  ;;  %v261_v18 = vand.u32 4294901760, %v260_v15  ;;  %v284_v45 = vsub.f32 %v282_v34, %v283_v39 }
  0x29   :  { %698 = vmatmul.f32.gmra.mxu3 %v179_v63  ;;  %v229_v50 = vand.u32 4294901760, %v228_v47 }
  0x2a   :  { %546 = vmatmul.f32.gmra.mxu2 %v178_v60  ;;  %v2476_v60 = vand.u32 4294901760, %v93_v56 }
  0x2c   :  { %v250_v63 = vsub.f32 %v93_v56, %v2476_v60 }
  0x2f   :  { %190 = vmatmul.f32.gmra.mxu0 %v189_v13  ;;  %413 = vmatmul.f32.gmra.mxu1 %v2390_v57  ;;  %v2492_v13 = vand.u32 4294901760, %v99_v9 }
  0x31   :  { %704 = vmatmul.f32.gmra.mxu3 %v187_v6  ;;  %v266_v16 = vsub.f32 %v99_v9, %v2492_v13 }
  0x32   :  { %551 = vmatmul.f32.gmra.mxu2 %v186_v3  ;;  %v251_v3 = vand.u32 4294901760, %v250_v63 }
  0x34   :  { %v252_v6 = vsub.f32 %v250_v63, %v251_v3 }
  0x37   :  { %198 = vmatmul.f32.gmra.mxu0 %v197_v20  ;;  %417 = vmatmul.f32.gmra.mxu1 %v2402_v0  ;;  %v267_v20 = vand.u32 4294901760, %v266_v16 }
  0x39   :  { %710 = vmatmul.f32.gmra.mxu3 %v195_v11  ;;  %v35_v11 = vld [vmem:[%s3817_s0 + $0x78] sm:$0xff]  ;;  %v268_v24 = vsub.f32 %v266_v16, %v267_v20 }
  0x3a   :  { %556 = vmatmul.f32.gmra.mxu2 %v194_v10  ;;  %v253_v10 = vand.u32 4294901760, %v252_v6 }
  0x3f   :  { %206 = vmatmul.f32.gmra.mxu0 %v205_v27  ;;  %421 = vmatmul.f32.gmra.mxu1 %v2420_v7  ;;  %v269_v27 = vand.u32 4294901760, %v268_v24 }
  0x41   :  { %716 = vmatmul.f32.gmra.mxu3 %v203_v21 }
  0x42   :  { %561 = vmatmul.f32.gmra.mxu2 %v202_v17  ;;  %v102_v17 = vsel %vm55_vm0, %v35_v11, 0 }
  0x43   :  { %v2500_v21 = vand.u32 4294901760, %v102_v17 }
  0x47   :  { %214 = vmatmul.f32.gmra.mxu0 %v213_v35  ;;  %425 = vmatmul.f32.gmra.mxu1 %v2428_v14  ;;  %v108_v35 = vsel %vm55_vm0, %v37_v31, 0 }
  0x49   :  { %722 = vmatmul.f32.gmra.mxu3 %v211_v28 }
  0x4a   :  { %566 = vmatmul.f32.gmra.mxu2 %v210_v25  ;;  %v274_v25 = vsub.f32 %v102_v17, %v2500_v21 }
  0x4c   :  { %v275_v28 = vand.u32 4294901760, %v274_v25 }
  0x4f   :  { %222 = vmatmul.f32.gmra.mxu0 %v221_v42  ;;  %429 = vmatmul.f32.gmra.mxu1 %v2436_v22  ;;  %v38_v42 = vld [vmem:[%s3817_s0 + $0x90] sm:$0xff] }
  0x50   :  { %v111_v49 = vsel %vm55_vm0, %v38_v42, 0 }
  0x51   :  { %728 = vmatmul.f32.gmra.mxu3 %v219_v36  ;;  %v1126_v36 = vld [vmem:[%s3819_s3 + $0x78] sm:$0xff]  ;;  %v2539_v54 = vand.u32 4294901760, %v111_v49 }
  0x52   :  { %571 = vmatmul.f32.gmra.mxu2 %v218_v33  ;;  %v276_v33 = vsub.f32 %v274_v25, %v275_v28  ;;  %v2521_v41 = vand.u32 4294901760, %v1126_v36 }
  0x53   :  { %v298_v62 = vsub.f32 %v111_v49, %v2539_v54 }
  0x54   :  { %v277_v38 = vand.u32 4294901760, %v276_v33  ;;  %1132 = vmatpush.msrb.mxu2 %v2521_v41  ;;  %1736 = vmatpush.msra.mxu1 %v2521_v41 }
  0x55   :  { %v299_v6 = vand.u32 4294901760, %v298_v62 }
  0x57   :  { %230 = vmatmul.f32.gmra.mxu0 %v229_v50  ;;  %433 = vmatmul.f32.gmra.mxu1 %v2444_v29  ;;  %v300_v23 = vsub.f32 %v298_v62, %v299_v6 }
  0x59   :  { %734 = vmatmul.f32.gmra.mxu3 %v227_v43  ;;  %v2528_v43 = vsub.f32 %v1126_v36, %v2521_v41  ;;  %v301_v31 = vand.u32 4294901760, %v300_v23 }
  0x5a   :  { %576 = vmatmul.f32.gmra.mxu2 %v226_v40  ;;  %v2519_v40 = vand.u32 4294901760, %v108_v35 }
  0x5b   :  { %1563 = vmatpush.msra.mxu0 %v2528_v43 }
  0x5c   :  { %v290_v47 = vsub.f32 %v108_v35, %v2519_v40 }
  0x5e   :  { %v291_v53 = vand.u32 4294901760, %v290_v47 }
  0x5f   :  { %238 = vmatmul.f32.gmra.mxu0 %v237_v58  ;;  %437 = vmatmul.f32.gmra.mxu1 %v2452_v37  ;;  %v2544_v58 = vld [vmem:[%s3818_s2] ss:$0 sm:$0xff] }
  0x60   :  { %v292_v61 = vsub.f32 %v290_v47, %v291_v53 }
  0x61   :  { %740 = vmatmul.f32.gmra.mxu3 %v235_v51  ;;  %v285_v51 = vand.u32 4294901760, %v284_v45 }
  0x62   :  { %581 = vmatmul.f32.gmra.mxu2 %v234_v48  ;;  %v3825_v48 = vand.u32 4294901760, %v2528_v43  ;;  %v293_v5 = vand.u32 4294901760, %v292_v61 }
  0x64   :  { %v1367_v50 = vsub.f32 %v2528_v43, %v3825_v48 }
  0x67   :  { %246 = vmatmul.f32.gmra.mxu0 %v245_v2  ;;  %441 = vmatmul.f32.gmra.mxu1 %v2460_v44  ;;  %v1125_v2 = vld [vmem:[%s3819_s3 + $0x70] sm:$0xff] }
  0x69   :  { %746 = vmatmul.f32.gmra.mxu3 %v243_v59  ;;  %v39_v59 = vld [vmem:[%s3817_s0 + $0x98] sm:$0xff] }
  0x6a   :  { %586 = vmatmul.f32.gmra.mxu2 %v242_v55  ;;  %v1368_v55 = vand.u32 4294901760, %v1367_v50 }
  0x6c   :  { %1369 = vmatpush.msrb.mxu3 %v1368_v55 }
  0x6f   :  { %254 = vmatmul.f32.gmra.mxu0 %v253_v10  ;;  %445 = vmatmul.f32.gmra.mxu1 %v2468_v52 }
  0x71   :  { %752 = vmatmul.f32.gmra.mxu3 %v251_v3  ;;  %v2556_v3 = vand.u32 4294901760, %v1125_v2 }
  0x72   :  { %591 = vmatmul.f32.gmra.mxu2 %v250_v63  ;;  %v114_v63 = vsel %vm55_vm0, %v39_v59, 0 }
  0x73   :  { %1134 = vmatpush.msrb.mxu2 %v2556_v3  ;;  %1738 = vmatpush.msra.mxu1 %v2556_v3 }
  0x77   :  { %262 = vmatmul.f32.gmra.mxu0 %v261_v18  ;;  %449 = vmatmul.f32.gmra.mxu1 %v2476_v60 }
  0x79   :  { %758 = vmatmul.f32.gmra.mxu3 %v259_v12  ;;  %v2564_v12 = vsub.f32 %v1125_v2, %v2556_v3 }
  0x7a   :  { %596 = vmatmul.f32.gmra.mxu2 %v258_v8  ;;  %v2558_v8 = vand.u32 4294901760, %v114_v63 }
  0x7b   :  { %v3824_v18 = vand.u32 4294901760, %v2564_v12  ;;  %1566 = vmatpush.msra.mxu0 %v2564_v12 }
  0x7c   :  { %v306_v24 = vsub.f32 %v114_v63, %v2558_v8 }
  0x7d   :  { %v1373_v26 = vsub.f32 %v2564_v12, %v3824_v18 }
  0x7e   :  { %v307_v33 = vand.u32 4294901760, %v306_v24 }
  0x7f   :  { %270 = vmatmul.f32.gmra.mxu0 %v269_v27  ;;  %453 = vmatmul.f32.gmra.mxu1 %v2484_v4 }
  0x80   :  { %v308_v45 = vsub.f32 %v306_v24, %v307_v33 }
  0x81   :  { %764 = vmatmul.f32.gmra.mxu3 %v267_v20 }
  0x82   :  { %601 = vmatmul.f32.gmra.mxu2 %v266_v16  ;;  %v40_v16 = vld [vmem:[%s3817_s0 + $0xa0] sm:$0xff] }
  0x87   :  { %278 = vmatmul.f32.gmra.mxu0 %v277_v38  ;;  %457 = vmatmul.f32.gmra.mxu1 %v2492_v13  ;;  %v41_v38 = vld [vmem:[%s3817_s0 + $0xa8] sm:$0xff] }
  0x88   :  { %v120_v49 = vsel %vm55_vm0, %v41_v38, 0 }
  0x89   :  { %770 = vmatmul.f32.gmra.mxu3 %v275_v28  ;;  %v1374_v28 = vand.u32 4294901760, %v1373_v26 }
  0x8a   :  { %606 = vmatmul.f32.gmra.mxu2 %v274_v25  ;;  %v117_v25 = vsel %vm55_vm0, %v40_v16, 0 }
  0x8b   :  { %1375 = vmatpush.msrb.mxu3 %v1374_v28 }
  0x8c   :  { %v159_v56 = vpop.f32.mrf.mxu0 }
  0x8d   :  { %v160_v1 = vadd.f32 %v2544_v58, %v159_v56  ;;  %v2604_v56 = vand.u32 4294901760, %v120_v49 }
  0x8f   :  { %286 = vmatmul.f32.gmra.mxu0 %v285_v51  ;;  %461 = vmatmul.f32.gmra.mxu1 %v2500_v21  ;;  %3859 = vst [vmem:[#allocation3_spill] sm:$0xff] %v2604_v56 }
  0x91   :  { %776 = vmatmul.f32.gmra.mxu3 %v283_v39  ;;  %v1124_v39 = vld [vmem:[%s3819_s3 + $0x68] sm:$0xff] }
  0x92   :  { %611 = vmatmul.f32.gmra.mxu2 %v282_v34  ;;  %v2580_v34 = vand.u32 4294901760, %v117_v25  ;;  %v2592_v42 = vand.u32 4294901760, %v1124_v39 }
  0x94   :  { %v2560_v9 = vpop.f32.mrf.mxu0  ;;  %v402_v10 = vpop.f32.mrf.mxu1  ;;  %3858 = vst [vmem:[#allocation2_spill] sm:$0xff] %v2580_v34  ;;  %1136 = vmatpush.msrb.mxu2 %v2592_v42  ;;  %v2599_v50 = vsub.f32 %v1124_v39, %v2592_v42  ;;  %1740 = vmatpush.msra.mxu1 %v2592_v42 }
  0x95   :  { %v403_v11 = vadd.f32 %v402_v10, %v160_v1  ;;  %v532_v15 = vpop.f32.mrf.mxu2  ;;  %v681_v17 = vpop.f32.mrf.mxu3  ;;  %v1123_v10 = vld [vmem:[%s3819_s3 + $0x60] sm:$0xff] }
  0x96   :  { %v3823_v51 = vand.u32 4294901760, %v2599_v50  ;;  %1569 = vmatpush.msra.mxu0 %v2599_v50 }
  0x97   :  { %v533_v20 = vadd.f32 %v532_v15, %v403_v11  ;;  %294 = vmatmul.f32.gmra.mxu0 %v293_v5  ;;  %465 = vmatmul.f32.gmra.mxu1 %v2508_v30  ;;  %v322_v5 = vsub.f32 %v120_v49, %v2604_v56  ;;  %v2622_v11 = vand.u32 4294901760, %v1123_v10 }
  0x98   :  { %v1379_v63 = vsub.f32 %v2599_v50, %v3823_v51 }
  0x99   :  { %v2578_v27 = vadd.f32 %v681_v17, %v533_v20  ;;  %782 = vmatmul.f32.gmra.mxu3 %v291_v53  ;;  %v309_v53 = vand.u32 4294901760, %v308_v45  ;;  %v323_v16 = vand.u32 4294901760, %v322_v5  ;;  %1138 = vmatpush.msrb.mxu2 %v2622_v11 }
  0x9a   :  { %616 = vmatmul.f32.gmra.mxu2 %v290_v47  ;;  %v314_v47 = vsub.f32 %v117_v25, %v2580_v34  ;;  %v1380_v1 = vand.u32 4294901760, %v1379_v63  ;;  %v2632_v25 = vsub.f32 %v1123_v10, %v2622_v11  ;;  %1742 = vmatpush.msra.mxu1 %v2622_v11 }
  0x9b   :  { %v324_v28 = vsub.f32 %v322_v5, %v323_v16 }
  0x9c   :  { %v2582_v35 = vpop.f32.mrf.mxu0  ;;  %v2584_v36 = vpop.f32.mrf.mxu1  ;;  %v315_v55 = vand.u32 4294901760, %v314_v47  ;;  %1381 = vmatpush.msrb.mxu3 %v1380_v1  ;;  %v3822_v26 = vand.u32 4294901760, %v2632_v25  ;;  %1572 = vmatpush.msra.mxu0 %v2632_v25  ;;  %v44_v1 = vld [vmem:[%s3817_s0 + $0xc0] sm:$0xff] }
  0x9d   :  { %v325_v45 = vand.u32 4294901760, %v324_v28  ;;  %v129_v10 = vsel %vm55_vm0, %v44_v1, 0 }
  0x9e   :  { %v316_v2 = vsub.f32 %v314_v47, %v315_v55  ;;  %v1385_v38 = vsub.f32 %v2632_v25, %v3822_v26 }
  0x9f   :  { %302 = vmatmul.f32.gmra.mxu0 %v301_v31  ;;  %469 = vmatmul.f32.gmra.mxu1 %v2519_v40 }
  0xa0   :  { %v317_v15 = vand.u32 4294901760, %v316_v2  ;;  %v1386_v39 = vand.u32 4294901760, %v1385_v38  ;;  %v1122_v2 = vld [vmem:[%s3819_s3 + $0x58] sm:$0xff] }
  0xa1   :  { %788 = vmatmul.f32.gmra.mxu3 %v299_v6 }
  0xa2   :  { %621 = vmatmul.f32.gmra.mxu2 %v298_v62  ;;  %v42_v62 = vld [vmem:[%s3817_s0 + $0xb0] sm:$0xff]  ;;  %1387 = vmatpush.msrb.mxu3 %v1386_v39  ;;  %v2670_v39 = vand.u32 4294901760, %v129_v10 }
  0xa3   :  { %v123_v6 = vsel %vm55_vm0, %v42_v62, 0 }
  0xa4   :  { %v2606_v59 = vpop.f32.mrf.mxu0  ;;  %v2608_v61 = vpop.f32.mrf.mxu1  ;;  %v2624_v17 = vand.u32 4294901760, %v123_v6  ;;  %3864 = vst [vmem:[#allocation8_spill] sm:$0xff] %v2670_v39 }
  0xa6   :  { %3860 = vst [vmem:[#allocation4_spill] sm:$0xff] %v2624_v17  ;;  %v330_v31 = vsub.f32 %v123_v6, %v2624_v17 }
  0xa7   :  { %310 = vmatmul.f32.gmra.mxu0 %v309_v53  ;;  %473 = vmatmul.f32.gmra.mxu1 %v2539_v54 }
  0xa8   :  { %v331_v49 = vand.u32 4294901760, %v330_v31 }
  0xa9   :  { %794 = vmatmul.f32.gmra.mxu3 %v307_v33 }
  0xaa   :  { %626 = vmatmul.f32.gmra.mxu2 %v306_v24  ;;  %v43_v24 = vld [vmem:[%s3817_s0 + $0xb8] sm:$0xff] }
  0xab   :  { %v126_v33 = vsel %vm55_vm0, %v43_v24, 0 }
  0xac   :  { %v2626_v20 = vpop.f32.mrf.mxu0  ;;  %v2628_v23 = vpop.f32.mrf.mxu1  ;;  %v2646_v53 = vand.u32 4294901760, %v126_v33 }
  0xae   :  { %3861 = vst [vmem:[#allocation5_spill] sm:$0xff] %v2646_v53  ;;  %v338_v6 = vsub.f32 %v126_v33, %v2646_v53 }
  0xaf   :  { %318 = vmatmul.f32.gmra.mxu0 %v317_v15  ;;  %477 = vmatmul.f32.gmra.mxu1 %v2558_v8 }
  0xb0   :  { %v339_v38 = vand.u32 4294901760, %v338_v6 }
  0xb1   :  { %800 = vmatmul.f32.gmra.mxu3 %v315_v55  ;;  %v2658_v55 = vand.u32 4294901760, %v1122_v2 }
  0xb2   :  { %631 = vmatmul.f32.gmra.mxu2 %v314_v47  ;;  %v332_v47 = vsub.f32 %v330_v31, %v331_v49 }
  0xb3   :  { %1140 = vmatpush.msrb.mxu2 %v2658_v55  ;;  %v2665_v15 = vsub.f32 %v1122_v2, %v2658_v55  ;;  %1744 = vmatpush.msra.mxu1 %v2658_v55 }
  0xb4   :  { %v2648_v63 = vpop.f32.mrf.mxu0  ;;  %v2650_v62 = vpop.f32.mrf.mxu1  ;;  %v333_v28 = vand.u32 4294901760, %v332_v47  ;;  %v1121_v47 = vld [vmem:[%s3819_s3 + $0x50] sm:$0xff] }
  0xb5   :  { %3862 = vst [vmem:[#allocation6_spill] sm:$0xff] %v2648_v63  ;;  %v3826_v24 = vand.u32 4294901760, %v2665_v15  ;;  %1575 = vmatpush.msra.mxu0 %v2665_v15  ;;  %v2684_v26 = vand.u32 4294901760, %v1121_v47 }
  0xb6   :  { %3863 = vst [vmem:[#allocation7_spill] sm:$0xff] %v2650_v62 }
  0xb7   :  { %326 = vmatmul.f32.gmra.mxu0 %v325_v45  ;;  %481 = vmatmul.f32.gmra.mxu1 %v2580_v34  ;;  %v1391_v1 = vsub.f32 %v2665_v15, %v3826_v24 }
  0xb8   :  { %1142 = vmatpush.msrb.mxu2 %v2684_v26  ;;  %1746 = vmatpush.msra.mxu1 %v2684_v26 }
  0xb9   :  { %806 = vmatmul.f32.gmra.mxu3 %v323_v16  ;;  %v1392_v2 = vand.u32 4294901760, %v1391_v1  ;;  %v346_v16 = vsub.f32 %v129_v10, %v2670_v39  ;;  %v2693_v10 = vsub.f32 %v1121_v47, %v2684_v26 }
  0xba   :  { %636 = vmatmul.f32.gmra.mxu2 %v322_v5  ;;  %v340_v5 = vsub.f32 %v338_v6, %v339_v38 }
  0xbb   :  { %1393 = vmatpush.msrb.mxu3 %v1392_v2  ;;  %v347_v18 = vand.u32 4294901760, %v346_v16  ;;  %1578 = vmatpush.msra.mxu0 %v2693_v10 }
  0xbc   :  { %v2672_v33 = vpop.f32.mrf.mxu0  ;;  %v2674_v45 = vpop.f32.mrf.mxu1  ;;  %v341_v51 = vand.u32 4294901760, %v340_v5 }
  0xbd   :  { %3865 = vst [vmem:[#allocation9_spill] sm:$0xff] %v2672_v33 }
  0xbe   :  { %3866 = vst [vmem:[#allocation10_spill] sm:$0xff] %v2674_v45 }
  0xbf   :  { %334 = vmatmul.f32.gmra.mxu0 %v333_v28  ;;  %485 = vmatmul.f32.gmra.mxu1 %v2604_v56  ;;  %v1114_v56 = vld [vmem:[%s3819_s3 + $0x18] sm:$0xff] }
  0xc0   :  { %v2867_v33 = vand.u32 4294901760, %v1114_v56 }
  0xc1   :  { %812 = vmatmul.f32.gmra.mxu3 %v331_v49  ;;  %v348_v49 = vsub.f32 %v346_v16, %v347_v18 }
  0xc2   :  { %641 = vmatmul.f32.gmra.mxu2 %v330_v31  ;;  %v3827_v31 = vand.u32 4294901760, %v2693_v10 }
  0xc3   :  { %v349_v2 = vand.u32 4294901760, %v348_v49 }
  0xc4   :  { %v2686_v48 = vpop.f32.mrf.mxu0  ;;  %v2688_v1 = vpop.f32.mrf.mxu1  ;;  %v1397_v28 = vsub.f32 %v2693_v10, %v3827_v31 }
  0xc5   :  { %3867 = vst [vmem:[#allocation11_spill] sm:$0xff] %v2686_v48  ;;  %v1115_v48 = vld [vmem:[%s3819_s3 + $0x20] sm:$0xff] }
  0xc6   :  { %3868 = vst [vmem:[#allocation12_spill] sm:$0xff] %v2688_v1  ;;  %v1398_v5 = vand.u32 4294901760, %v1397_v28  ;;  %v2840_v1 = vand.u32 4294901760, %v1115_v48 }
  0xc7   :  { %342 = vmatmul.f32.gmra.mxu0 %v341_v51  ;;  %489 = vmatmul.f32.gmra.mxu1 %v2624_v17  ;;  %v1120_v51 = vld [vmem:[%s3819_s3 + $0x48] sm:$0xff] }
  0xc8   :  { %1399 = vmatpush.msrb.mxu3 %v1398_v5  ;;  %v1119_v5 = vld [vmem:[%s3819_s3 + $0x40] sm:$0xff] }
  0xc9   :  { %818 = vmatmul.f32.gmra.mxu3 %v339_v38  ;;  %v2709_v38 = vand.u32 4294901760, %v1120_v51 }
  0xca   :  { %646 = vmatmul.f32.gmra.mxu2 %v338_v6 }
  0xcb   :  { %v2712_v6 = vsub.f32 %v1120_v51, %v2709_v38  ;;  %1748 = vmatpush.msra.mxu1 %v2709_v38  ;;  %1144 = vmatpush.msrb.mxu2 %v2709_v38  ;;  %v2730_v51 = vand.u32 4294901760, %v1119_v5 }
  0xcc   :  { %v2701_v24 = vpop.f32.mrf.mxu0  ;;  %v2703_v47 = vpop.f32.mrf.mxu1 }
  0xcd   :  { %3869 = vst [vmem:[#allocation13_spill] sm:$0xff] %v2701_v24  ;;  %1581 = vmatpush.msra.mxu0 %v2712_v6  ;;  %1146 = vmatpush.msrb.mxu2 %v2730_v51 }
  0xce   :  { %3870 = vst [vmem:[#allocation14_spill] sm:$0xff] %v2703_v47  ;;  %1750 = vmatpush.msra.mxu1 %v2730_v51 }
  0xcf   :  { %350 = vmatmul.f32.gmra.mxu0 %v349_v2  ;;  %493 = vmatmul.f32.gmra.mxu1 %v2646_v53  ;;  %v3828_v2 = vand.u32 4294901760, %v2712_v6  ;;  %v2784_v53 = vpop.f32.mrf.mxu3 }
  0xd1   :  { %824 = vmatmul.f32.gmra.mxu3 %v347_v18  ;;  %v1403_v18 = vsub.f32 %v2712_v6, %v3828_v2  ;;  %v2739_v2 = vsub.f32 %v1119_v5, %v2730_v51 }
  0xd2   :  { %651 = vmatmul.f32.gmra.mxu2 %v346_v16 }
  0xd3   :  { %v1404_v16 = vand.u32 4294901760, %v1403_v18  ;;  %v3831_v18 = vand.u32 4294901760, %v2739_v2  ;;  %1584 = vmatpush.msra.mxu0 %v2739_v2 }
  0xd4   :  { %v2716_v49 = vpop.f32.mrf.mxu0  ;;  %v2718_v28 = vpop.f32.mrf.mxu1 }
  0xd5   :  { %3871 = vst [vmem:[#allocation15_spill] sm:$0xff] %v2716_v49  ;;  %1405 = vmatpush.msrb.mxu3 %v1404_v16  ;;  %v1409_v16 = vsub.f32 %v2739_v2, %v3831_v18 }
  0xd6   :  { %3872 = vst [vmem:[#allocation16_spill] sm:$0xff] %v2718_v28 }
  0xd7   :  { %497 = vmatmul.f32.gmra.mxu1 %v2670_v39  ;;  %863 = vmatmul.f32.vlgmr.msrb.gmra.mxu0 %v2330_v19 }
  0xdc   :  { %v2732_v31 = vpop.f32.mrf.mxu0  ;;  %v2734_v49 = vpop.f32.mrf.mxu1 }
  0xdd   :  { %3873 = vst [vmem:[#allocation17_spill] sm:$0xff] %v2732_v31  ;;  %v1410_v31 = vand.u32 4294901760, %v1409_v16 }
  0xde   :  { %3874 = vst [vmem:[#allocation18_spill] sm:$0xff] %v2734_v49 }
  0xdf   :  { %867 = vmatmul.f32.gmra.mxu0 %v2355_v32  ;;  %986 = vmatmul.f32.vlgmr.msrb.gmra.mxu1 %v2330_v19  ;;  %v1118_v19 = vld [vmem:[%s3819_s3 + $0x38] sm:$0xff] }
  0xe0   :  { %1411 = vmatpush.msrb.mxu3 %v1410_v31  ;;  %v2757_v5 = vand.u32 4294901760, %v1118_v19 }
  0xe2   :  { %1148 = vmatpush.msrb.mxu2 %v2757_v5  ;;  %v2761_v18 = vsub.f32 %v1118_v19, %v2757_v5  ;;  %1752 = vmatpush.msra.mxu1 %v2757_v5 }
  0xe4   :  { %v2748_v49 = vpop.f32.mrf.mxu0  ;;  %v2750_v39 = vpop.f32.mrf.mxu1  ;;  %1587 = vmatpush.msra.mxu0 %v2761_v18 }
  0xe5   :  { %3875 = vst [vmem:[#allocation19_spill] sm:$0xff] %v2748_v49  ;;  %v3834_v49 = vand.u32 4294901760, %v2761_v18 }
  0xe6   :  { %3876 = vst [vmem:[#allocation20_spill] sm:$0xff] %v2750_v39 }
  0xe7   :  { %871 = vmatmul.f32.gmra.mxu0 %v2376_v46  ;;  %990 = vmatmul.f32.gmra.mxu1 %v2355_v32  ;;  %v1415_v32 = vsub.f32 %v2761_v18, %v3834_v49 }
  0xe9   :  { %v1416_v19 = vand.u32 4294901760, %v1415_v32 }
  0xeb   :  { %1417 = vmatpush.msrb.mxu3 %v1416_v19 }
  0xec   :  { %v2764_v16 = vpop.f32.mrf.mxu0  ;;  %v2766_v31 = vpop.f32.mrf.mxu1 }
  0xed   :  { %3877 = vst [vmem:[#allocation21_spill] sm:$0xff] %v2764_v16  ;;  %v1117_v16 = vld [vmem:[%s3819_s3 + $0x30] sm:$0xff] }
  0xee   :  { %3878 = vst [vmem:[#allocation22_spill] sm:$0xff] %v2766_v31  ;;  %v2782_v31 = vand.u32 4294901760, %v1117_v16 }
  0xef   :  { %875 = vmatmul.f32.gmra.mxu0 %v2390_v57  ;;  %994 = vmatmul.f32.gmra.mxu1 %v2376_v46 }
  0xf0   :  { %1150 = vmatpush.msrb.mxu2 %v2782_v31  ;;  %v2790_v46 = vsub.f32 %v1117_v16, %v2782_v31  ;;  %1754 = vmatpush.msra.mxu1 %v2782_v31  ;;  %v2806_v16 = vpop.f32.mrf.mxu3 }
  0xf2   :  { %v3835_v32 = vand.u32 4294901760, %v2790_v46  ;;  %1590 = vmatpush.msra.mxu0 %v2790_v46 }
  0xf4   :  { %v2775_v39 = vpop.f32.mrf.mxu0  ;;  %v2777_v28 = vpop.f32.mrf.mxu1 }
  0xf5   :  { %3879 = vst [vmem:[#allocation23_spill] sm:$0xff] %v2775_v39  ;;  %v1421_v39 = vsub.f32 %v2790_v46, %v3835_v32 }
  0xf6   :  { %3880 = vst [vmem:[#allocation24_spill] sm:$0xff] %v2777_v28  ;;  %v2802_v28 = vpop.f32.mrf.mxu2 }
  0xf7   :  { %879 = vmatmul.f32.gmra.mxu0 %v2402_v0  ;;  %998 = vmatmul.f32.gmra.mxu1 %v2390_v57  ;;  %v1422_v57 = vand.u32 4294901760, %v1421_v39 }
  0xf9   :  { %1423 = vmatpush.msrb.mxu3 %v1422_v57 }
  0xfc   :  { %v2795_v19 = vpop.f32.mrf.mxu0  ;;  %v2797_v49 = vpop.f32.mrf.mxu1 }
  0xfd   :  { %3881 = vst [vmem:[#allocation25_spill] sm:$0xff] %v2795_v19  ;;  %v1116_v19 = vld [vmem:[%s3819_s3 + $0x28] sm:$0xff] }
  0xfe   :  { %3882 = vst [vmem:[#allocation26_spill] sm:$0xff] %v2797_v49  ;;  %v2811_v24 = vand.u32 4294901760, %v1116_v19  ;;  %v2829_v32 = vpop.f32.mrf.mxu2 }
  0xff   :  { %883 = vmatmul.f32.gmra.mxu0 %v2420_v7  ;;  %1002 = vmatmul.f32.gmra.mxu1 %v2402_v0 }
 0x100   :  { %1152 = vmatpush.msrb.mxu2 %v2811_v24  ;;  %v2819_v39 = vsub.f32 %v1116_v19, %v2811_v24  ;;  %1756 = vmatpush.msra.mxu1 %v2811_v24 }
 0x102   :  { %v3838_v0 = vand.u32 4294901760, %v2819_v39  ;;  %1593 = vmatpush.msra.mxu0 %v2819_v39  ;;  %1154 = vmatpush.msrb.mxu2 %v2840_v1 }
 0x103   :  { %1758 = vmatpush.msra.mxu1 %v2840_v1 }
 0x104   :  { %v2813_v49 = vpop.f32.mrf.mxu0  ;;  %v2815_v47 = vpop.f32.mrf.mxu1  ;;  %v1427_v57 = vsub.f32 %v2819_v39, %v3838_v0  ;;  %1156 = vmatpush.msrb.mxu2 %v2867_v33 }
 0x105   :  { %3883 = vst [vmem:[#allocation27_spill] sm:$0xff] %v2813_v49  ;;  %1760 = vmatpush.msra.mxu1 %v2867_v33 }
 0x106   :  { %3884 = vst [vmem:[#allocation28_spill] sm:$0xff] %v2815_v47  ;;  %v1428_v49 = vand.u32 4294901760, %v1427_v57  ;;  %v2831_v47 = vpop.f32.mrf.mxu3 }
 0x107   :  { %887 = vmatmul.f32.gmra.mxu0 %v2428_v14  ;;  %1006 = vmatmul.f32.gmra.mxu1 %v2420_v7  ;;  %3885 = vst [vmem:[#allocation29_spill] sm:$0xff] %v2831_v47  ;;  %v2846_v7 = vsub.f32 %v1115_v48, %v2840_v1 }
 0x108   :  { %1429 = vmatpush.msrb.mxu3 %v1428_v49  ;;  %v2851_v49 = vpop.f32.mrf.mxu2 }
 0x109   :  { %v3841_v57 = vand.u32 4294901760, %v2846_v7  ;;  %1596 = vmatpush.msra.mxu0 %v2846_v7 }
 0x10c   :  { %v2833_v19 = vpop.f32.mrf.mxu0  ;;  %v2835_v17 = vpop.f32.mrf.mxu1 }
 0x10d   :  { %3886 = vst [vmem:[#allocation30_spill] sm:$0xff] %v2833_v19 }
 0x10e   :  { %3887 = vst [vmem:[#allocation31_spill] sm:$0xff] %v2835_v17  ;;  %v2860_v17 = vpop.f32.mrf.mxu3 }
 0x10f   :  { %891 = vmatmul.f32.gmra.mxu0 %v2436_v22  ;;  %1010 = vmatmul.f32.gmra.mxu1 %v2428_v14  ;;  %v1433_v14 = vsub.f32 %v2846_v7, %v3841_v57  ;;  %3890 = vst [vmem:[#allocation34_spill] sm:$0xff] %v2860_v17  ;;  %v2875_v57 = vsub.f32 %v1114_v56, %v2867_v33 }
 0x111   :  { %v1434_v48 = vand.u32 4294901760, %v1433_v14  ;;  %v2878_v14 = vpop.f32.mrf.mxu2  ;;  %1599 = vmatpush.msra.mxu0 %v2875_v57 }
 0x112   :  { %3893 = vst [vmem:[#allocation37_spill] sm:$0xff] %v2878_v14 }
 0x113   :  { %1435 = vmatpush.msrb.mxu3 %v1434_v48 }
 0x114   :  { %v2853_v0 = vpop.f32.mrf.mxu0  ;;  %v2855_v19 = vpop.f32.mrf.mxu1 }
 0x115   :  { %3888 = vst [vmem:[#allocation32_spill] sm:$0xff] %v2853_v0 }
 0x116   :  { %3889 = vst [vmem:[#allocation33_spill] sm:$0xff] %v2855_v19  ;;  %v2882_v48 = vpop.f32.mrf.mxu3 }
 0x117   :  { %895 = vmatmul.f32.gmra.mxu0 %v2444_v29  ;;  %1014 = vmatmul.f32.gmra.mxu1 %v2436_v22  ;;  %v3844_v22 = vand.u32 4294901760, %v2875_v57  ;;  %3894 = vst [vmem:[#allocation38_spill] sm:$0xff] %v2882_v48 }
 0x119   :  { %v2893_v17 = vpop.f32.mrf.mxu2 }
 0x11a   :  { %3897 = vst [vmem:[#allocation41_spill] sm:$0xff] %v2893_v17 }
 0x11c   :  { %v2869_v0 = vpop.f32.mrf.mxu0  ;;  %v2871_v19 = vpop.f32.mrf.mxu1 }
 0x11d   :  { %3891 = vst [vmem:[#allocation35_spill] sm:$0xff] %v2869_v0  ;;  %v1439_v0 = vsub.f32 %v2875_v57, %v3844_v22 }
 0x11e   :  { %3892 = vst [vmem:[#allocation36_spill] sm:$0xff] %v2871_v19  ;;  %v2902_v34 = vpop.f32.mrf.mxu3 }
 0x11f   :  { %899 = vmatmul.f32.gmra.mxu0 %v2452_v37  ;;  %1018 = vmatmul.f32.gmra.mxu1 %v2444_v29  ;;  %v1440_v56 = vand.u32 4294901760, %v1439_v0  ;;  %v1113_v29 = vld [vmem:[%s3819_s3 + $0x10] sm:$0xff]  ;;  %3898 = vst [vmem:[#allocation42_spill] sm:$0xff] %v2902_v34 }
 0x120   :  { %v2900_v48 = vand.u32 4294901760, %v1113_v29 }
 0x121   :  { %1441 = vmatpush.msrb.mxu3 %v1440_v56 }
 0x122   :  { %1158 = vmatpush.msrb.mxu2 %v2900_v48  ;;  %v2906_v0 = vsub.f32 %v1113_v29, %v2900_v48  ;;  %1762 = vmatpush.msra.mxu1 %v2900_v48 }
 0x124   :  { %v2889_v19 = vpop.f32.mrf.mxu0  ;;  %v2891_v45 = vpop.f32.mrf.mxu1  ;;  %1602 = vmatpush.msra.mxu0 %v2906_v0 }
 0x125   :  { %3895 = vst [vmem:[#allocation39_spill] sm:$0xff] %v2889_v19 }
 0x126   :  { %3896 = vst [vmem:[#allocation40_spill] sm:$0xff] %v2891_v45  ;;  %v2920_v45 = vpop.f32.mrf.mxu2  ;;  %v2927_v34 = vpop.f32.mrf.mxu3 }
 0x127   :  { %903 = vmatmul.f32.gmra.mxu0 %v2460_v44  ;;  %1022 = vmatmul.f32.gmra.mxu1 %v2452_v37  ;;  %v3845_v37 = vand.u32 4294901760, %v2906_v0  ;;  %3901 = vst [vmem:[#allocation45_spill] sm:$0xff] %v2920_v45 }
 0x128   :  { %3902 = vst [vmem:[#allocation46_spill] sm:$0xff] %v2927_v34  ;;  %v3905_v34 = vand.u32 4294901760, %v2528_v43  ;;  %v3908_v43 = vand.u32 4294901760, %v2599_v50 }
 0x129   :  { %v1445_v19 = vsub.f32 %v2906_v0, %v3845_v37 }
 0x12b   :  { %v1446_v29 = vand.u32 4294901760, %v1445_v19 }
 0x12c   :  { %v2909_v56 = vpop.f32.mrf.mxu0  ;;  %v2911_v22 = vpop.f32.mrf.mxu1 }
 0x12d   :  { %3899 = vst [vmem:[#allocation43_spill] sm:$0xff] %v2909_v56  ;;  %v1112_v56 = vld [vmem:[%s3819_s3 + $0x8] sm:$0xff]  ;;  %1447 = vmatpush.msrb.mxu3 %v1446_v29  ;;  %v1111_v29 = vld [vmem:[%s3819_s3] sm:$0xff] }
 0x12e   :  { %3900 = vst [vmem:[#allocation44_spill] sm:$0xff] %v2911_v22  ;;  %v2925_v22 = vand.u32 4294901760, %v1112_v56  ;;  %v2944_v37 = vand.u32 4294901760, %v1111_v29  ;;  %v2959_v47 = vpop.f32.mrf.mxu3 }
 0x12f   :  { %907 = vmatmul.f32.gmra.mxu0 %v2468_v52  ;;  %1026 = vmatmul.f32.gmra.mxu1 %v2460_v44 }
 0x130   :  { %1160 = vmatpush.msrb.mxu2 %v2925_v22  ;;  %1764 = vmatpush.msra.mxu1 %v2925_v22  ;;  %v2936_v44 = vsub.f32 %v1112_v56, %v2925_v22  ;;  %v1455_v56 = vsub.f32 %v1111_v29, %v2944_v37 }
 0x132   :  { %v1450_v19 = vand.u32 4294901760, %v2936_v44  ;;  %1605 = vmatpush.msra.mxu0 %v2936_v44  ;;  %1162 = vmatpush.msrb.mxu2 %v2944_v37  ;;  %v1456_v62 = vand.u32 4294901760, %v1455_v56 }
 0x133   :  { %1766 = vmatpush.msra.mxu1 %v2944_v37 }
 0x134   :  { %v2929_v17 = vpop.f32.mrf.mxu0  ;;  %v2931_v14 = vpop.f32.mrf.mxu1  ;;  %1921 = vmatpush.msra.mxu2 %v3905_v34  ;;  %1608 = vmatpush.msra.mxu0 %v1455_v56  ;;  %v1457_v29 = vsub.f32 %v1455_v56, %v1456_v62  ;;  %v3909_v34 = vand.u32 4294901760, %v2632_v25  ;;  %v3913_v25 = vand.u32 4294901760, %v2739_v2 }
 0x135   :  { %3903 = vst [vmem:[#allocation47_spill] sm:$0xff] %v2929_v17  ;;  %v1451_v17 = vsub.f32 %v2936_v44, %v1450_v19  ;;  %v3907_v44 = vand.u32 4294901760, %v2564_v12  ;;  %v3910_v12 = vand.u32 4294901760, %v2665_v15 }
 0x136   :  { %3904 = vst [vmem:[#allocation48_spill] sm:$0xff] %v2931_v14  ;;  %v2951_v14 = vpop.f32.mrf.mxu2  ;;  %v2981_v50 = vpop.f32.mrf.mxu3 }
 0x137   :  { %911 = vmatmul.f32.gmra.mxu0 %v2476_v60  ;;  %1030 = vmatmul.f32.gmra.mxu1 %v2468_v52  ;;  %v1452_v52 = vand.u32 4294901760, %v1451_v17  ;;  %v1458_v17 = vand.u32 4294901760, %v1457_v29 }
 0x138   :  { %1925 = vmatpush.msra.mxu2 %v3907_v44 }
 0x139   :  { %1453 = vmatpush.msrb.mxu3 %v1452_v52 }
 0x13a   :  { %1929 = vmatpush.msra.mxu2 %v3908_v43 }
 0x13b   :  { %1459 = vmatpush.msrb.mxu3 %v1458_v17 }
 0x13c   :  { %v2955_v45 = vpop.f32.mrf.mxu0  ;;  %v2957_v63 = vpop.f32.mrf.mxu1  ;;  %1933 = vmatpush.msra.mxu2 %v3909_v34 }
 0x13d   :  { %3906 = vst [vmem:[#allocation49_spill] sm:$0xff] %v2955_v45  ;;  %2084 = vmatpush.msra.mxu3 %v2521_v41  ;;  %v3912_v41 = vand.u32 4294901760, %v2712_v6 }
 0x13e   :  { %1937 = vmatpush.msra.mxu2 %v3910_v12  ;;  %v2976_v56 = vpop.f32.mrf.mxu2  ;;  %v192_v12 = vadd.f32 %v2544_v58, %v2626_v20 }
 0x13f   :  { %915 = vmatmul.f32.gmra.mxu0 %v2484_v4  ;;  %1034 = vmatmul.f32.gmra.mxu1 %v2476_v60  ;;  %v3911_v60 = vand.u32 4294901760, %v2693_v10  ;;  %v3914_v10 = vand.u32 4294901760, %v2761_v18  ;;  %v3918_v18 = vand.u32 4294901760, %v2875_v57 }
 0x140   :  { %2086 = vmatpush.msra.mxu3 %v2556_v3 }
 0x141   :  { %1941 = vmatpush.msra.mxu2 %v3911_v60 }
 0x142   :  { %2088 = vmatpush.msra.mxu3 %v2592_v42 }
 0x143   :  { %1945 = vmatpush.msra.mxu2 %v3912_v41 }
 0x144   :  { %v2970_v45 = vpop.f32.mrf.mxu0  ;;  %v2972_v52 = vpop.f32.mrf.mxu1  ;;  %2090 = vmatpush.msra.mxu3 %v2622_v11  ;;  %v3916_v11 = vand.u32 4294901760, %v2819_v39 }
 0x145   :  { %1949 = vmatpush.msra.mxu2 %v3913_v25 }
 0x146   :  { %2092 = vmatpush.msra.mxu3 %v2658_v55  ;;  %v3001_v42 = vpop.f32.mrf.mxu2  ;;  %v3008_v55 = vpop.f32.mrf.mxu3 }
 0x147   :  { %919 = vmatmul.f32.gmra.mxu0 %v2492_v13  ;;  %1038 = vmatmul.f32.gmra.mxu1 %v2484_v4  ;;  %v3915_v4 = vand.u32 4294901760, %v2790_v46 }
 0x148   :  { %1953 = vmatpush.msra.mxu2 %v3914_v10  ;;  %2094 = vmatpush.msra.mxu3 %v2684_v26  ;;  %v3917_v26 = vand.u32 4294901760, %v2846_v7 }
 0x14a   :  { %1957 = vmatpush.msra.mxu2 %v3915_v4  ;;  %2096 = vmatpush.msra.mxu3 %v2709_v38  ;;  %v3919_v38 = vand.u32 4294901760, %v2906_v0 }
 0x14c   :  { %v2991_v3 = vpop.f32.mrf.mxu0  ;;  %v2993_v15 = vpop.f32.mrf.mxu1  ;;  %1961 = vmatpush.msra.mxu2 %v3916_v11  ;;  %2098 = vmatpush.msra.mxu3 %v2730_v51  ;;  %v3920_v11 = vld [vmem:[#allocation29_spill] sm:$0xff] }
 0x14e   :  { %1965 = vmatpush.msra.mxu2 %v3917_v26  ;;  %2100 = vmatpush.msra.mxu3 %v2757_v5  ;;  %v3027_v5 = vpop.f32.mrf.mxu2  ;;  %v3921_v26 = vld [vmem:[#allocation7_spill] sm:$0xff] }
 0x14f   :  { %923 = vmatmul.f32.gmra.mxu0 %v2500_v21  ;;  %1042 = vmatmul.f32.gmra.mxu1 %v2492_v13  ;;  %v168_v13 = vadd.f32 %v2544_v58, %v2560_v9  ;;  %v3030_v9 = vpop.f32.mrf.mxu3 }
 0x150   :  { %1969 = vmatpush.msra.mxu2 %v3918_v18  ;;  %2102 = vmatpush.msra.mxu3 %v2782_v31 }
 0x151   :  { %v407_v51 = vadd.f32 %v2584_v36, %v168_v13 }
 0x152   :  { %1973 = vmatpush.msra.mxu2 %v3919_v38  ;;  %2104 = vmatpush.msra.mxu3 %v2811_v24 }
 0x153   :  { %v538_v24 = vadd.f32 %v2802_v28, %v407_v51 }
 0x154   :  { %v3013_v6 = vpop.f32.mrf.mxu1  ;;  %v864_v2 = vpop.f32.mrf.mxu0  ;;  %1977 = vmatpush.msra.mxu2 %v1450_v19  ;;  %2106 = vmatpush.msra.mxu3 %v2840_v1 }
 0x155   :  { %v865_v31 = vadd.f32 %v864_v2, %v2578_v27  ;;  %v688_v27 = vadd.f32 %v2784_v53, %v538_v24 }
 0x156   :  { %1981 = vmatpush.msra.mxu2 %v1456_v62  ;;  %2108 = vmatpush.msra.mxu3 %v2867_v33 }
 0x157   :  { %927 = vmatmul.f32.gmra.mxu0 %v2508_v30  ;;  %1046 = vmatmul.f32.gmra.mxu1 %v2500_v21  ;;  %v176_v21 = vadd.f32 %v2544_v58, %v2582_v35  ;;  %v3046_v35 = vpop.f32.mrf.mxu2 }
 0x158   :  { %2110 = vmatpush.msra.mxu3 %v2900_v48 }
 0x159   :  { %v411_v62 = vadd.f32 %v2608_v61, %v176_v21  ;;  %v3055_v61 = vpop.f32.mrf.mxu3 }
 0x15a   :  { %2112 = vmatpush.msra.mxu3 %v2925_v22  ;;  %v184_v22 = vadd.f32 %v2544_v58, %v2606_v59 }
 0x15b   :  { %v543_v53 = vadd.f32 %v2829_v32, %v411_v62  ;;  %v3924_v62 = vld [vmem:[#allocation2_spill] sm:$0xff] }
 0x15c   :  { %v868_v46 = vpop.f32.mrf.mxu0  ;;  %v987_v39 = vpop.f32.mrf.mxu1  ;;  %2114 = vmatpush.msra.mxu3 %v2944_v37  ;;  %v415_v59 = vadd.f32 %v2628_v23, %v184_v22  ;;  %v3926_v22 = vld [vmem:[#allocation10_spill] sm:$0xff] }
 0x15d   :  { %v988_v7 = vadd.f32 %v987_v39, %v865_v31  ;;  %v869_v1 = vadd.f32 %v868_v46, %v688_v27  ;;  %v694_v44 = vadd.f32 %v2806_v16, %v543_v53  ;;  %v3922_v31 = vld [vmem:[#allocation6_spill] sm:$0xff]  ;;  %v3923_v39 = vld [vmem:[#allocation37_spill] sm:$0xff] }
 0x15e   :  { %v548_v60 = vadd.f32 %v2851_v49, %v415_v59  ;;  %v419_v49 = vadd.f32 %v3921_v26, %v192_v12  ;;  %v200_v46 = vadd.f32 %v2544_v58, %v3922_v31 }
 0x15f   :  { %v1086_v36 = vmax.f32 %v988_v7, 0.0  ;;  %931 = vmatmul.f32.gmra.mxu0 %v2519_v40  ;;  %1050 = vmatmul.f32.gmra.mxu1 %v2508_v30  ;;  %v3074_v16 = vpop.f32.mrf.mxu2 }
 0x160   :  { %v700_v20 = vadd.f32 %v3920_v11, %v548_v60  ;;  %v553_v21 = vadd.f32 %v3923_v39, %v419_v49  ;;  %v423_v53 = vadd.f32 %v3926_v22, %v200_v46  ;;  %v3931_v49 = vld [vmem:[#allocation12_spill] sm:$0xff] }
 0x161   :  { %v3043_v33 = vand.u32 4294901760, %v1086_v36  ;;  %v3077_v25 = vpop.f32.mrf.mxu3 }
 0x163   :  { %v3049_v28 = vsub.f32 %v1086_v36, %v3043_v33  ;;  %1461 = vmatmul.f32.vlgmr.msrb.gmra.mxu3 %v3043_v33 }
 0x164   :  { %v872_v57 = vpop.f32.mrf.mxu0  ;;  %v991_v30 = vpop.f32.mrf.mxu1 }
 0x165   :  { %v1165_v48 = vand.u32 4294901760, %v3049_v28  ;;  %v992_v0 = vadd.f32 %v991_v30, %v869_v1  ;;  %v873_v17 = vadd.f32 %v872_v57, %v694_v44  ;;  %v3925_v57 = vld [vmem:[#allocation34_spill] sm:$0xff] }
 0x166   :  { %v706_v30 = vadd.f32 %v3925_v57, %v553_v21 }
 0x167   :  { %v1087_v37 = vmax.f32 %v992_v0, 0.0  ;;  %935 = vmatmul.f32.gmra.mxu0 %v2539_v54  ;;  %1054 = vmatmul.f32.gmra.mxu1 %v2519_v40  ;;  %v1166_v19 = vsub.f32 %v3049_v28, %v1165_v48  ;;  %v3096_v36 = vpop.f32.mrf.mxu2 }
 0x169   :  { %v3065_v29 = vand.u32 4294901760, %v1087_v37  ;;  %v1167_v32 = vand.u32 4294901760, %v1166_v19  ;;  %v3105_v0 = vpop.f32.mrf.mxu3 }
 0x16b   :  { %v3068_v43 = vsub.f32 %v1087_v37, %v3065_v29  ;;  %1168 = vmatmul.f32.vlgmr.msrb.gmra.mxu2 %v1167_v32  ;;  %1465 = vmatmul.f32.gmra.mxu3 %v3065_v29 }
 0x16c   :  { %v876_v34 = vpop.f32.mrf.mxu0  ;;  %v995_v40 = vpop.f32.mrf.mxu1 }
 0x16d   :  { %v996_v23 = vadd.f32 %v995_v40, %v873_v17  ;;  %v1173_v41 = vand.u32 4294901760, %v3068_v43  ;;  %v877_v13 = vadd.f32 %v876_v34, %v700_v20  ;;  %v3927_v17 = vld [vmem:[#allocation9_spill] sm:$0xff]  ;;  %v3930_v20 = vld [vmem:[#allocation38_spill] sm:$0xff] }
 0x16e   :  { %v208_v34 = vadd.f32 %v2544_v58, %v3927_v17  ;;  %v3928_v40 = vld [vmem:[#allocation41_spill] sm:$0xff]  ;;  %v3936_v17 = vld [vmem:[#allocation14_spill] sm:$0xff] }
 0x16f   :  { %v1088_v10 = vmax.f32 %v996_v23, 0.0  ;;  %939 = vmatmul.f32.gmra.mxu0 %v2558_v8  ;;  %1058 = vmatmul.f32.gmra.mxu1 %v2539_v54  ;;  %v1174_v4 = vsub.f32 %v3068_v43, %v1173_v41  ;;  %v558_v12 = vadd.f32 %v3928_v40, %v423_v53 }
 0x171   :  { %v3086_v2 = vand.u32 4294901760, %v1088_v10  ;;  %v1175_v18 = vand.u32 4294901760, %v1174_v4  ;;  %v3929_v4 = vld [vmem:[#allocation3_spill] sm:$0xff]  ;;  %v712_v26 = vadd.f32 %v3930_v20, %v558_v12  ;;  %v3128_v31 = vpop.f32.mrf.mxu3 }
 0x173   :  { %v3089_v38 = vsub.f32 %v1088_v10, %v3086_v2  ;;  %1176 = vmatmul.f32.gmra.mxu2 %v1175_v18  ;;  %1469 = vmatmul.f32.gmra.mxu3 %v3086_v2  ;;  %v427_v18 = vadd.f32 %v3931_v49, %v208_v34 }
 0x174   :  { %v880_v51 = vpop.f32.mrf.mxu0  ;;  %v999_v54 = vpop.f32.mrf.mxu1 }
 0x175   :  { %v1000_v24 = vadd.f32 %v999_v54, %v877_v13  ;;  %v1181_v7 = vand.u32 4294901760, %v3089_v38  ;;  %v881_v44 = vadd.f32 %v880_v51, %v706_v30  ;;  %v3124_v13 = vpop.f32.mrf.mxu2 }
 0x177   :  { %v1089_v27 = vmax.f32 %v1000_v24, 0.0  ;;  %943 = vmatmul.f32.gmra.mxu0 %v3924_v62  ;;  %1062 = vmatmul.f32.gmra.mxu1 %v2558_v8  ;;  %v1182_v1 = vsub.f32 %v3089_v38, %v1181_v7 }
 0x179   :  { %v3107_v37 = vand.u32 4294901760, %v1089_v27  ;;  %v1183_v19 = vand.u32 4294901760, %v1182_v1  ;;  %v3933_v1 = vld [vmem:[#allocation45_spill] sm:$0xff] }
 0x17a   :  { %v563_v57 = vadd.f32 %v3933_v1, %v427_v18  ;;  %v3939_v1 = vld [vmem:[#allocation46_spill] sm:$0xff] }
 0x17b   :  { %v3110_v59 = vsub.f32 %v1089_v27, %v3107_v37  ;;  %1184 = vmatmul.f32.gmra.mxu2 %v1183_v19  ;;  %1473 = vmatmul.f32.gmra.mxu3 %v3107_v37  ;;  %v3932_v27 = vld [vmem:[#allocation11_spill] sm:$0xff]  ;;  %v3934_v19 = vld [vmem:[#allocation4_spill] sm:$0xff] }
 0x17c   :  { %v884_v8 = vpop.f32.mrf.mxu0  ;;  %v1003_v32 = vpop.f32.mrf.mxu1 }
 0x17d   :  { %v1004_v60 = vadd.f32 %v1003_v32, %v881_v44  ;;  %v1189_v23 = vand.u32 4294901760, %v3110_v59  ;;  %v885_v46 = vadd.f32 %v884_v8, %v712_v26  ;;  %v3935_v8 = vld [vmem:[#allocation42_spill] sm:$0xff]  ;;  %v3937_v26 = vld [vmem:[#allocation13_spill] sm:$0xff] }
 0x17e   :  { %v718_v32 = vadd.f32 %v3935_v8, %v563_v57  ;;  %v224_v49 = vadd.f32 %v2544_v58, %v3937_v26 }
 0x17f   :  { %v1090_v10 = vmax.f32 %v1004_v60, 0.0  ;;  %947 = vmatmul.f32.gmra.mxu0 %v3929_v4  ;;  %1066 = vmatmul.f32.gmra.mxu1 %v3924_v62  ;;  %v1190_v11 = vsub.f32 %v3110_v59, %v1189_v23  ;;  %v216_v62 = vadd.f32 %v2544_v58, %v3932_v27  ;;  %v3147_v60 = vpop.f32.mrf.mxu2 }
 0x181   :  { %v3126_v51 = vand.u32 4294901760, %v1090_v10  ;;  %v1191_v54 = vand.u32 4294901760, %v1190_v11  ;;  %v431_v34 = vadd.f32 %v3936_v17, %v216_v62  ;;  %v3175_v17 = vld [vmem:[%s3818_s2] ss:$0 sm:$0xff] }
 0x183   :  { %v3131_v39 = vsub.f32 %v1090_v10, %v3126_v51  ;;  %1192 = vmatmul.f32.gmra.mxu2 %v1191_v54  ;;  %1477 = vmatmul.f32.gmra.mxu3 %v3126_v51  ;;  %v568_v18 = vadd.f32 %v2951_v14, %v431_v34  ;;  %v3156_v54 = vpop.f32.mrf.mxu3  ;;  %v3941_v34 = vld [vmem:[#allocation15_spill] sm:$0xff] }
 0x184   :  { %v888_v21 = vpop.f32.mrf.mxu0  ;;  %v1007_v24 = vpop.f32.mrf.mxu1 }
 0x185   :  { %v1008_v30 = vadd.f32 %v1007_v24, %v885_v46  ;;  %v1197_v22 = vand.u32 4294901760, %v3131_v39  ;;  %v889_v10 = vadd.f32 %v888_v21, %v718_v32  ;;  %v3938_v21 = vld [vmem:[#allocation5_spill] sm:$0xff]  ;;  %v724_v57 = vadd.f32 %v3939_v1, %v568_v18  ;;  %v3943_v1 = vld [vmem:[#allocation18_spill] sm:$0xff] }
 0x187   :  { %v1091_v53 = vmax.f32 %v1008_v30, 0.0  ;;  %951 = vmatmul.f32.gmra.mxu0 %v3934_v19  ;;  %1070 = vmatmul.f32.gmra.mxu1 %v3929_v4  ;;  %v1198_v44 = vsub.f32 %v3131_v39, %v1197_v22  ;;  %v3940_v30 = vld [vmem:[#allocation16_spill] sm:$0xff] }
 0x188   :  { %v435_v58 = vadd.f32 %v3940_v30, %v224_v49 }
 0x189   :  { %v3145_v40 = vand.u32 4294901760, %v1091_v53  ;;  %v1199_v12 = vand.u32 4294901760, %v1198_v44 }
 0x18b   :  { %v3150_v11 = vsub.f32 %v1091_v53, %v3145_v40  ;;  %1200 = vmatmul.f32.gmra.mxu2 %v1199_v12  ;;  %1481 = vmatmul.f32.gmra.mxu3 %v3145_v40  ;;  %v232_v12 = vadd.f32 %v3175_v17, %v3941_v34  ;;  %v3183_v49 = vpop.f32.mrf.mxu3 }
 0x18c   :  { %v892_v4 = vpop.f32.mrf.mxu0  ;;  %v1011_v20 = vpop.f32.mrf.mxu1 }
 0x18d   :  { %v1012_v46 = vadd.f32 %v1011_v20, %v889_v10  ;;  %v1205_v24 = vand.u32 4294901760, %v3150_v11  ;;  %v893_v44 = vadd.f32 %v892_v4, %v724_v57  ;;  %v573_v10 = vadd.f32 %v2976_v56, %v435_v58  ;;  %v3180_v20 = vpop.f32.mrf.mxu2 }
 0x18e   :  { %v439_v56 = vadd.f32 %v3943_v1, %v232_v12 }
 0x18f   :  { %v1092_v27 = vmax.f32 %v1012_v46, 0.0  ;;  %955 = vmatmul.f32.gmra.mxu0 %v3938_v21  ;;  %1074 = vmatmul.f32.gmra.mxu1 %v3934_v19  ;;  %v1206_v62 = vsub.f32 %v3150_v11, %v1205_v24  ;;  %v3942_v46 = vld [vmem:[#allocation8_spill] sm:$0xff] }
 0x191   :  { %v3166_v53 = vand.u32 4294901760, %v1092_v27  ;;  %v1207_v14 = vand.u32 4294901760, %v1206_v62  ;;  %v730_v62 = vadd.f32 %v2959_v47, %v573_v10 }
 0x193   :  { %v3169_v8 = vsub.f32 %v1092_v27, %v3166_v53  ;;  %1208 = vmatmul.f32.gmra.mxu2 %v1207_v14  ;;  %1485 = vmatmul.f32.gmra.mxu3 %v3166_v53 }
 0x194   :  { %v896_v32 = vpop.f32.mrf.mxu0  ;;  %v1015_v19 = vpop.f32.mrf.mxu1 }
 0x195   :  { %v1016_v4 = vadd.f32 %v1015_v19, %v893_v44  ;;  %v1213_v26 = vand.u32 4294901760, %v3169_v8  ;;  %v897_v58 = vadd.f32 %v896_v32, %v730_v62  ;;  %v3944_v19 = vld [vmem:[#allocation17_spill] sm:$0xff]  ;;  %v3202_v10 = vpop.f32.mrf.mxu2  ;;  %v3945_v62 = vld [vmem:[#allocation20_spill] sm:$0xff] }
 0x196   :  { %v240_v34 = vadd.f32 %v3175_v17, %v3944_v19 }
 0x197   :  { %v1093_v18 = vmax.f32 %v1016_v4, 0.0  ;;  %959 = vmatmul.f32.gmra.mxu0 %v3942_v46  ;;  %1078 = vmatmul.f32.gmra.mxu1 %v3938_v21  ;;  %v1214_v27 = vsub.f32 %v3169_v8, %v1213_v26  ;;  %v578_v4 = vadd.f32 %v3001_v42, %v439_v56 }
 0x198   :  { %v443_v1 = vadd.f32 %v3945_v62, %v240_v34 }
 0x199   :  { %v3192_v57 = vand.u32 4294901760, %v1093_v18  ;;  %v1215_v30 = vand.u32 4294901760, %v1214_v27 }
 0x19b   :  { %v3195_v14 = vsub.f32 %v1093_v18, %v3192_v57  ;;  %1216 = vmatmul.f32.gmra.mxu2 %v1215_v30  ;;  %1489 = vmatmul.f32.gmra.mxu3 %v3192_v57  ;;  %v736_v18 = vadd.f32 %v2981_v50, %v578_v4  ;;  %v3211_v30 = vpop.f32.mrf.mxu3  ;;  %v583_v50 = vadd.f32 %v3027_v5, %v443_v1 }
 0x19c   :  { %v900_v44 = vpop.f32.mrf.mxu0  ;;  %v1019_v21 = vpop.f32.mrf.mxu1 }
 0x19d   :  { %v1020_v47 = vadd.f32 %v1019_v21, %v897_v58  ;;  %v3846_v12 = vand.u32 4294901760, %v3195_v14  ;;  %v901_v58 = vadd.f32 %v900_v44, %v736_v18 }
 0x19f   :  { %v1094_v27 = vmax.f32 %v1020_v47, 0.0  ;;  %1082 = vmatmul.f32.gmra.mxu1 %v3942_v46  ;;  %1611 = vmatmul.f32.vlgmr.msra.gmra.mxu0 %v3049_v28  ;;  %v1222_v32 = vsub.f32 %v3195_v14, %v3846_v12  ;;  %v3946_v47 = vld [vmem:[#allocation19_spill] sm:$0xff] }
 0x1a0   :  { %v248_v12 = vadd.f32 %v3175_v17, %v3946_v47 }
 0x1a1   :  { %v3213_v42 = vand.u32 4294901760, %v1094_v27  ;;  %v1223_v56 = vand.u32 4294901760, %v1222_v32  ;;  %v3947_v32 = vld [vmem:[#allocation22_spill] sm:$0xff] }
 0x1a2   :  { %v447_v18 = vadd.f32 %v3947_v32, %v248_v12 }
 0x1a3   :  { %v3216_v21 = vsub.f32 %v1094_v27, %v3213_v42  ;;  %1224 = vmatmul.f32.gmra.mxu2 %v1223_v56  ;;  %1493 = vmatmul.f32.gmra.mxu3 %v3213_v42  ;;  %v742_v27 = vadd.f32 %v3008_v55, %v583_v50  ;;  %v3231_v56 = vpop.f32.mrf.mxu2 }
 0x1a4   :  { %v904_v46 = vpop.f32.mrf.mxu0  ;;  %v1023_v19 = vpop.f32.mrf.mxu1  ;;  %v588_v12 = vadd.f32 %v3046_v35, %v447_v18 }
 0x1a5   :  { %v1024_v34 = vadd.f32 %v1023_v19, %v901_v58  ;;  %v1229_v4 = vand.u32 4294901760, %v3216_v21  ;;  %v3235_v58 = vpop.f32.mrf.mxu3  ;;  %v905_v19 = vadd.f32 %v904_v46, %v742_v27  ;;  %v3949_v27 = vld [vmem:[#allocation24_spill] sm:$0xff] }
 0x1a7   :  { %v1095_v62 = vmax.f32 %v1024_v34, 0.0  ;;  %1616 = vmatmul.f32.gmra.mxu0 %v3068_v43  ;;  %1770 = vmatmul.f32.vlgmr.msra.gmra.mxu1 %v1165_v48  ;;  %v1230_v44 = vsub.f32 %v3216_v21, %v1229_v4  ;;  %v3948_v34 = vld [vmem:[#allocation21_spill] sm:$0xff] }
 0x1a8   :  { %v256_v55 = vadd.f32 %v3175_v17, %v3948_v34 }
 0x1a9   :  { %v3233_v5 = vand.u32 4294901760, %v1095_v62  ;;  %v1231_v1 = vand.u32 4294901760, %v1230_v44 }
 0x1ab   :  { %v3238_v47 = vsub.f32 %v1095_v62, %v3233_v5  ;;  %1232 = vmatmul.f32.gmra.mxu2 %v1231_v1  ;;  %1497 = vmatmul.f32.gmra.mxu3 %v3233_v5  ;;  %v748_v62 = vadd.f32 %v3030_v9, %v588_v12  ;;  %v451_v1 = vadd.f32 %v3949_v27, %v256_v55  ;;  %v3255_v18 = vpop.f32.mrf.mxu2 }
 0x1ac   :  { %v908_v28 = vpop.f32.mrf.mxu0  ;;  %v1027_v48 = vpop.f32.mrf.mxu1 }
 0x1ad   :  { %v1028_v50 = vadd.f32 %v1027_v48, %v905_v19  ;;  %v3847_v32 = vand.u32 4294901760, %v3238_v47  ;;  %v909_v19 = vadd.f32 %v908_v28, %v748_v62  ;;  %v593_v9 = vadd.f32 %v3074_v16, %v451_v1  ;;  %v3264_v55 = vpop.f32.mrf.mxu3  ;;  %v3951_v62 = vld [vmem:[#allocation26_spill] sm:$0xff] }
 0x1af   :  { %v1096_v44 = vmax.f32 %v1028_v50, 0.0  ;;  %1621 = vmatmul.f32.gmra.mxu0 %v3089_v38  ;;  %1776 = vmatmul.f32.gmra.mxu1 %v1173_v41  ;;  %v1238_v46 = vsub.f32 %v3238_v47, %v3847_v32  ;;  %v3950_v50 = vld [vmem:[#allocation23_spill] sm:$0xff] }
 0x1b0   :  { %v264_v32 = vadd.f32 %v3175_v17, %v3950_v50  ;;  %v3952_v50 = vld [vmem:[#allocation25_spill] sm:$0xff] }
 0x1b1   :  { %v3253_v34 = vand.u32 4294901760, %v1096_v44  ;;  %v1239_v35 = vand.u32 4294901760, %v1238_v46 }
 0x1b3   :  { %v3258_v48 = vsub.f32 %v1096_v44, %v3253_v34  ;;  %1240 = vmatmul.f32.gmra.mxu2 %v1239_v35  ;;  %1501 = vmatmul.f32.gmra.mxu3 %v3253_v34  ;;  %v754_v44 = vadd.f32 %v3055_v61, %v593_v9  ;;  %v455_v35 = vadd.f32 %v3951_v62, %v264_v32  ;;  %v3284_v61 = vpop.f32.mrf.mxu2 }
 0x1b4   :  { %v912_v43 = vpop.f32.mrf.mxu0  ;;  %v1031_v41 = vpop.f32.mrf.mxu1 }
 0x1b5   :  { %v1032_v12 = vadd.f32 %v1031_v41, %v909_v19  ;;  %v3848_v46 = vand.u32 4294901760, %v3258_v48  ;;  %v913_v19 = vadd.f32 %v912_v43, %v754_v44 }
 0x1b7   :  { %v1097_v27 = vmax.f32 %v1032_v12, 0.0  ;;  %1626 = vmatmul.f32.gmra.mxu0 %v3110_v59  ;;  %1782 = vmatmul.f32.gmra.mxu1 %v1181_v7  ;;  %v1246_v28 = vsub.f32 %v3258_v48, %v3848_v46  ;;  %v272_v12 = vadd.f32 %v3175_v17, %v3952_v50  ;;  %v598_v46 = vadd.f32 %v3096_v36, %v455_v35  ;;  %v3953_v36 = vld [vmem:[#allocation28_spill] sm:$0xff]  ;;  %v3954_v50 = vld [vmem:[#allocation27_spill] sm:$0xff] }
 0x1b9   :  { %v3275_v16 = vand.u32 4294901760, %v1097_v27  ;;  %v1247_v1 = vand.u32 4294901760, %v1246_v28  ;;  %v3287_v28 = vpop.f32.mrf.mxu3  ;;  %v760_v44 = vadd.f32 %v3077_v25, %v598_v46  ;;  %v459_v62 = vadd.f32 %v3953_v36, %v272_v12 }
 0x1bb   :  { %v3278_v41 = vsub.f32 %v1097_v27, %v3275_v16  ;;  %1248 = vmatmul.f32.gmra.mxu2 %v1247_v1  ;;  %1505 = vmatmul.f32.gmra.mxu3 %v3275_v16  ;;  %v3307_v12 = vpop.f32.mrf.mxu2 }
 0x1bc   :  { %v916_v38 = vpop.f32.mrf.mxu0  ;;  %v1035_v7 = vpop.f32.mrf.mxu1 }
 0x1bd   :  { %v1036_v32 = vadd.f32 %v1035_v7, %v913_v19  ;;  %v3849_v9 = vand.u32 4294901760, %v3278_v41  ;;  %v917_v19 = vadd.f32 %v916_v38, %v760_v44  ;;  %v3955_v44 = vld [vmem:[#allocation31_spill] sm:$0xff] }
 0x1bf   :  { %v1098_v43 = vmax.f32 %v1036_v32, 0.0  ;;  %1631 = vmatmul.f32.gmra.mxu0 %v3131_v39  ;;  %1788 = vmatmul.f32.gmra.mxu1 %v1189_v23  ;;  %v1254_v27 = vsub.f32 %v3278_v41, %v3849_v9  ;;  %v280_v32 = vadd.f32 %v3175_v17, %v3954_v50  ;;  %v603_v9 = vadd.f32 %v3124_v13, %v459_v62  ;;  %v3956_v50 = vld [vmem:[#allocation30_spill] sm:$0xff] }
 0x1c1   :  { %v3297_v35 = vand.u32 4294901760, %v1098_v43  ;;  %v1255_v1 = vand.u32 4294901760, %v1254_v27  ;;  %v463_v36 = vadd.f32 %v3955_v44, %v280_v32  ;;  %v3317_v13 = vpop.f32.mrf.mxu3 }
 0x1c3   :  { %v3300_v7 = vsub.f32 %v1098_v43, %v3297_v35  ;;  %1256 = vmatmul.f32.gmra.mxu2 %v1255_v1  ;;  %1509 = vmatmul.f32.gmra.mxu3 %v3297_v35  ;;  %v766_v43 = vadd.f32 %v3105_v0, %v603_v9  ;;  %v608_v0 = vadd.f32 %v3147_v60, %v463_v36 }
 0x1c4   :  { %v920_v59 = vpop.f32.mrf.mxu0  ;;  %v1039_v23 = vpop.f32.mrf.mxu1 }
 0x1c5   :  { %v1040_v25 = vadd.f32 %v1039_v23, %v917_v19  ;;  %v3854_v46 = vand.u32 4294901760, %v3300_v7  ;;  %v921_v19 = vadd.f32 %v920_v59, %v766_v43 }
 0x1c7   :  { %v1099_v27 = vmax.f32 %v1040_v25, 0.0  ;;  %1636 = vmatmul.f32.gmra.mxu0 %v3150_v11  ;;  %1794 = vmatmul.f32.gmra.mxu1 %v1197_v22  ;;  %v1262_v38 = vsub.f32 %v3300_v7, %v3854_v46  ;;  %v288_v25 = vadd.f32 %v3175_v17, %v3956_v50 }
 0x1c9   :  { %v3319_v62 = vand.u32 4294901760, %v1099_v27  ;;  %v1263_v1 = vand.u32 4294901760, %v1262_v38  ;;  %v3957_v38 = vld [vmem:[#allocation33_spill] sm:$0xff] }
 0x1ca   :  { %v467_v43 = vadd.f32 %v3957_v38, %v288_v25 }
 0x1cb   :  { %v3322_v23 = vsub.f32 %v1099_v27, %v3319_v62  ;;  %1264 = vmatmul.f32.gmra.mxu2 %v1263_v1  ;;  %1513 = vmatmul.f32.gmra.mxu3 %v3319_v62  ;;  %v772_v27 = vadd.f32 %v3128_v31, %v608_v0  ;;  %v3337_v1 = vpop.f32.mrf.mxu2 }
 0x1cc   :  { %v924_v39 = vpop.f32.mrf.mxu0  ;;  %v1043_v22 = vpop.f32.mrf.mxu1  ;;  %v613_v25 = vadd.f32 %v3180_v20, %v467_v43 }
 0x1cd   :  { %v1044_v9 = vadd.f32 %v1043_v22, %v921_v19  ;;  %v3851_v32 = vand.u32 4294901760, %v3322_v23  ;;  %v3341_v19 = vpop.f32.mrf.mxu3  ;;  %v925_v22 = vadd.f32 %v924_v39, %v772_v27  ;;  %v3959_v27 = vld [vmem:[#allocation36_spill] sm:$0xff] }
 0x1cf   :  { %v1100_v44 = vmax.f32 %v1044_v9, 0.0  ;;  %1641 = vmatmul.f32.gmra.mxu0 %v3169_v8  ;;  %1800 = vmatmul.f32.gmra.mxu1 %v1205_v24  ;;  %v1270_v59 = vsub.f32 %v3322_v23, %v3851_v32  ;;  %v3958_v9 = vld [vmem:[#allocation32_spill] sm:$0xff] }
 0x1d0   :  { %v296_v31 = vadd.f32 %v3175_v17, %v3958_v9 }
 0x1d1   :  { %v3339_v60 = vand.u32 4294901760, %v1100_v44  ;;  %v1271_v36 = vand.u32 4294901760, %v1270_v59 }
 0x1d3   :  { %v3344_v50 = vsub.f32 %v1100_v44, %v3339_v60  ;;  %1272 = vmatmul.f32.gmra.mxu2 %v1271_v36  ;;  %1517 = vmatmul.f32.gmra.mxu3 %v3339_v60  ;;  %v778_v44 = vadd.f32 %v3156_v54, %v613_v25  ;;  %v471_v36 = vadd.f32 %v3959_v27, %v296_v31  ;;  %v3361_v43 = vpop.f32.mrf.mxu2 }
 0x1d4   :  { %v928_v11 = vpop.f32.mrf.mxu0  ;;  %v1047_v24 = vpop.f32.mrf.mxu1 }
 0x1d5   :  { %v1048_v0 = vadd.f32 %v1047_v24, %v925_v22  ;;  %v3850_v38 = vand.u32 4294901760, %v3344_v50  ;;  %v929_v22 = vadd.f32 %v928_v11, %v778_v44  ;;  %v618_v54 = vadd.f32 %v3202_v10, %v471_v36 }
 0x1d6   :  { %v3961_v11 = vand.u32 4294901760, %v3195_v14 }
 0x1d7   :  { %v1101_v59 = vmax.f32 %v1048_v0, 0.0  ;;  %1646 = vmatmul.f32.gmra.mxu0 %v3195_v14  ;;  %1806 = vmatmul.f32.gmra.mxu1 %v1213_v26  ;;  %v1278_v39 = vsub.f32 %v3344_v50, %v3850_v38  ;;  %v3960_v0 = vld [vmem:[#allocation35_spill] sm:$0xff]  ;;  %v784_v44 = vadd.f32 %v3183_v49, %v618_v54 }
 0x1d8   :  { %v304_v38 = vadd.f32 %v3175_v17, %v3960_v0  ;;  %v3963_v14 = vld [vmem:[#allocation39_spill] sm:$0xff] }
 0x1d9   :  { %v3359_v9 = vand.u32 4294901760, %v1101_v59  ;;  %v1279_v20 = vand.u32 4294901760, %v1278_v39  ;;  %v3371_v39 = vpop.f32.mrf.mxu3 }
 0x1db   :  { %v3364_v24 = vsub.f32 %v1101_v59, %v3359_v9  ;;  %1280 = vmatmul.f32.gmra.mxu2 %v1279_v20  ;;  %1521 = vmatmul.f32.gmra.mxu3 %v3359_v9  ;;  %v3962_v20 = vld [vmem:[#allocation40_spill] sm:$0xff]  ;;  %v3391_v54 = vpop.f32.mrf.mxu2 }
 0x1dc   :  { %v932_v8 = vpop.f32.mrf.mxu0  ;;  %v1051_v26 = vpop.f32.mrf.mxu1  ;;  %v475_v0 = vadd.f32 %v3962_v20, %v304_v38 }
 0x1dd   :  { %v1052_v31 = vadd.f32 %v1051_v26, %v929_v22  ;;  %v3852_v25 = vand.u32 4294901760, %v3364_v24  ;;  %v933_v22 = vadd.f32 %v932_v8, %v784_v44  ;;  %v3964_v44 = vld [vmem:[#allocation44_spill] sm:$0xff] }
 0x1df   :  { %v1102_v27 = vmax.f32 %v1052_v31, 0.0  ;;  %1651 = vmatmul.f32.gmra.mxu0 %v3216_v21  ;;  %1812 = vmatmul.f32.gmra.mxu1 %v3961_v11  ;;  %v1286_v59 = vsub.f32 %v3364_v24, %v3852_v25  ;;  %v312_v31 = vadd.f32 %v3175_v17, %v3963_v14  ;;  %v623_v25 = vadd.f32 %v3231_v56, %v475_v0  ;;  %v3410_v21 = vld [vmem:[%s3820_s4] ss:$0 sm:$0xff] }
 0x1e1   :  { %v3381_v10 = vand.u32 4294901760, %v1102_v27  ;;  %v1287_v36 = vand.u32 4294901760, %v1286_v59  ;;  %v479_v20 = vadd.f32 %v3964_v44, %v312_v31  ;;  %v790_v56 = vadd.f32 %v3211_v30, %v623_v25  ;;  %v3966_v30 = vld [vmem:[#allocation43_spill] sm:$0xff] }
 0x1e2   :  { %v320_v25 = vadd.f32 %v3175_v17, %v3966_v30  ;;  %v3968_v30 = vld [vmem:[#allocation48_spill] sm:$0xff] }
 0x1e3   :  { %v3384_v26 = vsub.f32 %v1102_v27, %v3381_v10  ;;  %1288 = vmatmul.f32.gmra.mxu2 %v1287_v36  ;;  %1525 = vmatmul.f32.gmra.mxu3 %v3381_v10 }
 0x1e4   :  { %v936_v11 = vpop.f32.mrf.mxu0  ;;  %v1055_v32 = vpop.f32.mrf.mxu1 }
 0x1e5   :  { %v1056_v49 = vadd.f32 %v1055_v32, %v933_v22  ;;  %v3853_v38 = vand.u32 4294901760, %v3384_v26  ;;  %v937_v36 = vadd.f32 %v936_v11, %v790_v56 }
 0x1e6   :  { %v1462_v59 = vpop.f32.mrf.mxu3 }
 0x1e7   :  { %v1103_v8 = vmax.f32 %v1056_v49, 0.0  ;;  %1656 = vmatmul.f32.gmra.mxu0 %v3238_v47  ;;  %1818 = vmatmul.f32.gmra.mxu1 %v1229_v4  ;;  %v1294_v27 = vsub.f32 %v3384_v26, %v3853_v38  ;;  %v628_v4 = vadd.f32 %v3255_v18, %v479_v20 }
 0x1e9   :  { %v3401_v32 = vand.u32 4294901760, %v1103_v8  ;;  %v1295_v0 = vand.u32 4294901760, %v1294_v27  ;;  %v796_v20 = vadd.f32 %v3235_v58, %v628_v4 }
 0x1eb   :  { %3965 = vst [vmem:[#allocation29_spill] sm:$0xff] %v3401_v32  ;;  %v3404_v22 = vsub.f32 %v1103_v8, %v3401_v32  ;;  %1296 = vmatmul.f32.gmra.mxu2 %v1295_v0  ;;  %1529 = vmatmul.f32.gmra.mxu3 %v3401_v32  ;;  %v3967_v0 = vand.u32 4294901760, %v3238_v47  ;;  %v3969_v47 = vld [vmem:[#allocation47_spill] sm:$0xff] }
 0x1ec   :  { %v940_v14 = vpop.f32.mrf.mxu0  ;;  %v1059_v31 = vpop.f32.mrf.mxu1 }
 0x1ed   :  { %v1060_v49 = vadd.f32 %v1059_v31, %v937_v36  ;;  %v3855_v11 = vand.u32 4294901760, %v3404_v22  ;;  %v483_v36 = vadd.f32 %v3968_v30, %v320_v25 }
 0x1ee   :  { %v1169_v8 = vpop.f32.mrf.mxu2  ;;  %v1466_v27 = vpop.f32.mrf.mxu3 }
 0x1ef   :  { %v1104_v44 = vmax.f32 %v1060_v49, 0.0  ;;  %v1170_v56 = vadd.f32 %v3410_v21, %v1169_v8  ;;  %1661 = vmatmul.f32.gmra.mxu0 %v3258_v48  ;;  %1824 = vmatmul.f32.gmra.mxu1 %v3967_v0  ;;  %v1302_v18 = vsub.f32 %v3404_v22, %v3855_v11  ;;  %v941_v49 = vadd.f32 %v940_v14, %v796_v20 }
 0x1f0   :  { %v328_v0 = vadd.f32 %v3175_v17, %v3969_v47  ;;  %v633_v58 = vadd.f32 %v3284_v61, %v483_v36 }
 0x1f1   :  { %v3425_v31 = vand.u32 4294901760, %v1104_v44  ;;  %v1303_v38 = vand.u32 4294901760, %v1302_v18  ;;  %v3427_v46 = vadd.f32 %v1462_v59, %v1170_v56 }
 0x1f2   :  { %v487_v20 = vadd.f32 %v2957_v63, %v328_v0  ;;  %v802_v61 = vadd.f32 %v3264_v55, %v633_v58 }
 0x1f3   :  { %v3430_v8 = vsub.f32 %v1104_v44, %v3425_v31  ;;  %1304 = vmatmul.f32.gmra.mxu2 %v1303_v38  ;;  %1533 = vmatmul.f32.gmra.mxu3 %v3425_v31  ;;  %v3970_v38 = vand.u32 4294901760, %v3258_v48 }
 0x1f4   :  { %v944_v11 = vpop.f32.mrf.mxu0  ;;  %v1063_v32 = vpop.f32.mrf.mxu1  ;;  %v638_v48 = vadd.f32 %v3307_v12, %v487_v20 }
 0x1f5   :  { %v1064_v4 = vadd.f32 %v1063_v32, %v941_v49  ;;  %v1309_v25 = vand.u32 4294901760, %v3430_v8  ;;  %v945_v49 = vadd.f32 %v944_v11, %v802_v61 }
 0x1f6   :  { %v1177_v18 = vpop.f32.mrf.mxu2  ;;  %v1470_v59 = vpop.f32.mrf.mxu3 }
 0x1f7   :  { %v1105_v56 = vmax.f32 %v1064_v4, 0.0  ;;  %v1178_v14 = vadd.f32 %v3410_v21, %v1177_v18  ;;  %1666 = vmatmul.f32.gmra.mxu0 %v3278_v41  ;;  %1830 = vmatmul.f32.gmra.mxu1 %v3970_v38  ;;  %v1310_v44 = vsub.f32 %v3430_v8, %v1309_v25  ;;  %v3971_v38 = vld [vmem:[#allocation49_spill] sm:$0xff] }
 0x1f8   :  { %v336_v63 = vadd.f32 %v3175_v17, %v3971_v38 }
 0x1f9   :  { %v3446_v32 = vand.u32 4294901760, %v1105_v56  ;;  %v1311_v30 = vand.u32 4294901760, %v1310_v44  ;;  %v3448_v36 = vadd.f32 %v1466_v27, %v1178_v14  ;;  %v808_v44 = vadd.f32 %v3287_v28, %v638_v48 }
 0x1fa   :  { %v491_v20 = vadd.f32 %v2972_v52, %v336_v63 }
 0x1fb   :  { %v3451_v47 = vsub.f32 %v1105_v56, %v3446_v32  ;;  %1312 = vmatmul.f32.gmra.mxu2 %v1311_v30  ;;  %1537 = vmatmul.f32.gmra.mxu3 %v3446_v32  ;;  %v3972_v56 = vand.u32 4294901760, %v3278_v41  ;;  %v344_v41 = vadd.f32 %v3175_v17, %v2970_v45 }
 0x1fc   :  { %v948_v4 = vpop.f32.mrf.mxu0  ;;  %v1067_v18 = vpop.f32.mrf.mxu1  ;;  %v643_v28 = vadd.f32 %v3337_v1, %v491_v20 }
 0x1fd   :  { %v1068_v55 = vadd.f32 %v1067_v18, %v945_v49  ;;  %v1317_v0 = vand.u32 4294901760, %v3451_v47  ;;  %v949_v18 = vadd.f32 %v948_v4, %v808_v44 }
 0x1fe   :  { %v1185_v58 = vpop.f32.mrf.mxu2  ;;  %v1474_v27 = vpop.f32.mrf.mxu3  ;;  %v814_v1 = vadd.f32 %v3317_v13, %v643_v28 }
 0x1ff   :  { %v1106_v14 = vmax.f32 %v1068_v55, 0.0  ;;  %v1186_v11 = vadd.f32 %v3410_v21, %v1185_v58  ;;  %1671 = vmatmul.f32.gmra.mxu0 %v3300_v7  ;;  %1836 = vmatmul.f32.gmra.mxu1 %v3972_v56  ;;  %v1318_v12 = vsub.f32 %v3451_v47, %v1317_v0  ;;  %v495_v56 = vadd.f32 %v2993_v15, %v344_v41 }
 0x200   :  { %v352_v15 = vadd.f32 %v3175_v17, %v2991_v3 }
 0x201   :  { %v3467_v61 = vand.u32 4294901760, %v1106_v14  ;;  %v1319_v30 = vand.u32 4294901760, %v1318_v12  ;;  %v3469_v49 = vadd.f32 %v1470_v59, %v1186_v11 }
 0x202   :  { %v499_v17 = vadd.f32 %v3013_v6, %v352_v15 }
 0x203   :  { %v3472_v38 = vsub.f32 %v1106_v14, %v3467_v61  ;;  %1320 = vmatmul.f32.gmra.mxu2 %v1319_v30  ;;  %1541 = vmatmul.f32.gmra.mxu3 %v3467_v61  ;;  %v3973_v14 = vand.u32 4294901760, %v3300_v7  ;;  %v648_v7 = vadd.f32 %v3361_v43, %v495_v56 }
 0x204   :  { %v952_v55 = vpop.f32.mrf.mxu0  ;;  %v1071_v58 = vpop.f32.mrf.mxu1 }
 0x205   :  { %v1072_v52 = vadd.f32 %v1071_v58, %v949_v18  ;;  %v1325_v48 = vand.u32 4294901760, %v3472_v38  ;;  %v953_v30 = vadd.f32 %v952_v55, %v814_v1  ;;  %v820_v3 = vadd.f32 %v3341_v19, %v648_v7 }
 0x206   :  { %v1193_v63 = vpop.f32.mrf.mxu2  ;;  %v1478_v59 = vpop.f32.mrf.mxu3 }
 0x207   :  { %v1107_v11 = vmax.f32 %v1072_v52, 0.0  ;;  %v1194_v4 = vadd.f32 %v3410_v21, %v1193_v63  ;;  %1676 = vmatmul.f32.gmra.mxu0 %v3322_v23  ;;  %1842 = vmatmul.f32.gmra.mxu1 %v3973_v14  ;;  %v1326_v45 = vsub.f32 %v3472_v38, %v1325_v48 }
 0x209   :  { %v3488_v12 = vand.u32 4294901760, %v1107_v11  ;;  %v1327_v44 = vand.u32 4294901760, %v1326_v45  ;;  %v3490_v20 = vadd.f32 %v1474_v27, %v1194_v4 }
 0x20b   :  { %v3493_v18 = vsub.f32 %v1107_v11, %v3488_v12  ;;  %1328 = vmatmul.f32.gmra.mxu2 %v1327_v44  ;;  %1545 = vmatmul.f32.gmra.mxu3 %v3488_v12  ;;  %v3974_v11 = vand.u32 4294901760, %v3322_v23  ;;  %v653_v44 = vadd.f32 %v3391_v54, %v499_v17 }
 0x20c   :  { %v1075_v58 = vpop.f32.mrf.mxu1  ;;  %v956_v41 = vpop.f32.mrf.mxu0 }
 0x20d   :  { %v1076_v13 = vadd.f32 %v1075_v58, %v953_v30  ;;  %v1333_v28 = vand.u32 4294901760, %v3493_v18  ;;  %v957_v56 = vadd.f32 %v956_v41, %v820_v3  ;;  %v826_v54 = vadd.f32 %v3371_v39, %v653_v44 }
 0x20e   :  { %v1201_v52 = vpop.f32.mrf.mxu2  ;;  %v1482_v27 = vpop.f32.mrf.mxu3 }
 0x20f   :  { %v1108_v63 = vmax.f32 %v1076_v13, 0.0  ;;  %v1202_v55 = vadd.f32 %v3410_v21, %v1201_v52  ;;  %1681 = vmatmul.f32.gmra.mxu0 %v3344_v50  ;;  %1848 = vmatmul.f32.gmra.mxu1 %v3974_v11  ;;  %v1334_v43 = vsub.f32 %v3493_v18, %v1333_v28 }
 0x211   :  { %v3509_v4 = vand.u32 4294901760, %v1108_v63  ;;  %v1335_v14 = vand.u32 4294901760, %v1334_v43  ;;  %v3511_v45 = vadd.f32 %v1478_v59, %v1202_v55  ;;  %v3975_v59 = vand.u32 4294901760, %v3344_v50 }
 0x213   :  { %v3514_v1 = vsub.f32 %v1108_v63, %v3509_v4  ;;  %1336 = vmatmul.f32.gmra.mxu2 %v1335_v14  ;;  %1549 = vmatmul.f32.gmra.mxu3 %v3509_v4 }
 0x214   :  { %v1079_v23 = vpop.f32.mrf.mxu1  ;;  %v960_v13 = vpop.f32.mrf.mxu0 }
 0x215   :  { %v1080_v30 = vadd.f32 %v1079_v23, %v957_v56  ;;  %v1341_v19 = vand.u32 4294901760, %v3514_v1  ;;  %v961_v11 = vadd.f32 %v960_v13, %v826_v54  ;;  %v3977_v54 = vand.u32 4294901760, %v3384_v26 }
 0x216   :  { %v1209_v7 = vpop.f32.mrf.mxu2  ;;  %v1486_v6 = vpop.f32.mrf.mxu3 }
 0x217   :  { %v1109_v58 = vmax.f32 %v1080_v30, 0.0  ;;  %v1210_v15 = vadd.f32 %v3410_v21, %v1209_v7  ;;  %1686 = vmatmul.f32.gmra.mxu0 %v3364_v24  ;;  %1854 = vmatmul.f32.gmra.mxu1 %v3975_v59  ;;  %v1342_v41 = vsub.f32 %v3514_v1, %v1341_v19 }
 0x219   :  { %v3527_v52 = vand.u32 4294901760, %v1109_v58  ;;  %v1343_v63 = vand.u32 4294901760, %v1342_v41  ;;  %v3529_v55 = vadd.f32 %v1482_v27, %v1210_v15  ;;  %v3976_v27 = vand.u32 4294901760, %v3364_v24 }
 0x21b   :  { %v3532_v43 = vsub.f32 %v1109_v58, %v3527_v52  ;;  %1344 = vmatmul.f32.gmra.mxu2 %v1343_v63  ;;  %1553 = vmatmul.f32.gmra.mxu3 %v3527_v52 }
 0x21c   :  { %v1083_v50 = vpop.f32.mrf.mxu1 }
 0x21d   :  { %v1084_v3 = vadd.f32 %v1083_v50, %v961_v11  ;;  %v1349_v17 = vand.u32 4294901760, %v3532_v43 }
 0x21e   :  { %v1217_v14 = vpop.f32.mrf.mxu2  ;;  %v1490_v56 = vpop.f32.mrf.mxu3 }
 0x21f   :  { %v1110_v23 = vmax.f32 %v1084_v3, 0.0  ;;  %v1218_v39 = vadd.f32 %v3410_v21, %v1217_v14  ;;  %1691 = vmatmul.f32.gmra.mxu0 %v3384_v26  ;;  %1860 = vmatmul.f32.gmra.mxu1 %v3976_v27  ;;  %v1350_v44 = vsub.f32 %v3532_v43, %v1349_v17 }
 0x221   :  { %v3543_v30 = vand.u32 4294901760, %v1110_v23  ;;  %v1351_v7 = vand.u32 4294901760, %v1350_v44  ;;  %v3545_v58 = vadd.f32 %v1486_v6, %v1218_v39 }
 0x223   :  { %v3548_v15 = vsub.f32 %v1110_v23, %v3543_v30  ;;  %1352 = vmatmul.f32.gmra.mxu2 %v1351_v7  ;;  %1557 = vmatmul.f32.gmra.mxu3 %v3543_v30  ;;  %v3978_v23 = vand.u32 4294901760, %v3404_v22 }
 0x225   :  { %v1357_v59 = vand.u32 4294901760, %v3548_v15 }
 0x226   :  { %v1225_v41 = vpop.f32.mrf.mxu2  ;;  %v1494_v24 = vpop.f32.mrf.mxu3 }
 0x227   :  { %v1226_v13 = vadd.f32 %v3410_v21, %v1225_v41  ;;  %1696 = vmatmul.f32.gmra.mxu0 %v3404_v22  ;;  %1866 = vmatmul.f32.gmra.mxu1 %v3977_v54  ;;  %v1358_v6 = vsub.f32 %v3548_v15, %v1357_v59 }
 0x229   :  { %v1359_v63 = vand.u32 4294901760, %v1358_v6  ;;  %v3559_v11 = vadd.f32 %v1490_v56, %v1226_v13 }
 0x22b   :  { %1360 = vmatmul.f32.gmra.mxu2 %v1359_v63  ;;  %2116 = vmatmul.f32.vlgmr.msra.gmra.mxu3 %v3043_v33 }
 0x22e   :  { %v1233_v50 = vpop.f32.mrf.mxu2  ;;  %v1498_v3 = vpop.f32.mrf.mxu3 }
 0x22f   :  { %v1234_v14 = vadd.f32 %v3410_v21, %v1233_v50  ;;  %1701 = vmatmul.f32.gmra.mxu0 %v3430_v8  ;;  %1872 = vmatmul.f32.gmra.mxu1 %v3978_v23 }
 0x231   :  { %v3566_v26 = vadd.f32 %v1494_v24, %v1234_v14 }
 0x233   :  { %1983 = vmatmul.f32.vlgmr.msra.gmra.mxu2 %v3043_v33  ;;  %2120 = vmatmul.f32.gmra.mxu3 %v3065_v29 }
 0x236   :  { %v1241_v56 = vpop.f32.mrf.mxu2  ;;  %v1502_v39 = vpop.f32.mrf.mxu3 }
 0x237   :  { %v1242_v27 = vadd.f32 %v3410_v21, %v1241_v56  ;;  %1706 = vmatmul.f32.gmra.mxu0 %v3451_v47  ;;  %1878 = vmatmul.f32.gmra.mxu1 %v1309_v25 }
 0x239   :  { %v3574_v44 = vadd.f32 %v1498_v3, %v1242_v27 }
 0x23b   :  { %1987 = vmatmul.f32.gmra.mxu2 %v3065_v29  ;;  %2124 = vmatmul.f32.gmra.mxu3 %v3086_v2 }
 0x23e   :  { %v1249_v22 = vpop.f32.mrf.mxu2  ;;  %v1506_v7 = vpop.f32.mrf.mxu3 }
 0x23f   :  { %v1250_v33 = vadd.f32 %v3410_v21, %v1249_v22  ;;  %1711 = vmatmul.f32.gmra.mxu0 %v3472_v38  ;;  %1884 = vmatmul.f32.gmra.mxu1 %v1317_v0 }
 0x241   :  { %v3582_v41 = vadd.f32 %v1502_v39, %v1250_v33 }
 0x243   :  { %1991 = vmatmul.f32.gmra.mxu2 %v3086_v2  ;;  %2128 = vmatmul.f32.gmra.mxu3 %v3107_v37 }
 0x246   :  { %v1257_v8 = vpop.f32.mrf.mxu2  ;;  %v1510_v25 = vpop.f32.mrf.mxu3 }
 0x247   :  { %v1258_v29 = vadd.f32 %v3410_v21, %v1257_v8  ;;  %1716 = vmatmul.f32.gmra.mxu0 %v3493_v18  ;;  %1890 = vmatmul.f32.gmra.mxu1 %v1325_v48 }
 0x249   :  { %v3590_v24 = vadd.f32 %v1506_v7, %v1258_v29 }
 0x24b   :  { %1995 = vmatmul.f32.gmra.mxu2 %v3107_v37  ;;  %2132 = vmatmul.f32.gmra.mxu3 %v3126_v51 }
 0x24e   :  { %v1265_v47 = vpop.f32.mrf.mxu2  ;;  %v1514_v0 = vpop.f32.mrf.mxu3 }
 0x24f   :  { %v1266_v2 = vadd.f32 %v3410_v21, %v1265_v47  ;;  %1721 = vmatmul.f32.gmra.mxu0 %v3514_v1  ;;  %1896 = vmatmul.f32.gmra.mxu1 %v1333_v28 }
 0x251   :  { %v3598_v13 = vadd.f32 %v1510_v25, %v1266_v2 }
 0x253   :  { %1999 = vmatmul.f32.gmra.mxu2 %v3126_v51  ;;  %2136 = vmatmul.f32.gmra.mxu3 %v3145_v40  ;;  %v3610_v51 = vpop.f32.mrf.mxu0 }
 0x256   :  { %v1273_v38 = vpop.f32.mrf.mxu2  ;;  %v1518_v48 = vpop.f32.mrf.mxu3 }
 0x257   :  { %v1274_v37 = vadd.f32 %v3410_v21, %v1273_v38  ;;  %1726 = vmatmul.f32.gmra.mxu0 %v3532_v43  ;;  %1902 = vmatmul.f32.gmra.mxu1 %v1341_v19  ;;  %v3620_v19 = vpop.f32.mrf.mxu1 }
 0x259   :  { %v3606_v54 = vadd.f32 %v1514_v0, %v1274_v37 }
 0x25b   :  { %2003 = vmatmul.f32.gmra.mxu2 %v3145_v40  ;;  %2140 = vmatmul.f32.gmra.mxu3 %v3166_v53  ;;  %v1617_v8 = vpop.f32.mrf.mxu0 }
 0x25e   :  { %v1281_v18 = vpop.f32.mrf.mxu2  ;;  %v1522_v28 = vpop.f32.mrf.mxu3 }
 0x25f   :  { %v1282_v6 = vadd.f32 %v3410_v21, %v1281_v18  ;;  %1731 = vmatmul.f32.gmra.mxu0 %v3548_v15  ;;  %1908 = vmatmul.f32.gmra.mxu1 %v1349_v17 }
 0x261   :  { %v3616_v63 = vadd.f32 %v1518_v48, %v1282_v6 }
 0x263   :  { %2007 = vmatmul.f32.gmra.mxu2 %v3166_v53  ;;  %2144 = vmatmul.f32.gmra.mxu3 %v3192_v57 }
 0x266   :  { %v1289_v40 = vpop.f32.mrf.mxu2  ;;  %v1526_v1 = vpop.f32.mrf.mxu3 }
 0x267   :  { %v1290_v50 = vadd.f32 %v3410_v21, %v1289_v40  ;;  %1914 = vmatmul.f32.gmra.mxu1 %v1357_v59 }
 0x269   :  { %v3625_v3 = vadd.f32 %v1522_v28, %v1290_v50 }
 0x26b   :  { %2011 = vmatmul.f32.gmra.mxu2 %v3192_v57  ;;  %2148 = vmatmul.f32.gmra.mxu3 %v3213_v42 }
 0x26e   :  { %v1297_v43 = vpop.f32.mrf.mxu2  ;;  %v1530_v17 = vpop.f32.mrf.mxu3 }
 0x26f   :  { %v1298_v53 = vadd.f32 %v3410_v21, %v1297_v43 }
 0x271   :  { %v3630_v14 = vadd.f32 %v1526_v1, %v1298_v53 }
 0x273   :  { %2015 = vmatmul.f32.gmra.mxu2 %v3213_v42  ;;  %2152 = vmatmul.f32.gmra.mxu3 %v3233_v5 }
 0x276   :  { %v1305_v23 = vpop.f32.mrf.mxu2  ;;  %v1534_v56 = vpop.f32.mrf.mxu3 }
 0x277   :  { %v1306_v15 = vadd.f32 %v3410_v21, %v1305_v23 }
 0x279   :  { %v3635_v59 = vadd.f32 %v1530_v17, %v1306_v15 }
 0x27b   :  { %2019 = vmatmul.f32.gmra.mxu2 %v3233_v5  ;;  %2156 = vmatmul.f32.gmra.mxu3 %v3253_v34  ;;  %v1777_v5 = vpop.f32.mrf.mxu1 }
 0x27e   :  { %v1313_v57 = vpop.f32.mrf.mxu2  ;;  %v1538_v39 = vpop.f32.mrf.mxu3 }
 0x27f   :  { %v1314_v27 = vadd.f32 %v3410_v21, %v1313_v57 }
 0x281   :  { %v3640_v22 = vadd.f32 %v1534_v56, %v1314_v27 }
 0x283   :  { %2023 = vmatmul.f32.gmra.mxu2 %v3253_v34  ;;  %2160 = vmatmul.f32.gmra.mxu3 %v3275_v16  ;;  %v1622_v34 = vpop.f32.mrf.mxu0  ;;  %v1783_v38 = vpop.f32.mrf.mxu1 }
 0x286   :  { %v1321_v42 = vpop.f32.mrf.mxu2  ;;  %v1542_v7 = vpop.f32.mrf.mxu3 }
 0x287   :  { %v1322_v33 = vadd.f32 %v3410_v21, %v1321_v42  ;;  %v1613_v42 = vadd.f32 %v3610_v51, %v3427_v46 }
 0x289   :  { %v3645_v25 = vadd.f32 %v1538_v39, %v1322_v33  ;;  %v3979_v33 = vld [vmem:[#allocation29_spill] sm:$0xff] }
 0x28b   :  { %2027 = vmatmul.f32.gmra.mxu2 %v3275_v16  ;;  %2164 = vmatmul.f32.gmra.mxu3 %v3297_v35  ;;  %v1627_v16 = vpop.f32.mrf.mxu0  ;;  %v1789_v1 = vpop.f32.mrf.mxu1 }
 0x28e   :  { %v1329_v29 = vpop.f32.mrf.mxu2  ;;  %v1546_v47 = vpop.f32.mrf.mxu3 }
 0x28f   :  { %v1330_v0 = vadd.f32 %v3410_v21, %v1329_v29  ;;  %v1772_v29 = vadd.f32 %v3620_v19, %v1613_v42 }
 0x291   :  { %v3650_v2 = vadd.f32 %v1542_v7, %v1330_v0 }
 0x293   :  { %2031 = vmatmul.f32.gmra.mxu2 %v3297_v35  ;;  %2168 = vmatmul.f32.gmra.mxu3 %v3319_v62  ;;  %v1632_v53 = vpop.f32.mrf.mxu0 }
 0x296   :  { %v1337_v48 = vpop.f32.mrf.mxu2  ;;  %v1550_v37 = vpop.f32.mrf.mxu3 }
 0x297   :  { %v1338_v18 = vadd.f32 %v3410_v21, %v1337_v48 }
 0x299   :  { %v3655_v28 = vadd.f32 %v1546_v47, %v1338_v18 }
 0x29b   :  { %2035 = vmatmul.f32.gmra.mxu2 %v3319_v62  ;;  %2172 = vmatmul.f32.gmra.mxu3 %v3339_v60  ;;  %v1795_v62 = vpop.f32.mrf.mxu1  ;;  %v1637_v27 = vpop.f32.mrf.mxu0 }
 0x29e   :  { %v1345_v6 = vpop.f32.mrf.mxu2  ;;  %v1554_v40 = vpop.f32.mrf.mxu3 }
 0x29f   :  { %v1346_v50 = vadd.f32 %v3410_v21, %v1345_v6 }
 0x2a1   :  { %v3660_v35 = vadd.f32 %v1550_v37, %v1346_v50 }
 0x2a3   :  { %2039 = vmatmul.f32.gmra.mxu2 %v3339_v60  ;;  %2176 = vmatmul.f32.gmra.mxu3 %v3359_v9  ;;  %v1801_v7 = vpop.f32.mrf.mxu1  ;;  %v1642_v37 = vpop.f32.mrf.mxu0 }
 0x2a6   :  { %v1353_v43 = vpop.f32.mrf.mxu2  ;;  %v1558_v17 = vpop.f32.mrf.mxu3 }
 0x2a7   :  { %v1354_v23 = vadd.f32 %v3410_v21, %v1353_v43 }
 0x2a9   :  { %v3665_v56 = vadd.f32 %v1554_v40, %v1354_v23  ;;  %v1623_v40 = vadd.f32 %v1622_v34, %v3469_v49 }
 0x2ab   :  { %2043 = vmatmul.f32.gmra.mxu2 %v3359_v9  ;;  %2180 = vmatmul.f32.gmra.mxu3 %v3381_v10 }
 0x2ae   :  { %v1361_v15 = vpop.f32.mrf.mxu2  ;;  %v2117_v57 = vpop.f32.mrf.mxu3 }
 0x2af   :  { %v1362_v39 = vadd.f32 %v3410_v21, %v1361_v15  ;;  %v1618_v21 = vadd.f32 %v1617_v8, %v3448_v36  ;;  %v1784_v36 = vadd.f32 %v1783_v38, %v1623_v40  ;;  %v1647_v8 = vpop.f32.mrf.mxu0  ;;  %v1628_v15 = vadd.f32 %v1627_v16, %v3490_v20 }
 0x2b1   :  { %v3670_v60 = vadd.f32 %v1558_v17, %v1362_v39  ;;  %v1778_v46 = vadd.f32 %v1777_v5, %v1618_v21  ;;  %v1643_v21 = vadd.f32 %v1642_v37, %v3545_v58 }
 0x2b3   :  { %2047 = vmatmul.f32.gmra.mxu2 %v3381_v10  ;;  %2184 = vmatmul.f32.gmra.mxu3 %v3979_v33  ;;  %v1807_v10 = vpop.f32.mrf.mxu1 }
 0x2b6   :  { %v1984_v9 = vpop.f32.mrf.mxu2  ;;  %v2121_v47 = vpop.f32.mrf.mxu3 }
 0x2b7   :  { %v1985_v0 = vadd.f32 %v1984_v9, %v1772_v29  ;;  %v1652_v38 = vpop.f32.mrf.mxu0 }
 0x2b9   :  { %v2118_v48 = vadd.f32 %v2117_v57, %v1985_v0 }
 0x2bb   :  { %2217 = vst.msk [vmem:[%s3821_s5] sm:$0xff] %vm2216_vm1, %v2118_v48  ;;  %2051 = vmatmul.f32.gmra.mxu2 %v3979_v33  ;;  %2188 = vmatmul.f32.gmra.mxu3 %v3425_v31  ;;  %v1813_v43 = vpop.f32.mrf.mxu1  ;;  %v1633_v33 = vadd.f32 %v1632_v53, %v3511_v45 }
 0x2be   :  { %v1988_v51 = vpop.f32.mrf.mxu2  ;;  %v2125_v19 = vpop.f32.mrf.mxu3 }
 0x2bf   :  { %v1989_v18 = vadd.f32 %v1988_v51, %v1778_v46  ;;  %v1657_v29 = vpop.f32.mrf.mxu0 }
 0x2c1   :  { %v2122_v6 = vadd.f32 %v2121_v47, %v1989_v18  ;;  %v1638_v47 = vadd.f32 %v1637_v27, %v3529_v55  ;;  %v1648_v18 = vadd.f32 %v1647_v8, %v3559_v11 }
 0x2c3   :  { %2218 = vst.msk [vmem:[%s3821_s5 + $0x8] sm:$0xff] %vm2216_vm1, %v2122_v6  ;;  %2055 = vmatmul.f32.gmra.mxu2 %v3425_v31  ;;  %2192 = vmatmul.f32.gmra.mxu3 %v3446_v32  ;;  %v1790_v31 = vadd.f32 %v1789_v1, %v1628_v15  ;;  %v1819_v39 = vpop.f32.mrf.mxu1  ;;  %v1658_v15 = vadd.f32 %v1657_v29, %v3574_v44 }
 0x2c6   :  { %v1992_v50 = vpop.f32.mrf.mxu2  ;;  %v2129_v5 = vpop.f32.mrf.mxu3 }
 0x2c7   :  { %v1993_v17 = vadd.f32 %v1992_v50, %v1784_v36  ;;  %v1662_v46 = vpop.f32.mrf.mxu0  ;;  %v1653_v50 = vadd.f32 %v1652_v38, %v3566_v26 }
 0x2c9   :  { %v2126_v23 = vadd.f32 %v2125_v19, %v1993_v17  ;;  %v1820_v11 = vadd.f32 %v1819_v39, %v1653_v50 }
 0x2cb   :  { %2219 = vst.msk [vmem:[%s3821_s5 + $0x10] sm:$0xff] %vm2216_vm1, %v2126_v23  ;;  %2059 = vmatmul.f32.gmra.mxu2 %v3446_v32  ;;  %2196 = vmatmul.f32.gmra.mxu3 %v3467_v61  ;;  %v1796_v32 = vadd.f32 %v1795_v62, %v1633_v33  ;;  %v1825_v0 = vpop.f32.mrf.mxu1 }
 0x2cc   :  { %v1826_v26 = vadd.f32 %v1825_v0, %v1658_v15 }
 0x2ce   :  { %v1996_v49 = vpop.f32.mrf.mxu2  ;;  %v2133_v34 = vpop.f32.mrf.mxu3 }
 0x2cf   :  { %v1997_v57 = vadd.f32 %v1996_v49, %v1790_v31  ;;  %v1667_v58 = vpop.f32.mrf.mxu0 }
 0x2d1   :  { %v2130_v42 = vadd.f32 %v2129_v5, %v1997_v57  ;;  %v1663_v57 = vadd.f32 %v1662_v46, %v3582_v41 }
 0x2d3   :  { %2220 = vst.msk [vmem:[%s3821_s5 + $0x18] sm:$0xff] %vm2216_vm1, %v2130_v42  ;;  %2063 = vmatmul.f32.gmra.mxu2 %v3467_v61  ;;  %2200 = vmatmul.f32.gmra.mxu3 %v3488_v12  ;;  %v1802_v61 = vadd.f32 %v1801_v7, %v1638_v47  ;;  %v1831_v55 = vpop.f32.mrf.mxu1 }
 0x2d4   :  { %v1832_v44 = vadd.f32 %v1831_v55, %v1663_v57 }
 0x2d6   :  { %v2000_v20 = vpop.f32.mrf.mxu2  ;;  %v2137_v16 = vpop.f32.mrf.mxu3 }
 0x2d7   :  { %v2001_v1 = vadd.f32 %v2000_v20, %v1796_v32  ;;  %v1672_v5 = vpop.f32.mrf.mxu0 }
 0x2d9   :  { %v2134_v9 = vadd.f32 %v2133_v34, %v2001_v1 }
 0x2db   :  { %2221 = vst.msk [vmem:[%s3821_s5 + $0x20] sm:$0xff] %vm2216_vm1, %v2134_v9  ;;  %2067 = vmatmul.f32.gmra.mxu2 %v3488_v12  ;;  %2204 = vmatmul.f32.gmra.mxu3 %v3509_v4  ;;  %v1808_v12 = vadd.f32 %v1807_v10, %v1643_v21  ;;  %v1837_v6 = vpop.f32.mrf.mxu1 }
 0x2de   :  { %v2004_v45 = vpop.f32.mrf.mxu2  ;;  %v2141_v53 = vpop.f32.mrf.mxu3 }
 0x2df   :  { %v2005_v62 = vadd.f32 %v2004_v45, %v1802_v61  ;;  %v1677_v38 = vpop.f32.mrf.mxu0  ;;  %v1673_v45 = vadd.f32 %v1672_v5, %v3598_v13 }
 0x2e0   :  { %v1678_v55 = vadd.f32 %v1677_v38, %v3606_v54 }
 0x2e1   :  { %v2138_v48 = vadd.f32 %v2137_v16, %v2005_v62  ;;  %v1668_v16 = vadd.f32 %v1667_v58, %v3590_v24 }
 0x2e3   :  { %2222 = vst.msk [vmem:[%s3821_s5 + $0x28] sm:$0xff] %vm2216_vm1, %v2138_v48  ;;  %2071 = vmatmul.f32.gmra.mxu2 %v3509_v4  ;;  %2208 = vmatmul.f32.gmra.mxu3 %v3527_v52  ;;  %v1814_v4 = vadd.f32 %v1813_v43, %v1648_v18  ;;  %v1843_v17 = vpop.f32.mrf.mxu1  ;;  %v1838_v41 = vadd.f32 %v1837_v6, %v1668_v16 }
 0x2e4   :  { %v1844_v24 = vadd.f32 %v1843_v17, %v1673_v45 }
 0x2e6   :  { %v2008_v27 = vpop.f32.mrf.mxu2  ;;  %v2145_v7 = vpop.f32.mrf.mxu3 }
 0x2e7   :  { %v2009_v51 = vadd.f32 %v2008_v27, %v1808_v12  ;;  %v1682_v1 = vpop.f32.mrf.mxu0 }
 0x2e8   :  { %v1683_v58 = vadd.f32 %v1682_v1, %v3616_v63 }
 0x2e9   :  { %v2142_v19 = vadd.f32 %v2141_v53, %v2009_v51 }
 0x2eb   :  { %2223 = vst.msk [vmem:[%s3821_s5 + $0x30] sm:$0xff] %vm2216_vm1, %v2142_v19  ;;  %2075 = vmatmul.f32.gmra.mxu2 %v3527_v52  ;;  %2212 = vmatmul.f32.gmra.mxu3 %v3543_v30  ;;  %v1849_v39 = vpop.f32.mrf.mxu1 }
 0x2ec   :  { %v1850_v13 = vadd.f32 %v1849_v39, %v1678_v55 }
 0x2ee   :  { %v2012_v37 = vpop.f32.mrf.mxu2  ;;  %v2149_v10 = vpop.f32.mrf.mxu3 }
 0x2ef   :  { %v2013_v40 = vadd.f32 %v2012_v37, %v1814_v4  ;;  %v1687_v53 = vpop.f32.mrf.mxu0 }
 0x2f0   :  { %v1688_v50 = vadd.f32 %v1687_v53, %v3625_v3 }
 0x2f1   :  { %v2146_v36 = vadd.f32 %v2145_v7, %v2013_v40 }
 0x2f3   :  { %2224 = vst.msk [vmem:[%s3821_s5 + $0x38] sm:$0xff] %vm2216_vm1, %v2146_v36  ;;  %2079 = vmatmul.f32.gmra.mxu2 %v3543_v30  ;;  %v1855_v29 = vpop.f32.mrf.mxu1 }
 0x2f4   :  { %v1856_v54 = vadd.f32 %v1855_v29, %v1683_v58 }
 0x2f6   :  { %v2016_v52 = vpop.f32.mrf.mxu2  ;;  %v2153_v8 = vpop.f32.mrf.mxu3 }
 0x2f7   :  { %v2017_v43 = vadd.f32 %v2016_v52, %v1820_v11  ;;  %v1692_v51 = vpop.f32.mrf.mxu0 }
 0x2f8   :  { %v1693_v17 = vadd.f32 %v1692_v51, %v3630_v14 }
 0x2f9   :  { %v2150_v23 = vadd.f32 %v2149_v10, %v2017_v43 }
 0x2fb   :  { %2225 = vst.msk [vmem:[%s3821_s5 + $0x40] sm:$0xff] %vm2216_vm1, %v2150_v23  ;;  %v1861_v21 = vpop.f32.mrf.mxu1 }
 0x2fc   :  { %v1862_v63 = vadd.f32 %v1861_v21, %v1688_v50 }
 0x2fe   :  { %v2020_v31 = vpop.f32.mrf.mxu2  ;;  %v2157_v49 = vpop.f32.mrf.mxu3 }
 0x2ff   :  { %v2021_v34 = vadd.f32 %v2020_v31, %v1826_v26  ;;  %v1697_v40 = vpop.f32.mrf.mxu0 }
 0x300   :  { %v1698_v38 = vadd.f32 %v1697_v40, %v3635_v59 }
 0x301   :  { %v2154_v30 = vadd.f32 %v2153_v8, %v2021_v34 }
 0x303   :  { %2226 = vst.msk [vmem:[%s3821_s5 + $0x48] sm:$0xff] %vm2216_vm1, %v2154_v30  ;;  %v1867_v18 = vpop.f32.mrf.mxu1 }
 0x304   :  { %v1868_v3 = vadd.f32 %v1867_v18, %v1693_v17 }
 0x306   :  { %v2024_v42 = vpop.f32.mrf.mxu2  ;;  %v2161_v33 = vpop.f32.mrf.mxu3 }
 0x307   :  { %v2025_v32 = vadd.f32 %v2024_v42, %v1832_v44  ;;  %v1702_v23 = vpop.f32.mrf.mxu0 }
 0x309   :  { %v2158_v20 = vadd.f32 %v2157_v49, %v2025_v32  ;;  %v1703_v32 = vadd.f32 %v1702_v23, %v3640_v22 }
 0x30b   :  { %2227 = vst.msk [vmem:[%s3821_s5 + $0x50] sm:$0xff] %vm2216_vm1, %v2158_v20  ;;  %v1873_v11 = vpop.f32.mrf.mxu1 }
 0x30c   :  { %v1874_v14 = vadd.f32 %v1873_v11, %v1698_v38 }
 0x30e   :  { %v2028_v9 = vpop.f32.mrf.mxu2  ;;  %v2165_v47 = vpop.f32.mrf.mxu3 }
 0x30f   :  { %v2029_v0 = vadd.f32 %v2028_v9, %v1838_v41  ;;  %v1707_v30 = vpop.f32.mrf.mxu0 }
 0x311   :  { %v2162_v61 = vadd.f32 %v2161_v33, %v2029_v0 }
 0x313   :  { %2228 = vst.msk [vmem:[%s3821_s5 + $0x58] sm:$0xff] %vm2216_vm1, %v2162_v61  ;;  %v1879_v15 = vpop.f32.mrf.mxu1 }
 0x314   :  { %v1880_v59 = vadd.f32 %v1879_v15, %v1703_v32 }
 0x316   :  { %v2032_v62 = vpop.f32.mrf.mxu2  ;;  %v2169_v48 = vpop.f32.mrf.mxu3 }
 0x317   :  { %v2033_v46 = vadd.f32 %v2032_v62, %v1844_v24  ;;  %v1712_v41 = vpop.f32.mrf.mxu0 }
 0x318   :  { %v1713_v62 = vadd.f32 %v1712_v41, %v3650_v2 }
 0x319   :  { %v2166_v12 = vadd.f32 %v2165_v47, %v2033_v46  ;;  %v1708_v47 = vadd.f32 %v1707_v30, %v3645_v25 }
 0x31b   :  { %2229 = vst.msk [vmem:[%s3821_s5 + $0x60] sm:$0xff] %vm2216_vm1, %v2166_v12  ;;  %v1885_v42 = vpop.f32.mrf.mxu1 }
 0x31c   :  { %v1886_v22 = vadd.f32 %v1885_v42, %v1708_v47 }
 0x31e   :  { %v2036_v27 = vpop.f32.mrf.mxu2  ;;  %v2173_v7 = vpop.f32.mrf.mxu3 }
 0x31f   :  { %v2037_v19 = vadd.f32 %v2036_v27, %v1850_v13  ;;  %v1717_v53 = vpop.f32.mrf.mxu0 }
 0x320   :  { %v1718_v13 = vadd.f32 %v1717_v53, %v3655_v28 }
 0x321   :  { %v2170_v4 = vadd.f32 %v2169_v48, %v2037_v19 }
 0x323   :  { %2230 = vst.msk [vmem:[%s3821_s5 + $0x68] sm:$0xff] %vm2216_vm1, %v2170_v4  ;;  %v1891_v9 = vpop.f32.mrf.mxu1 }
 0x324   :  { %v1892_v25 = vadd.f32 %v1891_v9, %v1713_v62 }
 0x326   :  { %v2040_v37 = vpop.f32.mrf.mxu2  ;;  %v2177_v10 = vpop.f32.mrf.mxu3 }
 0x327   :  { %v2041_v6 = vadd.f32 %v2040_v37, %v1856_v54  ;;  %v1722_v27 = vpop.f32.mrf.mxu0 }
 0x328   :  { %v1723_v4 = vadd.f32 %v1722_v27, %v3660_v35 }
 0x329   :  { %v2174_v36 = vadd.f32 %v2173_v7, %v2041_v6 }
 0x32b   :  { %2231 = vst.msk [vmem:[%s3821_s5 + $0x70] sm:$0xff] %vm2216_vm1, %v2174_v36  ;;  %v1897_v48 = vpop.f32.mrf.mxu1 }
 0x32c   :  { %v1898_v2 = vadd.f32 %v1897_v48, %v1718_v13 }
 0x32e   :  { %v2044_v52 = vpop.f32.mrf.mxu2  ;;  %v2181_v8 = vpop.f32.mrf.mxu3 }
 0x32f   :  { %v2045_v5 = vadd.f32 %v2044_v52, %v1862_v63  ;;  %v1727_v54 = vpop.f32.mrf.mxu0 }
 0x330   :  { %v1728_v36 = vadd.f32 %v1727_v54, %v3665_v56 }
 0x331   :  { %v2178_v43 = vadd.f32 %v2177_v10, %v2045_v5 }
 0x333   :  { %2232 = vst.msk [vmem:[%s3821_s5 + $0x78] sm:$0xff] %vm2216_vm1, %v2178_v43  ;;  %v1903_v7 = vpop.f32.mrf.mxu1 }
 0x334   :  { %v1904_v28 = vadd.f32 %v1903_v7, %v1723_v4 }
 0x336   :  { %v2048_v26 = vpop.f32.mrf.mxu2  ;;  %v2185_v31 = vpop.f32.mrf.mxu3 }
 0x337   :  { %v2049_v49 = vadd.f32 %v2048_v26, %v1868_v3  ;;  %v1732_v52 = vpop.f32.mrf.mxu0 }
 0x338   :  { %v1733_v43 = vadd.f32 %v1732_v52, %v3670_v60 }
 0x339   :  { %v2182_v34 = vadd.f32 %v2181_v8, %v2049_v49 }
 0x33b   :  { %2233 = vst.msk [vmem:[%s3821_s5 + $0x80] sm:$0xff] %vm2216_vm1, %v2182_v34  ;;  %v1909_v6 = vpop.f32.mrf.mxu1 }
 0x33c   :  { %v1910_v35 = vadd.f32 %v1909_v6, %v1728_v36 }
 0x33e   :  { %v2052_v57 = vpop.f32.mrf.mxu2  ;;  %v2189_v39 = vpop.f32.mrf.mxu3 }
 0x33f   :  { %v2053_v44 = vadd.f32 %v2052_v57, %v1874_v14 }
 0x341   :  { %v2186_v33 = vadd.f32 %v2185_v31, %v2053_v44 }
 0x343   :  { %2234 = vst.msk [vmem:[%s3821_s5 + $0x88] sm:$0xff] %vm2216_vm1, %v2186_v33  ;;  %v1915_v5 = vpop.f32.mrf.mxu1 }
 0x344   :  { %v1916_v56 = vadd.f32 %v1915_v5, %v1733_v43 }
 0x346   :  { %v2056_v20 = vpop.f32.mrf.mxu2  ;;  %v2193_v16 = vpop.f32.mrf.mxu3 }
 0x347   :  { %v2057_v1 = vadd.f32 %v2056_v20, %v1880_v59 }
 0x349   :  { %v2190_v29 = vadd.f32 %v2189_v39, %v2057_v1 }
 0x34b   :  { %2235 = vst.msk [vmem:[%s3821_s5 + $0x90] sm:$0xff] %vm2216_vm1, %v2190_v29 }
 0x34e   :  { %v2060_v0 = vpop.f32.mrf.mxu2  ;;  %v2197_v45 = vpop.f32.mrf.mxu3 }
 0x34f   :  { %v2061_v61 = vadd.f32 %v2060_v0, %v1886_v22 }
 0x351   :  { %v2194_v24 = vadd.f32 %v2193_v16, %v2061_v61 }
 0x353   :  { %2236 = vst.msk [vmem:[%s3821_s5 + $0x98] sm:$0xff] %vm2216_vm1, %v2194_v24 }
 0x356   :  { %v2064_v21 = vpop.f32.mrf.mxu2  ;;  %v2201_v55 = vpop.f32.mrf.mxu3 }
 0x357   :  { %v2065_v46 = vadd.f32 %v2064_v21, %v1892_v25 }
 0x359   :  { %v2198_v12 = vadd.f32 %v2197_v45, %v2065_v46 }
 0x35b   :  { %2237 = vst.msk [vmem:[%s3821_s5 + $0xa0] sm:$0xff] %vm2216_vm1, %v2198_v12 }
 0x35e   :  { %v2068_v51 = vpop.f32.mrf.mxu2  ;;  %v2205_v58 = vpop.f32.mrf.mxu3 }
 0x35f   :  { %v2069_v19 = vadd.f32 %v2068_v51, %v1898_v2 }
 0x361   :  { %v2202_v18 = vadd.f32 %v2201_v55, %v2069_v19 }
 0x363   :  { %2238 = vst.msk [vmem:[%s3821_s5 + $0xa8] sm:$0xff] %vm2216_vm1, %v2202_v18 }
 0x366   :  { %v2072_v37 = vpop.f32.mrf.mxu2  ;;  %v2209_v50 = vpop.f32.mrf.mxu3 }
 0x367   :  { %v2073_v10 = vadd.f32 %v2072_v37, %v1904_v28 }
 0x369   :  { %v2206_v40 = vadd.f32 %v2205_v58, %v2073_v10 }
 0x36b   :  { %2239 = vst.msk [vmem:[%s3821_s5 + $0xb0] sm:$0xff] %vm2216_vm1, %v2206_v40 }
 0x36e   :  { %v2076_v11 = vpop.f32.mrf.mxu2  ;;  %v2213_v3 = vpop.f32.mrf.mxu3 }
 0x36f   :  { %v2077_v63 = vadd.f32 %v2076_v11, %v1910_v35 }
 0x371   :  { %v2210_v8 = vadd.f32 %v2209_v50, %v2077_v63 }
 0x373   :  { %2240 = vst.msk [vmem:[%s3821_s5 + $0xb8] sm:$0xff] %vm2216_vm1, %v2210_v8 }
 0x376   :  { %v2080_v17 = vpop.f32.mrf.mxu2 }
 0x377   :  { %v2081_v23 = vadd.f32 %v2080_v17, %v1916_v56 }
 0x379   :  { %v2214_v15 = vadd.f32 %v2213_v3, %v2081_v23 }
 0x37b   :  { %2241 = vst.msk [vmem:[%s3821_s5 + $0xc0] sm:$0xff] %vm2216_vm1, %v2214_v15 }

</bundles_post_ra>
